<compile_context>
chip_gen: v6e
topology: v6e:2x2x1
jax: 0.10.0
libtpu: 0.0.40
codegen_flags: <defaults>
</compile_context>

<pallas_src>
import functools

import jax
import jax.numpy as jnp
from jax import lax
from jax.experimental import pallas as pl
from jax.experimental.pallas import tpu as pltpu

_VMEM_LIMIT = 64 * 1024 * 1024   # scoped-VMEM cap (review: raise toward 64 MiB)
_VMEM_BUDGET = 40 * 1024 * 1024  # target working set -> headroom under the cap


def _round_up(x, m):
    return ((x + m - 1) // m) * m


# ------------------------------ Pallas kernels ------------------------------ #

def _fc_kernel(z_ref, w_ref, b_ref, o_ref):
    # O(N, TN) = Z(N, Zd) @ W(Zd, TN) + bias(1, TN); lane dim = TN (dense).
    acc = jnp.dot(z_ref[...], w_ref[...], preferred_element_type=jnp.float32)
    o_ref[...] = (acc + b_ref[...]).astype(o_ref.dtype)


def _convt_s2_kernel(xa_ref, xh_ref, w_ref, b_ref, o_ref, x9_ref,
                     *, offsets, tm, cinp, act):
    """One lane tile of all 4 phases of ConvTranspose2d(k=4, s=2, p=1).

    xa_ref : (Cinp, TM)  bf16   current lane tile of the padded, flat input
    xh_ref : (Cinp, HW)  bf16   pre-gathered narrow halo (right neighbour)
    w_ref  : (4*Cout, 9*Cinp) bf16  phase+tap stacked weights (zero blocks for
             unused (phase, offset) pairs)
    b_ref  : (4*Cout, 1) f32 bias (per phase copy of the layer bias)
    o_ref  : (4*Cout, TM) output tile (lane dim = TM, dense stores)
    x9_ref : (9*Cinp, TM) bf16 VMEM scratch - K-stacked shifted views.
    """
    # Stage the 9 unique shifted views once (deduplicated across phases).
    for r, off in enumerate(offsets):
        lo, hi = r * cinp, (r + 1) * cinp
        if off == 0:
            x9_ref[lo:hi, :] = xa_ref[...]
        else:
            x9_ref[lo:hi, :tm - off] = xa_ref[:, off:]
            x9_ref[lo:hi, tm - off:] = xh_ref[:, :off]

    # Single long-K MXU matmul for all 4 phases, f32 accumulation.
    acc = jnp.dot(w_ref[...], x9_ref[...], preferred_element_type=jnp.float32)
    acc = acc + b_ref[...]                       # bias once, in the epilogue
    if act == "leaky_relu":
        acc = jnp.where(acc >= 0.0, acc, 0.05 * acc)
    elif act == "tanh":
        acc = jnp.tanh(acc)
    o_ref[...] = acc.astype(o_ref.dtype)


# ------------------------- one-time weight repacking ------------------------ #

# Phase decomposition for K=4, stride=2, pad=1:
#   output parity 0 uses kernel taps {ky=1 at dy=0, ky=3 at dy=-1}
#   output parity 1 uses kernel taps {ky=2 at dy=0, ky=0 at dy=+1}
_TAP = ({0: 1, -1: 3}, {0: 2, 1: 0})


def _pack_conv(w, b):
    """w: (Cin, Cout, 4, 4), b: (Cout,) -> (W_all (4*Cout, 9*Cinp) bf16,
    bias (4*Cout, 1) f32).  Row blocks = phase p = 2*py+px; column blocks =
    offset r = 3*(dy+1)+(dx+1); unused (phase, offset) blocks are zero."""
    cin, cout, k, _ = w.shape
    assert k == 4
    cinp = _round_up(cin, 16)                    # bf16 sublane-aligned channels
    w_all = jnp.zeros((4 * cout, 9 * cinp), jnp.float32)
    for py in range(2):
        for px in range(2):
            p = 2 * py + px
            for dy in (-1, 0, 1):
                ky = _TAP[py].get(dy)
                if ky is None:
                    continue
                for dx in (-1, 0, 1):
                    kx = _TAP[px].get(dx)
                    if kx is None:
                        continue
                    r = 3 * (dy + 1) + (dx + 1)
                    w_all = w_all.at[p * cout:(p + 1) * cout,
                                     r * cinp:r * cinp + cin].set(w[:, :, ky, kx].T)
    b_all = jnp.tile(b, 4).reshape(4 * cout, 1).astype(jnp.float32)
    return w_all.astype(jnp.bfloat16), b_all


def _pack_fc(w, b):
    """w: (z_dim, Cout, k0, k0), b: (Cout,) -> padded GEMM weight/bias."""
    zd, cout, k0, _ = w.shape
    cfc = cout * k0 * k0
    tn = min(2048, _round_up(cfc, 128))
    cp = _round_up(cfc, tn)
    w_mat = jnp.pad(w.reshape(zd, cfc), ((0, 0), (0, cp - cfc))).astype(jnp.bfloat16)
    b_mat = jnp.pad(jnp.repeat(b, k0 * k0).reshape(1, cfc),
                    ((0, 0), (0, cp - cfc))).astype(jnp.float32)
    return w_mat, b_mat


def pack_params(params):
    """One-time repack of all layer weights (done outside the forward pass)."""
    (wf, bf), *convs = params
    packed = [_pack_fc(wf, bf)]
    for (w, b) in convs:
        packed.append(_pack_conv(w, b))
    return tuple(packed)


# ------------------------------- layer wrappers ----------------------------- #

def fc_layer(z, w_mat, b_mat, cout, k0):
    """ConvTranspose2d(z_dim, Cout, k0, stride=1, pad=0) on a 1x1 input.

    z: (N, z_dim) -> activations in GEMM-native layout (Cout, N, k0, k0) bf16.
    """
    n, zd = z.shape
    cp = w_mat.shape[1]
    cfc = cout * k0 * k0
    tn = min(2048, cp)

    out = pl.pallas_call(
        _fc_kernel,
        out_shape=jax.ShapeDtypeStruct((n, cp), jnp.bfloat16),
        grid=(cp // tn,),
        in_specs=[
            pl.BlockSpec((n, zd), lambda j: (0, 0)),
            pl.BlockSpec((zd, tn), lambda j: (0, j)),
            pl.BlockSpec((1, tn), lambda j: (0, j)),
        ],
        out_specs=pl.BlockSpec((n, tn), lambda j: (0, j)),
        compiler_params=pltpu.CompilerParams(
            dimension_semantics=("parallel",),
            vmem_limit_bytes=_VMEM_LIMIT),
    )(z.astype(jnp.bfloat16), w_mat, b_mat)

    out = out[:, :cfc].reshape(n, cout, k0, k0)
    return out.transpose(1, 0, 2, 3)                     # (Cout, N, k0, k0)


def _conv_vmem_bytes(tm, hw, cinp, cout4, out_itemsize):
    """Rough VMEM working-set estimate (double-buffered pipeline inputs/outputs)."""
    k9 = 9 * cinp
    return (2 * cinp * tm * 2            # current lane tile (bf16, x2 buffers)
            + 2 * cinp * hw * 2          # halo tile
            + 2 * cout4 * k9 * 2         # stacked weights
            + 2 * cout4 * 128 * 4        # bias (lane padded)
            + k9 * tm * 2                # X9 scratch
            + 2 * cout4 * tm * out_itemsize)


def conv_transpose2d_s2(x, w_all, b_all, act, to_nchw=False):
    """PyTorch ConvTranspose2d(Cin, Cout, 4, stride=2, padding=1) + activation.

    x     : (Cin, N, H, W) activations (GEMM-native channel-major layout)
    w_all : (4*Cout, 9*Cinp) bf16 packed weights, b_all: (4*Cout, 1) f32
    Returns (Cout, N, 2H, 2W) bf16, or (N, Cout, 2H, 2W) f32 if to_nchw.
    """
    cin, n, h, wdim = x.shape
    cout = w_all.shape[0] // 4
    cinp = w_all.shape[1] // 9
    assert cinp == _round_up(cin, 16)

    hp, wp = h + 2, wdim + 2
    s = wp + 1                          # max |flat offset| of any tap
    mp = n * hp * wp                    # output positions on the padded grid
    hw = _round_up(2 * s, 128)          # lane-aligned halo width
    out_itemsize = 4 if act == "tanh" else 2

    # Lane tile: big (up to 2048), >=2 tiles where possible (v7x megacore),
    # backed off to keep the VMEM working set under budget.
    tm = max(hw, min(2048, _round_up(pl.cdiv(mp, 2), 128)))
    while (tm - 128 >= max(hw, 128)
           and _conv_vmem_bytes(tm, hw, cinp, 4 * cout, out_itemsize) > _VMEM_BUDGET):
        tm -= 128
    assert 2 * s <= hw <= tm
    nt = pl.cdiv(mp, tm)
    mo = nt * tm

    # Prologue: spatial pad, then ONE flat pad (channels to Cinp, +s front
    # halo, tail so the halo gather below is a clean reshape).  All bf16.
    x_pad = jnp.pad(x, ((0, 0), (0, 0), (1, 1), (1, 1))).reshape(cin, mp)
    x_flat = jnp.pad(x_pad, ((0, cinp - cin),
                             (s, mo + tm - s - mp))).astype(jnp.bfloat16)
    # Narrow pre-gathered halo (first HW columns of each tile's right
    # neighbour) instead of re-reading a full neighbour tile from HBM.
    halo = x_flat[:, tm:].reshape(cinp, nt, tm)[:, :, :hw].transpose(1, 0, 2)

    # Flat lane offset of each of the 9 unique (dy, dx) taps inside the
    # [tile_start, tile_start + tm + hw) window.
    offsets = tuple(s + dy * wp + dx for dy in (-1, 0, 1) for dx in (-1, 0, 1))

    kernel = functools.partial(_convt_s2_kernel, offsets=offsets, tm=tm,
                               cinp=cinp, act=act)
    out_dtype = jnp.float32 if act == "tanh" else jnp.bfloat16
    out = pl.pallas_call(
        kernel,
        out_shape=jax.ShapeDtypeStruct((4 * cout, mo), out_dtype),
        grid=(nt,),
        in_specs=[
            pl.BlockSpec((cinp, tm), lambda j: (0, j)),         # current tile
            pl.BlockSpec((None, cinp, hw), lambda j: (j, 0, 0)),  # narrow halo
            pl.BlockSpec((4 * cout, 9 * cinp), lambda j: (0, 0)),
            pl.BlockSpec((4 * cout, 1), lambda j: (0, 0)),
        ],
        out_specs=pl.BlockSpec((4 * cout, tm), lambda j: (0, j)),
        scratch_shapes=[pltpu.VMEM((9 * cinp, tm), jnp.bfloat16)],
        compiler_params=pltpu.CompilerParams(
            dimension_semantics=("parallel",),
            vmem_limit_bytes=_VMEM_LIMIT),
    )(x_flat, halo, w_all, b_all)

    # Epilogue (bf16 for intermediates): drop padded-grid garbage rows/cols
    # and interleave the 4 phases in a single relayout pass.
    ph = out[:, :mp].reshape(2, 2, cout, n, hp, wp)
    ph = ph[:, :, :, :, 1:h + 1, 1:wdim + 1]               # (2,2,C,N,H,W)
    if to_nchw:
        full = ph.transpose(3, 2, 4, 0, 5, 1)              # (N,C,i,py,j,px)
        return full.reshape(n, cout, 2 * h, 2 * wdim)
    full = ph.transpose(2, 3, 4, 0, 5, 1)                  # (C,N,i,py,j,px)
    return full.reshape(cout, n, 2 * h, 2 * wdim)


# -------------------------------- DCGenerator ------------------------------- #

def init_params(key, z_dim, image_size, conv_dim):
    k0 = image_size // 16
    shapes = [
        (z_dim, conv_dim * 8, k0, k0),        # fc     : ConvT(z_dim, 8c, k0, 1, 0)
        (conv_dim * 8, conv_dim * 4, 4, 4),   # layer1 : ConvT(8c, 4c, 4, 2, 1)
        (conv_dim * 4, conv_dim * 2, 4, 4),   # layer2 : ConvT(4c, 2c, 4, 2, 1)
        (conv_dim * 2, conv_dim, 4, 4),       # layer3 : ConvT(2c,  c, 4, 2, 1)
        (conv_dim, 3, 4, 4),                  # layer4 : ConvT( c,  3, 4, 2, 1)
    ]
    params = []
    for shp in shapes:
        key, kw, kb = jax.random.split(key, 3)
        fan = shp[0] * shp[2] * shp[3]
        w = jax.random.normal(kw, shp, jnp.float32) / jnp.sqrt(float(fan))
        b = 0.01 * jax.random.normal(kb, (shp[1],), jnp.float32)
        params.append((w, b))
    return params


def make_forward(z_dim, image_size, conv_dim):
    """Builds the forward pass; static layer dims are closed over (not traced)."""
    del z_dim
    k0 = image_size // 16
    c8 = conv_dim * 8

    def forward(z, packed):
        (fw, fb), (w1, b1), (w2, b2), (w3, b3), (w4, b4) = packed
        x = fc_layer(z, fw, fb, c8, k0)                                # (8c,N,k0,k0)
        x = conv_transpose2d_s2(x, w1, b1, act="leaky_relu")           # (4c,N,..)
        x = conv_transpose2d_s2(x, w2, b2, act="leaky_relu")
        x = conv_transpose2d_s2(x, w3, b3, act="leaky_relu")
        x = conv_transpose2d_s2(x, w4, b4, act="tanh", to_nchw=True)   # (N,3,H,W)
        return x

    return forward


# ------------------------ pure-JAX reference (f32) -------------------------- #

def _conv_transpose_ref(x, w, b, stride, pad):
    k = w.shape[2]
    w2 = jnp.flip(w, (2, 3)).transpose(1, 0, 2, 3)          # (Cout, Cin, K, K)
    y = lax.conv_general_dilated(
        x, w2, window_strides=(1, 1),
        padding=[(k - 1 - pad, k - 1 - pad)] * 2,
        lhs_dilation=(stride, stride),
        dimension_numbers=("NCHW", "OIHW", "NCHW"),
        precision=lax.Precision.HIGHEST)
    return y + b.reshape(1, -1, 1, 1)


def dc_generator_reference(z, params):
    z4 = z.reshape(z.shape[0], z.shape[1], 1, 1)
    (wf, bf), (w1, b1), (w2, b2), (w3, b3), (w4, b4) = params

    def lrelu(v):
        return jnp.where(v >= 0.0, v, 0.05 * v)

    out = _conv_transpose_ref(z4, wf, bf, 1, 0)
    out = lrelu(_conv_transpose_ref(out, w1, b1, 2, 1))
    out = lrelu(_conv_transpose_ref(out, w2, b2, 2, 1))
    out = lrelu(_conv_transpose_ref(out, w3, b3, 2, 1))
    out = jnp.tanh(_conv_transpose_ref(out, w4, b4, 2, 1))
    return out


if __name__ == "__main__":
    # Small, module-consistent shapes: image_size must be divisible by 16.
    batch, z_dim, image_size, conv_dim = 2, 32, 32, 8

    key = jax.random.PRNGKey(0)
    key, kz, kp = jax.random.split(key, 3)
    z = jax.random.normal(kz, (batch, z_dim), jnp.float32)
    params = init_params(kp, z_dim, image_size, conv_dim)
    packed = pack_params(params)                    # one-time weight repack

    forward = jax.jit(make_forward(z_dim, image_size, conv_dim))
    out = jax.block_until_ready(forward(z, packed))

    assert out.shape == (batch, 3, image_size, image_size), out.shape
    assert bool(jnp.all(jnp.isfinite(out)))
    assert bool(jnp.all(jnp.abs(out) <= 1.0))       # tanh output range

    ref = jax.block_until_ready(dc_generator_reference(z, params))
    max_err = float(jnp.max(jnp.abs(out - ref)))
    assert max_err < 5e-2, f"mismatch vs reference: {max_err}"
    print("KERNEL_OK")
</pallas_src>

<mosaic_0001>
module attributes {stable_mosaic.version = 11 : i64} {
  func.func @_fc_kernel(%arg0: i32, %arg1: memref<2x32xbf16, #tpu.memory_space<vmem>>, %arg2: memref<32x256xbf16, #tpu.memory_space<vmem>>, %arg3: memref<1x256xf32, #tpu.memory_space<vmem>>, %arg4: memref<2x256xbf16, #tpu.memory_space<vmem>>) attributes {dimension_semantics = [#tpu.dimension_semantics<parallel>], iteration_bounds = array<i64: 1>, scalar_prefetch = 0 : i64, scratch_operands = 0 : i64, tpu.core_type = #tpu.core_type<tc>, window_params = [{pipeline_mode = #tpu.pipeline_mode<synchronous>, transform_indices = @transform_0, window_bounds = array<i64: 2, 32>}, {transform_indices = @transform_1, window_bounds = array<i64: 32, 256>}, {transform_indices = @transform_2, window_bounds = array<i64: 1, 256>}, {transform_indices = @transform_3, window_bounds = array<i64: 2, 256>}]} {
    %c0 = arith.constant 0 : index
    %c0_0 = arith.constant 0 : index
    %0 = vector.load %arg1[%c0, %c0_0] : memref<2x32xbf16, #tpu.memory_space<vmem>>, vector<2x32xbf16>
    %c0_1 = arith.constant 0 : index
    %c0_2 = arith.constant 0 : index
    %1 = vector.load %arg2[%c0_1, %c0_2] : memref<32x256xbf16, #tpu.memory_space<vmem>>, vector<32x256xbf16>
    %cst = arith.constant dense<0.000000e+00> : vector<2x256xf32>
    %2 = tpu.matmul %0, %1, %cst {dimension_numbers = #tpu.dot_dimension_numbers<[1], [0], [0], [1], [0, 0, 1, 1], [], []>} : vector<2x32xbf16>, vector<32x256xbf16>, vector<2x256xf32> -> vector<2x256xf32>
    %c0_3 = arith.constant 0 : index
    %c0_4 = arith.constant 0 : index
    %3 = vector.load %arg3[%c0_3, %c0_4] : memref<1x256xf32, #tpu.memory_space<vmem>>, vector<1x256xf32>
    %4 = vector.broadcast %3 : vector<1x256xf32> to vector<2x256xf32>
    %5 = arith.addf %2, %4 : vector<2x256xf32>
    %6 = arith.truncf %5 : vector<2x256xf32> to vector<2x256xbf16>
    %c0_5 = arith.constant 0 : index
    %c0_6 = arith.constant 0 : index
    %7 = vector.load %arg4[%c0_5, %c0_6] : memref<2x256xbf16, #tpu.memory_space<vmem>>, vector<2x256xbf16>
    tpu.vector_store %arg4[%c0_5, %c0_6], %6 {strides = array<i32>} : memref<2x256xbf16, #tpu.memory_space<vmem>>, vector<2x256xbf16>,
    return
  }
  func.func @transform_0(%arg0: i32) -> (i32, i32) {
    %c0_i32 = arith.constant 0 : i32
    %c0_i32_0 = arith.constant 0 : i32
    %c0_i32_1 = arith.constant 0 : i32
    return %c0_i32, %c0_i32_0 : i32, i32
  }
  func.func @transform_1(%arg0: i32) -> (i32, i32) {
    %c0_i32 = arith.constant 0 : i32
    %c0_i32_0 = arith.constant 0 : i32
    return %c0_i32, %arg0 : i32, i32
  }
  func.func @transform_2(%arg0: i32) -> (i32, i32) {
    %c0_i32 = arith.constant 0 : i32
    %c0_i32_0 = arith.constant 0 : i32
    return %c0_i32, %arg0 : i32, i32
  }
  func.func @transform_3(%arg0: i32) -> (i32, i32) {
    %c0_i32 = arith.constant 0 : i32
    %c0_i32_0 = arith.constant 0 : i32
    return %c0_i32, %arg0 : i32, i32
  }
}

module attributes {stable_mosaic.version = 11 : i64} {
  func.func @_convt_s2_kernel(%arg0: i32, %arg1: memref<64x128xbf16, #tpu.memory_space<vmem>>, %arg2: memref<1x64x128xbf16, #tpu.memory_space<vmem>>, %arg3: memref<128x576xbf16, #tpu.memory_space<vmem>>, %arg4: memref<128x1xf32, #tpu.memory_space<vmem>>, %arg5: memref<128x128xbf16, #tpu.memory_space<vmem>>, %arg6: memref<576x128xbf16, #tpu.memory_space<vmem>>) attributes {dimension_semantics = [#tpu.dimension_semantics<parallel>], iteration_bounds = array<i64: 1>, scalar_prefetch = 0 : i64, scratch_operands = 1 : i64, tpu.core_type = #tpu.core_type<tc>, window_params = [{transform_indices = @transform_0, window_bounds = array<i64: 64, 128>}, {transform_indices = @transform_1, window_bounds = array<i64: 1, 64, 128>}, {pipeline_mode = #tpu.pipeline_mode<synchronous>, transform_indices = @transform_2, window_bounds = array<i64: 128, 576>}, {pipeline_mode = #tpu.pipeline_mode<synchronous>, transform_indices = @transform_3, window_bounds = array<i64: 128, 1>}, {transform_indices = @transform_4, window_bounds = array<i64: 128, 128>}]} {
    %c0 = arith.constant 0 : index
    %c0_0 = arith.constant 0 : index
    %0 = vector.load %arg1[%c0, %c0_0] : memref<64x128xbf16, #tpu.memory_space<vmem>>, vector<64x128xbf16>
    %c0_1 = arith.constant 0 : index
    %c0_2 = arith.constant 0 : index
    %1 = vector.load %arg6[%c0_1, %c0_2] : memref<576x128xbf16, #tpu.memory_space<vmem>>, vector<64x128xbf16>
    tpu.vector_store %arg6[%c0_1, %c0_2], %0 {strides = array<i32>} : memref<576x128xbf16, #tpu.memory_space<vmem>>, vector<64x128xbf16>,
    %c0_3 = arith.constant 0 : index
    %c1 = arith.constant 1 : index
    %2 = vector.load %arg1[%c0_3, %c1] : memref<64x128xbf16, #tpu.memory_space<vmem>>, vector<64x127xbf16>
    %c64 = arith.constant 64 : index
    %c0_4 = arith.constant 0 : index
    %3 = vector.load %arg6[%c64, %c0_4] : memref<576x128xbf16, #tpu.memory_space<vmem>>, vector<64x127xbf16>
    tpu.vector_store %arg6[%c64, %c0_4], %2 {strides = array<i32>} : memref<576x128xbf16, #tpu.memory_space<vmem>>, vector<64x127xbf16>,
    %c0_5 = arith.constant 0 : index
    %c0_6 = arith.constant 0 : index
    %c0_7 = arith.constant 0 : index
    %4 = vector.load %arg2[%c0_5, %c0_6, %c0_7] : memref<1x64x128xbf16, #tpu.memory_space<vmem>>, vector<1x64x1xbf16>
    %5 = vector.shape_cast %4 : vector<1x64x1xbf16> to vector<64x1xbf16>
    %c64_8 = arith.constant 64 : index
    %c127 = arith.constant 127 : index
    %6 = vector.load %arg6[%c64_8, %c127] : memref<576x128xbf16, #tpu.memory_space<vmem>>, vector<64x1xbf16>
    tpu.vector_store %arg6[%c64_8, %c127], %5 {strides = array<i32>} : memref<576x128xbf16, #tpu.memory_space<vmem>>, vector<64x1xbf16>,
    %c0_9 = arith.constant 0 : index
    %c2 = arith.constant 2 : index
    %7 = vector.load %arg1[%c0_9, %c2] : memref<64x128xbf16, #tpu.memory_space<vmem>>, vector<64x126xbf16>
    %c128 = arith.constant 128 : index
    %c0_10 = arith.constant 0 : index
    %8 = vector.load %arg6[%c128, %c0_10] : memref<576x128xbf16, #tpu.memory_space<vmem>>, vector<64x126xbf16>
    tpu.vector_store %arg6[%c128, %c0_10], %7 {strides = array<i32>} : memref<576x128xbf16, #tpu.memory_space<vmem>>, vector<64x126xbf16>,
    %c0_11 = arith.constant 0 : index
    %c0_12 = arith.constant 0 : index
    %c0_13 = arith.constant 0 : index
    %9 = vector.load %arg2[%c0_11, %c0_12, %c0_13] : memref<1x64x128xbf16, #tpu.memory_space<vmem>>, vector<1x64x2xbf16>
    %10 = vector.shape_cast %9 : vector<1x64x2xbf16> to vector<64x2xbf16>
    %c128_14 = arith.constant 128 : index
    %c126 = arith.constant 126 : index
    %11 = vector.load %arg6[%c128_14, %c126] : memref<576x128xbf16, #tpu.memory_space<vmem>>, vector<64x2xbf16>
    tpu.vector_store %arg6[%c128_14, %c126], %10 {strides = array<i32>} : memref<576x128xbf16, #tpu.memory_space<vmem>>, vector<64x2xbf16>,
    %c0_15 = arith.constant 0 : index
    %c4 = arith.constant 4 : index
    %12 = vector.load %arg1[%c0_15, %c4] : memref<64x128xbf16, #tpu.memory_space<vmem>>, vector<64x124xbf16>
    %c192 = arith.constant 192 : index
    %c0_16 = arith.constant 0 : index
    %13 = vector.load %arg6[%c192, %c0_16] : memref<576x128xbf16, #tpu.memory_space<vmem>>, vector<64x124xbf16>
    tpu.vector_store %arg6[%c192, %c0_16], %12 {strides = array<i32>} : memref<576x128xbf16, #tpu.memory_space<vmem>>, vector<64x124xbf16>,
    %c0_17 = arith.constant 0 : index
    %c0_18 = arith.constant 0 : index
    %c0_19 = arith.constant 0 : index
    %14 = vector.load %arg2[%c0_17, %c0_18, %c0_19] : memref<1x64x128xbf16, #tpu.memory_space<vmem>>, vector<1x64x4xbf16>
    %15 = vector.shape_cast %14 : vector<1x64x4xbf16> to vector<64x4xbf16>
    %c192_20 = arith.constant 192 : index
    %c124 = arith.constant 124 : index
    %16 = vector.load %arg6[%c192_20, %c124] : memref<576x128xbf16, #tpu.memory_space<vmem>>, vector<64x4xbf16>
    tpu.vector_store %arg6[%c192_20, %c124], %15 {strides = array<i32>} : memref<576x128xbf16, #tpu.memory_space<vmem>>, vector<64x4xbf16>,
    %c0_21 = arith.constant 0 : index
    %c5 = arith.constant 5 : index
    %17 = vector.load %arg1[%c0_21, %c5] : memref<64x128xbf16, #tpu.memory_space<vmem>>, vector<64x123xbf16>
    %c256 = arith.constant 256 : index
    %c0_22 = arith.constant 0 : index
    %18 = vector.load %arg6[%c256, %c0_22] : memref<576x128xbf16, #tpu.memory_space<vmem>>, vector<64x123xbf16>
    tpu.vector_store %arg6[%c256, %c0_22], %17 {strides = array<i32>} : memref<576x128xbf16, #tpu.memory_space<vmem>>, vector<64x123xbf16>,
    %c0_23 = arith.constant 0 : index
    %c0_24 = arith.constant 0 : index
    %c0_25 = arith.constant 0 : index
    %19 = vector.load %arg2[%c0_23, %c0_24, %c0_25] : memref<1x64x128xbf16, #tpu.memory_space<vmem>>, vector<1x64x5xbf16>
    %20 = vector.shape_cast %19 : vector<1x64x5xbf16> to vector<64x5xbf16>
    %c256_26 = arith.constant 256 : index
    %c123 = arith.constant 123 : index
    %21 = vector.load %arg6[%c256_26, %c123] : memref<576x128xbf16, #tpu.memory_space<vmem>>, vector<64x5xbf16>
    tpu.vector_store %arg6[%c256_26, %c123], %20 {strides = array<i32>} : memref<576x128xbf16, #tpu.memory_space<vmem>>, vector<64x5xbf16>,
    %c0_27 = arith.constant 0 : index
    %c6 = arith.constant 6 : index
    %22 = vector.load %arg1[%c0_27, %c6] : memref<64x128xbf16, #tpu.memory_space<vmem>>, vector<64x122xbf16>
    %c320 = arith.constant 320 : index
    %c0_28 = arith.constant 0 : index
    %23 = vector.load %arg6[%c320, %c0_28] : memref<576x128xbf16, #tpu.memory_space<vmem>>, vector<64x122xbf16>
    tpu.vector_store %arg6[%c320, %c0_28], %22 {strides = array<i32>} : memref<576x128xbf16, #tpu.memory_space<vmem>>, vector<64x122xbf16>,
    %c0_29 = arith.constant 0 : index
    %c0_30 = arith.constant 0 : index
    %c0_31 = arith.constant 0 : index
    %24 = vector.load %arg2[%c0_29, %c0_30, %c0_31] : memref<1x64x128xbf16, #tpu.memory_space<vmem>>, vector<1x64x6xbf16>
    %25 = vector.shape_cast %24 : vector<1x64x6xbf16> to vector<64x6xbf16>
    %c320_32 = arith.constant 320 : index
    %c122 = arith.constant 122 : index
    %26 = vector.load %arg6[%c320_32, %c122] : memref<576x128xbf16, #tpu.memory_space<vmem>>, vector<64x6xbf16>
    tpu.vector_store %arg6[%c320_32, %c122], %25 {strides = array<i32>} : memref<576x128xbf16, #tpu.memory_space<vmem>>, vector<64x6xbf16>,
    %c0_33 = arith.constant 0 : index
    %c8 = arith.constant 8 : index
    %27 = vector.load %arg1[%c0_33, %c8] : memref<64x128xbf16, #tpu.memory_space<vmem>>, vector<64x120xbf16>
    %c384 = arith.constant 384 : index
    %c0_34 = arith.constant 0 : index
    %28 = vector.load %arg6[%c384, %c0_34] : memref<576x128xbf16, #tpu.memory_space<vmem>>, vector<64x120xbf16>
    tpu.vector_store %arg6[%c384, %c0_34], %27 {strides = array<i32>} : memref<576x128xbf16, #tpu.memory_space<vmem>>, vector<64x120xbf16>,
    %c0_35 = arith.constant 0 : index
    %c0_36 = arith.constant 0 : index
    %c0_37 = arith.constant 0 : index
    %29 = vector.load %arg2[%c0_35, %c0_36, %c0_37] : memref<1x64x128xbf16, #tpu.memory_space<vmem>>, vector<1x64x8xbf16>
    %30 = vector.shape_cast %29 : vector<1x64x8xbf16> to vector<64x8xbf16>
    %c384_38 = arith.constant 384 : index
    %c120 = arith.constant 120 : index
    %31 = vector.load %arg6[%c384_38, %c120] : memref<576x128xbf16, #tpu.memory_space<vmem>>, vector<64x8xbf16>
    tpu.vector_store %arg6[%c384_38, %c120], %30 {strides = array<i32>} : memref<576x128xbf16, #tpu.memory_space<vmem>>, vector<64x8xbf16>,
    %c0_39 = arith.constant 0 : index
    %c9 = arith.constant 9 : index
    %32 = vector.load %arg1[%c0_39, %c9] : memref<64x128xbf16, #tpu.memory_space<vmem>>, vector<64x119xbf16>
    %c448 = arith.constant 448 : index
    %c0_40 = arith.constant 0 : index
    %33 = vector.load %arg6[%c448, %c0_40] : memref<576x128xbf16, #tpu.memory_space<vmem>>, vector<64x119xbf16>
    tpu.vector_store %arg6[%c448, %c0_40], %32 {strides = array<i32>} : memref<576x128xbf16, #tpu.memory_space<vmem>>, vector<64x119xbf16>,
    %c0_41 = arith.constant 0 : index
    %c0_42 = arith.constant 0 : index
    %c0_43 = arith.constant 0 : index
    %34 = vector.load %arg2[%c0_41, %c0_42, %c0_43] : memref<1x64x128xbf16, #tpu.memory_space<vmem>>, vector<1x64x9xbf16>
    %35 = vector.shape_cast %34 : vector<1x64x9xbf16> to vector<64x9xbf16>
    %c448_44 = arith.constant 448 : index
    %c119 = arith.constant 119 : index
    %36 = vector.load %arg6[%c448_44, %c119] : memref<576x128xbf16, #tpu.memory_space<vmem>>, vector<64x9xbf16>
    tpu.vector_store %arg6[%c448_44, %c119], %35 {strides = array<i32>} : memref<576x128xbf16, #tpu.memory_space<vmem>>, vector<64x9xbf16>,
    %c0_45 = arith.constant 0 : index
    %c10 = arith.constant 10 : index
    %37 = vector.load %arg1[%c0_45, %c10] : memref<64x128xbf16, #tpu.memory_space<vmem>>, vector<64x118xbf16>
    %c512 = arith.constant 512 : index
    %c0_46 = arith.constant 0 : index
    %38 = vector.load %arg6[%c512, %c0_46] : memref<576x128xbf16, #tpu.memory_space<vmem>>, vector<64x118xbf16>
    tpu.vector_store %arg6[%c512, %c0_46], %37 {strides = array<i32>} : memref<576x128xbf16, #tpu.memory_space<vmem>>, vector<64x118xbf16>,
    %c0_47 = arith.constant 0 : index
    %c0_48 = arith.constant 0 : index
    %c0_49 = arith.constant 0 : index
    %39 = vector.load %arg2[%c0_47, %c0_48, %c0_49] : memref<1x64x128xbf16, #tpu.memory_space<vmem>>, vector<1x64x10xbf16>
    %40 = vector.shape_cast %39 : vector<1x64x10xbf16> to vector<64x10xbf16>
    %c512_50 = arith.constant 512 : index
    %c118 = arith.constant 118 : index
    %41 = vector.load %arg6[%c512_50, %c118] : memref<576x128xbf16, #tpu.memory_space<vmem>>, vector<64x10xbf16>
    tpu.vector_store %arg6[%c512_50, %c118], %40 {strides = array<i32>} : memref<576x128xbf16, #tpu.memory_space<vmem>>, vector<64x10xbf16>,
    %c0_51 = arith.constant 0 : index
    %c0_52 = arith.constant 0 : index
    %42 = vector.load %arg3[%c0_51, %c0_52] : memref<128x576xbf16, #tpu.memory_space<vmem>>, vector<128x576xbf16>
    %c0_53 = arith.constant 0 : index
    %c0_54 = arith.constant 0 : index
    %43 = vector.load %arg6[%c0_53, %c0_54] : memref<576x128xbf16, #tpu.memory_space<vmem>>, vector<576x128xbf16>
    %cst = arith.constant dense<0.000000e+00> : vector<128x128xf32>
    %44 = tpu.matmul %42, %43, %cst {dimension_numbers = #tpu.dot_dimension_numbers<[1], [0], [0], [1], [0, 0, 1, 1], [], []>} : vector<128x576xbf16>, vector<576x128xbf16>, vector<128x128xf32> -> vector<128x128xf32>
    %c0_55 = arith.constant 0 : index
    %c0_56 = arith.constant 0 : index
    %45 = vector.load %arg4[%c0_55, %c0_56] : memref<128x1xf32, #tpu.memory_space<vmem>>, vector<128x1xf32>
    %46 = vector.broadcast %45 : vector<128x1xf32> to vector<128x128xf32>
    %47 = arith.addf %44, %46 : vector<128x128xf32>
    %cst_57 = arith.constant 0.000000e+00 : f32
    %48 = vector.broadcast %cst_57 : f32 to vector<128x128xf32>
    %49 = arith.cmpf oge, %47, %48 : vector<128x128xf32>
    %cst_58 = arith.constant 5.000000e-02 : f32
    %50 = vector.broadcast %cst_58 : f32 to vector<128x128xf32>
    %51 = arith.mulf %50, %47 : vector<128x128xf32>
    %52 = arith.select %49, %47, %51 : vector<128x128xi1>, vector<128x128xf32>
    %53 = arith.truncf %52 : vector<128x128xf32> to vector<128x128xbf16>
    %c0_59 = arith.constant 0 : index
    %c0_60 = arith.constant 0 : index
    %54 = vector.load %arg5[%c0_59, %c0_60] : memref<128x128xbf16, #tpu.memory_space<vmem>>, vector<128x128xbf16>
    tpu.vector_store %arg5[%c0_59, %c0_60], %53 {strides = array<i32>} : memref<128x128xbf16, #tpu.memory_space<vmem>>, vector<128x128xbf16>,
    return
  }
  func.func @transform_0(%arg0: i32) -> (i32, i32) {
    %c0_i32 = arith.constant 0 : i32
    %c0_i32_0 = arith.constant 0 : i32
    return %c0_i32, %arg0 : i32, i32
  }
  func.func @transform_1(%arg0: i32) -> (i32, i32, i32) {
    %c0_i32 = arith.constant 0 : i32
    %c0_i32_0 = arith.constant 0 : i32
    %c0_i32_1 = arith.constant 0 : i32
    return %arg0, %c0_i32, %c0_i32_0 : i32, i32, i32
  }
  func.func @transform_2(%arg0: i32) -> (i32, i32) {
    %c0_i32 = arith.constant 0 : i32
    %c0_i32_0 = arith.constant 0 : i32
    %c0_i32_1 = arith.constant 0 : i32
    return %c0_i32, %c0_i32_0 : i32, i32
  }
  func.func @transform_3(%arg0: i32) -> (i32, i32) {
    %c0_i32 = arith.constant 0 : i32
    %c0_i32_0 = arith.constant 0 : i32
    %c0_i32_1 = arith.constant 0 : i32
    return %c0_i32, %c0_i32_0 : i32, i32
  }
  func.func @transform_4(%arg0: i32) -> (i32, i32) {
    %c0_i32 = arith.constant 0 : i32
    %c0_i32_0 = arith.constant 0 : i32
    return %c0_i32, %arg0 : i32, i32
  }
}

module attributes {stable_mosaic.version = 11 : i64} {
  func.func @_convt_s2_kernel(%arg0: i32, %arg1: memref<32x128xbf16, #tpu.memory_space<vmem>>, %arg2: memref<1x32x128xbf16, #tpu.memory_space<vmem>>, %arg3: memref<64x288xbf16, #tpu.memory_space<vmem>>, %arg4: memref<64x1xf32, #tpu.memory_space<vmem>>, %arg5: memref<64x128xbf16, #tpu.memory_space<vmem>>, %arg6: memref<288x128xbf16, #tpu.memory_space<vmem>>) attributes {dimension_semantics = [#tpu.dimension_semantics<parallel>], iteration_bounds = array<i64: 1>, scalar_prefetch = 0 : i64, scratch_operands = 1 : i64, tpu.core_type = #tpu.core_type<tc>, window_params = [{transform_indices = @transform_0, window_bounds = array<i64: 32, 128>}, {transform_indices = @transform_1, window_bounds = array<i64: 1, 32, 128>}, {pipeline_mode = #tpu.pipeline_mode<synchronous>, transform_indices = @transform_2, window_bounds = array<i64: 64, 288>}, {pipeline_mode = #tpu.pipeline_mode<synchronous>, transform_indices = @transform_3, window_bounds = array<i64: 64, 1>}, {transform_indices = @transform_4, window_bounds = array<i64: 64, 128>}]} {
    %c0 = arith.constant 0 : index
    %c0_0 = arith.constant 0 : index
    %0 = vector.load %arg1[%c0, %c0_0] : memref<32x128xbf16, #tpu.memory_space<vmem>>, vector<32x128xbf16>
    %c0_1 = arith.constant 0 : index
    %c0_2 = arith.constant 0 : index
    %1 = vector.load %arg6[%c0_1, %c0_2] : memref<288x128xbf16, #tpu.memory_space<vmem>>, vector<32x128xbf16>
    tpu.vector_store %arg6[%c0_1, %c0_2], %0 {strides = array<i32>} : memref<288x128xbf16, #tpu.memory_space<vmem>>, vector<32x128xbf16>,
    %c0_3 = arith.constant 0 : index
    %c1 = arith.constant 1 : index
    %2 = vector.load %arg1[%c0_3, %c1] : memref<32x128xbf16, #tpu.memory_space<vmem>>, vector<32x127xbf16>
    %c32 = arith.constant 32 : index
    %c0_4 = arith.constant 0 : index
    %3 = vector.load %arg6[%c32, %c0_4] : memref<288x128xbf16, #tpu.memory_space<vmem>>, vector<32x127xbf16>
    tpu.vector_store %arg6[%c32, %c0_4], %2 {strides = array<i32>} : memref<288x128xbf16, #tpu.memory_space<vmem>>, vector<32x127xbf16>,
    %c0_5 = arith.constant 0 : index
    %c0_6 = arith.constant 0 : index
    %c0_7 = arith.constant 0 : index
    %4 = vector.load %arg2[%c0_5, %c0_6, %c0_7] : memref<1x32x128xbf16, #tpu.memory_space<vmem>>, vector<1x32x1xbf16>
    %5 = vector.shape_cast %4 : vector<1x32x1xbf16> to vector<32x1xbf16>
    %c32_8 = arith.constant 32 : index
    %c127 = arith.constant 127 : index
    %6 = vector.load %arg6[%c32_8, %c127] : memref<288x128xbf16, #tpu.memory_space<vmem>>, vector<32x1xbf16>
    tpu.vector_store %arg6[%c32_8, %c127], %5 {strides = array<i32>} : memref<288x128xbf16, #tpu.memory_space<vmem>>, vector<32x1xbf16>,
    %c0_9 = arith.constant 0 : index
    %c2 = arith.constant 2 : index
    %7 = vector.load %arg1[%c0_9, %c2] : memref<32x128xbf16, #tpu.memory_space<vmem>>, vector<32x126xbf16>
    %c64 = arith.constant 64 : index
    %c0_10 = arith.constant 0 : index
    %8 = vector.load %arg6[%c64, %c0_10] : memref<288x128xbf16, #tpu.memory_space<vmem>>, vector<32x126xbf16>
    tpu.vector_store %arg6[%c64, %c0_10], %7 {strides = array<i32>} : memref<288x128xbf16, #tpu.memory_space<vmem>>, vector<32x126xbf16>,
    %c0_11 = arith.constant 0 : index
    %c0_12 = arith.constant 0 : index
    %c0_13 = arith.constant 0 : index
    %9 = vector.load %arg2[%c0_11, %c0_12, %c0_13] : memref<1x32x128xbf16, #tpu.memory_space<vmem>>, vector<1x32x2xbf16>
    %10 = vector.shape_cast %9 : vector<1x32x2xbf16> to vector<32x2xbf16>
    %c64_14 = arith.constant 64 : index
    %c126 = arith.constant 126 : index
    %11 = vector.load %arg6[%c64_14, %c126] : memref<288x128xbf16, #tpu.memory_space<vmem>>, vector<32x2xbf16>
    tpu.vector_store %arg6[%c64_14, %c126], %10 {strides = array<i32>} : memref<288x128xbf16, #tpu.memory_space<vmem>>, vector<32x2xbf16>,
    %c0_15 = arith.constant 0 : index
    %c6 = arith.constant 6 : index
    %12 = vector.load %arg1[%c0_15, %c6] : memref<32x128xbf16, #tpu.memory_space<vmem>>, vector<32x122xbf16>
    %c96 = arith.constant 96 : index
    %c0_16 = arith.constant 0 : index
    %13 = vector.load %arg6[%c96, %c0_16] : memref<288x128xbf16, #tpu.memory_space<vmem>>, vector<32x122xbf16>
    tpu.vector_store %arg6[%c96, %c0_16], %12 {strides = array<i32>} : memref<288x128xbf16, #tpu.memory_space<vmem>>, vector<32x122xbf16>,
    %c0_17 = arith.constant 0 : index
    %c0_18 = arith.constant 0 : index
    %c0_19 = arith.constant 0 : index
    %14 = vector.load %arg2[%c0_17, %c0_18, %c0_19] : memref<1x32x128xbf16, #tpu.memory_space<vmem>>, vector<1x32x6xbf16>
    %15 = vector.shape_cast %14 : vector<1x32x6xbf16> to vector<32x6xbf16>
    %c96_20 = arith.constant 96 : index
    %c122 = arith.constant 122 : index
    %16 = vector.load %arg6[%c96_20, %c122] : memref<288x128xbf16, #tpu.memory_space<vmem>>, vector<32x6xbf16>
    tpu.vector_store %arg6[%c96_20, %c122], %15 {strides = array<i32>} : memref<288x128xbf16, #tpu.memory_space<vmem>>, vector<32x6xbf16>,
    %c0_21 = arith.constant 0 : index
    %c7 = arith.constant 7 : index
    %17 = vector.load %arg1[%c0_21, %c7] : memref<32x128xbf16, #tpu.memory_space<vmem>>, vector<32x121xbf16>
    %c128 = arith.constant 128 : index
    %c0_22 = arith.constant 0 : index
    %18 = vector.load %arg6[%c128, %c0_22] : memref<288x128xbf16, #tpu.memory_space<vmem>>, vector<32x121xbf16>
    tpu.vector_store %arg6[%c128, %c0_22], %17 {strides = array<i32>} : memref<288x128xbf16, #tpu.memory_space<vmem>>, vector<32x121xbf16>,
    %c0_23 = arith.constant 0 : index
    %c0_24 = arith.constant 0 : index
    %c0_25 = arith.constant 0 : index
    %19 = vector.load %arg2[%c0_23, %c0_24, %c0_25] : memref<1x32x128xbf16, #tpu.memory_space<vmem>>, vector<1x32x7xbf16>
    %20 = vector.shape_cast %19 : vector<1x32x7xbf16> to vector<32x7xbf16>
    %c128_26 = arith.constant 128 : index
    %c121 = arith.constant 121 : index
    %21 = vector.load %arg6[%c128_26, %c121] : memref<288x128xbf16, #tpu.memory_space<vmem>>, vector<32x7xbf16>
    tpu.vector_store %arg6[%c128_26, %c121], %20 {strides = array<i32>} : memref<288x128xbf16, #tpu.memory_space<vmem>>, vector<32x7xbf16>,
    %c0_27 = arith.constant 0 : index
    %c8 = arith.constant 8 : index
    %22 = vector.load %arg1[%c0_27, %c8] : memref<32x128xbf16, #tpu.memory_space<vmem>>, vector<32x120xbf16>
    %c160 = arith.constant 160 : index
    %c0_28 = arith.constant 0 : index
    %23 = vector.load %arg6[%c160, %c0_28] : memref<288x128xbf16, #tpu.memory_space<vmem>>, vector<32x120xbf16>
    tpu.vector_store %arg6[%c160, %c0_28], %22 {strides = array<i32>} : memref<288x128xbf16, #tpu.memory_space<vmem>>, vector<32x120xbf16>,
    %c0_29 = arith.constant 0 : index
    %c0_30 = arith.constant 0 : index
    %c0_31 = arith.constant 0 : index
    %24 = vector.load %arg2[%c0_29, %c0_30, %c0_31] : memref<1x32x128xbf16, #tpu.memory_space<vmem>>, vector<1x32x8xbf16>
    %25 = vector.shape_cast %24 : vector<1x32x8xbf16> to vector<32x8xbf16>
    %c160_32 = arith.constant 160 : index
    %c120 = arith.constant 120 : index
    %26 = vector.load %arg6[%c160_32, %c120] : memref<288x128xbf16, #tpu.memory_space<vmem>>, vector<32x8xbf16>
    tpu.vector_store %arg6[%c160_32, %c120], %25 {strides = array<i32>} : memref<288x128xbf16, #tpu.memory_space<vmem>>, vector<32x8xbf16>,
    %c0_33 = arith.constant 0 : index
    %c12 = arith.constant 12 : index
    %27 = vector.load %arg1[%c0_33, %c12] : memref<32x128xbf16, #tpu.memory_space<vmem>>, vector<32x116xbf16>
    %c192 = arith.constant 192 : index
    %c0_34 = arith.constant 0 : index
    %28 = vector.load %arg6[%c192, %c0_34] : memref<288x128xbf16, #tpu.memory_space<vmem>>, vector<32x116xbf16>
    tpu.vector_store %arg6[%c192, %c0_34], %27 {strides = array<i32>} : memref<288x128xbf16, #tpu.memory_space<vmem>>, vector<32x116xbf16>,
    %c0_35 = arith.constant 0 : index
    %c0_36 = arith.constant 0 : index
    %c0_37 = arith.constant 0 : index
    %29 = vector.load %arg2[%c0_35, %c0_36, %c0_37] : memref<1x32x128xbf16, #tpu.memory_space<vmem>>, vector<1x32x12xbf16>
    %30 = vector.shape_cast %29 : vector<1x32x12xbf16> to vector<32x12xbf16>
    %c192_38 = arith.constant 192 : index
    %c116 = arith.constant 116 : index
    %31 = vector.load %arg6[%c192_38, %c116] : memref<288x128xbf16, #tpu.memory_space<vmem>>, vector<32x12xbf16>
    tpu.vector_store %arg6[%c192_38, %c116], %30 {strides = array<i32>} : memref<288x128xbf16, #tpu.memory_space<vmem>>, vector<32x12xbf16>,
    %c0_39 = arith.constant 0 : index
    %c13 = arith.constant 13 : index
    %32 = vector.load %arg1[%c0_39, %c13] : memref<32x128xbf16, #tpu.memory_space<vmem>>, vector<32x115xbf16>
    %c224 = arith.constant 224 : index
    %c0_40 = arith.constant 0 : index
    %33 = vector.load %arg6[%c224, %c0_40] : memref<288x128xbf16, #tpu.memory_space<vmem>>, vector<32x115xbf16>
    tpu.vector_store %arg6[%c224, %c0_40], %32 {strides = array<i32>} : memref<288x128xbf16, #tpu.memory_space<vmem>>, vector<32x115xbf16>,
    %c0_41 = arith.constant 0 : index
    %c0_42 = arith.constant 0 : index
    %c0_43 = arith.constant 0 : index
    %34 = vector.load %arg2[%c0_41, %c0_42, %c0_43] : memref<1x32x128xbf16, #tpu.memory_space<vmem>>, vector<1x32x13xbf16>
    %35 = vector.shape_cast %34 : vector<1x32x13xbf16> to vector<32x13xbf16>
    %c224_44 = arith.constant 224 : index
    %c115 = arith.constant 115 : index
    %36 = vector.load %arg6[%c224_44, %c115] : memref<288x128xbf16, #tpu.memory_space<vmem>>, vector<32x13xbf16>
    tpu.vector_store %arg6[%c224_44, %c115], %35 {strides = array<i32>} : memref<288x128xbf16, #tpu.memory_space<vmem>>, vector<32x13xbf16>,
    %c0_45 = arith.constant 0 : index
    %c14 = arith.constant 14 : index
    %37 = vector.load %arg1[%c0_45, %c14] : memref<32x128xbf16, #tpu.memory_space<vmem>>, vector<32x114xbf16>
    %c256 = arith.constant 256 : index
    %c0_46 = arith.constant 0 : index
    %38 = vector.load %arg6[%c256, %c0_46] : memref<288x128xbf16, #tpu.memory_space<vmem>>, vector<32x114xbf16>
    tpu.vector_store %arg6[%c256, %c0_46], %37 {strides = array<i32>} : memref<288x128xbf16, #tpu.memory_space<vmem>>, vector<32x114xbf16>,
    %c0_47 = arith.constant 0 : index
    %c0_48 = arith.constant 0 : index
    %c0_49 = arith.constant 0 : index
    %39 = vector.load %arg2[%c0_47, %c0_48, %c0_49] : memref<1x32x128xbf16, #tpu.memory_space<vmem>>, vector<1x32x14xbf16>
    %40 = vector.shape_cast %39 : vector<1x32x14xbf16> to vector<32x14xbf16>
    %c256_50 = arith.constant 256 : index
    %c114 = arith.constant 114 : index
    %41 = vector.load %arg6[%c256_50, %c114] : memref<288x128xbf16, #tpu.memory_space<vmem>>, vector<32x14xbf16>
    tpu.vector_store %arg6[%c256_50, %c114], %40 {strides = array<i32>} : memref<288x128xbf16, #tpu.memory_space<vmem>>, vector<32x14xbf16>,
    %c0_51 = arith.constant 0 : index
    %c0_52 = arith.constant 0 : index
    %42 = vector.load %arg3[%c0_51, %c0_52] : memref<64x288xbf16, #tpu.memory_space<vmem>>, vector<64x288xbf16>
    %c0_53 = arith.constant 0 : index
    %c0_54 = arith.constant 0 : index
    %43 = vector.load %arg6[%c0_53, %c0_54] : memref<288x128xbf16, #tpu.memory_space<vmem>>, vector<288x128xbf16>
    %cst = arith.constant dense<0.000000e+00> : vector<64x128xf32>
    %44 = tpu.matmul %42, %43, %cst {dimension_numbers = #tpu.dot_dimension_numbers<[1], [0], [0], [1], [0, 0, 1, 1], [], []>} : vector<64x288xbf16>, vector<288x128xbf16>, vector<64x128xf32> -> vector<64x128xf32>
    %c0_55 = arith.constant 0 : index
    %c0_56 = arith.constant 0 : index
    %45 = vector.load %arg4[%c0_55, %c0_56] : memref<64x1xf32, #tpu.memory_space<vmem>>, vector<64x1xf32>
    %46 = vector.broadcast %45 : vector<64x1xf32> to vector<64x128xf32>
    %47 = arith.addf %44, %46 : vector<64x128xf32>
    %cst_57 = arith.constant 0.000000e+00 : f32
    %48 = vector.broadcast %cst_57 : f32 to vector<64x128xf32>
    %49 = arith.cmpf oge, %47, %48 : vector<64x128xf32>
    %cst_58 = arith.constant 5.000000e-02 : f32
    %50 = vector.broadcast %cst_58 : f32 to vector<64x128xf32>
    %51 = arith.mulf %50, %47 : vector<64x128xf32>
    %52 = arith.select %49, %47, %51 : vector<64x128xi1>, vector<64x128xf32>
    %53 = arith.truncf %52 : vector<64x128xf32> to vector<64x128xbf16>
    %c0_59 = arith.constant 0 : index
    %c0_60 = arith.constant 0 : index
    %54 = vector.load %arg5[%c0_59, %c0_60] : memref<64x128xbf16, #tpu.memory_space<vmem>>, vector<64x128xbf16>
    tpu.vector_store %arg5[%c0_59, %c0_60], %53 {strides = array<i32>} : memref<64x128xbf16, #tpu.memory_space<vmem>>, vector<64x128xbf16>,
    return
  }
  func.func @transform_0(%arg0: i32) -> (i32, i32) {
    %c0_i32 = arith.constant 0 : i32
    %c0_i32_0 = arith.constant 0 : i32
    return %c0_i32, %arg0 : i32, i32
  }
  func.func @transform_1(%arg0: i32) -> (i32, i32, i32) {
    %c0_i32 = arith.constant 0 : i32
    %c0_i32_0 = arith.constant 0 : i32
    %c0_i32_1 = arith.constant 0 : i32
    return %arg0, %c0_i32, %c0_i32_0 : i32, i32, i32
  }
  func.func @transform_2(%arg0: i32) -> (i32, i32) {
    %c0_i32 = arith.constant 0 : i32
    %c0_i32_0 = arith.constant 0 : i32
    %c0_i32_1 = arith.constant 0 : i32
    return %c0_i32, %c0_i32_0 : i32, i32
  }
  func.func @transform_3(%arg0: i32) -> (i32, i32) {
    %c0_i32 = arith.constant 0 : i32
    %c0_i32_0 = arith.constant 0 : i32
    %c0_i32_1 = arith.constant 0 : i32
    return %c0_i32, %c0_i32_0 : i32, i32
  }
  func.func @transform_4(%arg0: i32) -> (i32, i32) {
    %c0_i32 = arith.constant 0 : i32
    %c0_i32_0 = arith.constant 0 : i32
    return %c0_i32, %arg0 : i32, i32
  }
}

module attributes {stable_mosaic.version = 11 : i64} {
  func.func @_convt_s2_kernel(%arg0: i32, %arg1: memref<16x128xbf16, #tpu.memory_space<vmem>>, %arg2: memref<1x16x128xbf16, #tpu.memory_space<vmem>>, %arg3: memref<32x144xbf16, #tpu.memory_space<vmem>>, %arg4: memref<32x1xf32, #tpu.memory_space<vmem>>, %arg5: memref<32x128xbf16, #tpu.memory_space<vmem>>, %arg6: memref<144x128xbf16, #tpu.memory_space<vmem>>) attributes {dimension_semantics = [#tpu.dimension_semantics<parallel>], iteration_bounds = array<i64: 2>, scalar_prefetch = 0 : i64, scratch_operands = 1 : i64, tpu.core_type = #tpu.core_type<tc>, window_params = [{transform_indices = @transform_0, window_bounds = array<i64: 16, 128>}, {transform_indices = @transform_1, window_bounds = array<i64: 1, 16, 128>}, {pipeline_mode = #tpu.pipeline_mode<synchronous>, transform_indices = @transform_2, window_bounds = array<i64: 32, 144>}, {pipeline_mode = #tpu.pipeline_mode<synchronous>, transform_indices = @transform_3, window_bounds = array<i64: 32, 1>}, {transform_indices = @transform_4, window_bounds = array<i64: 32, 128>}]} {
    %c0 = arith.constant 0 : index
    %c0_0 = arith.constant 0 : index
    %0 = vector.load %arg1[%c0, %c0_0] : memref<16x128xbf16, #tpu.memory_space<vmem>>, vector<16x128xbf16>
    %c0_1 = arith.constant 0 : index
    %c0_2 = arith.constant 0 : index
    %1 = vector.load %arg6[%c0_1, %c0_2] : memref<144x128xbf16, #tpu.memory_space<vmem>>, vector<16x128xbf16>
    tpu.vector_store %arg6[%c0_1, %c0_2], %0 {strides = array<i32>} : memref<144x128xbf16, #tpu.memory_space<vmem>>, vector<16x128xbf16>,
    %c0_3 = arith.constant 0 : index
    %c1 = arith.constant 1 : index
    %2 = vector.load %arg1[%c0_3, %c1] : memref<16x128xbf16, #tpu.memory_space<vmem>>, vector<16x127xbf16>
    %c16 = arith.constant 16 : index
    %c0_4 = arith.constant 0 : index
    %3 = vector.load %arg6[%c16, %c0_4] : memref<144x128xbf16, #tpu.memory_space<vmem>>, vector<16x127xbf16>
    tpu.vector_store %arg6[%c16, %c0_4], %2 {strides = array<i32>} : memref<144x128xbf16, #tpu.memory_space<vmem>>, vector<16x127xbf16>,
    %c0_5 = arith.constant 0 : index
    %c0_6 = arith.constant 0 : index
    %c0_7 = arith.constant 0 : index
    %4 = vector.load %arg2[%c0_5, %c0_6, %c0_7] : memref<1x16x128xbf16, #tpu.memory_space<vmem>>, vector<1x16x1xbf16>
    %5 = vector.shape_cast %4 : vector<1x16x1xbf16> to vector<16x1xbf16>
    %c16_8 = arith.constant 16 : index
    %c127 = arith.constant 127 : index
    %6 = vector.load %arg6[%c16_8, %c127] : memref<144x128xbf16, #tpu.memory_space<vmem>>, vector<16x1xbf16>
    tpu.vector_store %arg6[%c16_8, %c127], %5 {strides = array<i32>} : memref<144x128xbf16, #tpu.memory_space<vmem>>, vector<16x1xbf16>,
    %c0_9 = arith.constant 0 : index
    %c2 = arith.constant 2 : index
    %7 = vector.load %arg1[%c0_9, %c2] : memref<16x128xbf16, #tpu.memory_space<vmem>>, vector<16x126xbf16>
    %c32 = arith.constant 32 : index
    %c0_10 = arith.constant 0 : index
    %8 = vector.load %arg6[%c32, %c0_10] : memref<144x128xbf16, #tpu.memory_space<vmem>>, vector<16x126xbf16>
    tpu.vector_store %arg6[%c32, %c0_10], %7 {strides = array<i32>} : memref<144x128xbf16, #tpu.memory_space<vmem>>, vector<16x126xbf16>,
    %c0_11 = arith.constant 0 : index
    %c0_12 = arith.constant 0 : index
    %c0_13 = arith.constant 0 : index
    %9 = vector.load %arg2[%c0_11, %c0_12, %c0_13] : memref<1x16x128xbf16, #tpu.memory_space<vmem>>, vector<1x16x2xbf16>
    %10 = vector.shape_cast %9 : vector<1x16x2xbf16> to vector<16x2xbf16>
    %c32_14 = arith.constant 32 : index
    %c126 = arith.constant 126 : index
    %11 = vector.load %arg6[%c32_14, %c126] : memref<144x128xbf16, #tpu.memory_space<vmem>>, vector<16x2xbf16>
    tpu.vector_store %arg6[%c32_14, %c126], %10 {strides = array<i32>} : memref<144x128xbf16, #tpu.memory_space<vmem>>, vector<16x2xbf16>,
    %c0_15 = arith.constant 0 : index
    %c10 = arith.constant 10 : index
    %12 = vector.load %arg1[%c0_15, %c10] : memref<16x128xbf16, #tpu.memory_space<vmem>>, vector<16x118xbf16>
    %c48 = arith.constant 48 : index
    %c0_16 = arith.constant 0 : index
    %13 = vector.load %arg6[%c48, %c0_16] : memref<144x128xbf16, #tpu.memory_space<vmem>>, vector<16x118xbf16>
    tpu.vector_store %arg6[%c48, %c0_16], %12 {strides = array<i32>} : memref<144x128xbf16, #tpu.memory_space<vmem>>, vector<16x118xbf16>,
    %c0_17 = arith.constant 0 : index
    %c0_18 = arith.constant 0 : index
    %c0_19 = arith.constant 0 : index
    %14 = vector.load %arg2[%c0_17, %c0_18, %c0_19] : memref<1x16x128xbf16, #tpu.memory_space<vmem>>, vector<1x16x10xbf16>
    %15 = vector.shape_cast %14 : vector<1x16x10xbf16> to vector<16x10xbf16>
    %c48_20 = arith.constant 48 : index
    %c118 = arith.constant 118 : index
    %16 = vector.load %arg6[%c48_20, %c118] : memref<144x128xbf16, #tpu.memory_space<vmem>>, vector<16x10xbf16>
    tpu.vector_store %arg6[%c48_20, %c118], %15 {strides = array<i32>} : memref<144x128xbf16, #tpu.memory_space<vmem>>, vector<16x10xbf16>,
    %c0_21 = arith.constant 0 : index
    %c11 = arith.constant 11 : index
    %17 = vector.load %arg1[%c0_21, %c11] : memref<16x128xbf16, #tpu.memory_space<vmem>>, vector<16x117xbf16>
    %c64 = arith.constant 64 : index
    %c0_22 = arith.constant 0 : index
    %18 = vector.load %arg6[%c64, %c0_22] : memref<144x128xbf16, #tpu.memory_space<vmem>>, vector<16x117xbf16>
    tpu.vector_store %arg6[%c64, %c0_22], %17 {strides = array<i32>} : memref<144x128xbf16, #tpu.memory_space<vmem>>, vector<16x117xbf16>,
    %c0_23 = arith.constant 0 : index
    %c0_24 = arith.constant 0 : index
    %c0_25 = arith.constant 0 : index
    %19 = vector.load %arg2[%c0_23, %c0_24, %c0_25] : memref<1x16x128xbf16, #tpu.memory_space<vmem>>, vector<1x16x11xbf16>
    %20 = vector.shape_cast %19 : vector<1x16x11xbf16> to vector<16x11xbf16>
    %c64_26 = arith.constant 64 : index
    %c117 = arith.constant 117 : index
    %21 = vector.load %arg6[%c64_26, %c117] : memref<144x128xbf16, #tpu.memory_space<vmem>>, vector<16x11xbf16>
    tpu.vector_store %arg6[%c64_26, %c117], %20 {strides = array<i32>} : memref<144x128xbf16, #tpu.memory_space<vmem>>, vector<16x11xbf16>,
    %c0_27 = arith.constant 0 : index
    %c12 = arith.constant 12 : index
    %22 = vector.load %arg1[%c0_27, %c12] : memref<16x128xbf16, #tpu.memory_space<vmem>>, vector<16x116xbf16>
    %c80 = arith.constant 80 : index
    %c0_28 = arith.constant 0 : index
    %23 = vector.load %arg6[%c80, %c0_28] : memref<144x128xbf16, #tpu.memory_space<vmem>>, vector<16x116xbf16>
    tpu.vector_store %arg6[%c80, %c0_28], %22 {strides = array<i32>} : memref<144x128xbf16, #tpu.memory_space<vmem>>, vector<16x116xbf16>,
    %c0_29 = arith.constant 0 : index
    %c0_30 = arith.constant 0 : index
    %c0_31 = arith.constant 0 : index
    %24 = vector.load %arg2[%c0_29, %c0_30, %c0_31] : memref<1x16x128xbf16, #tpu.memory_space<vmem>>, vector<1x16x12xbf16>
    %25 = vector.shape_cast %24 : vector<1x16x12xbf16> to vector<16x12xbf16>
    %c80_32 = arith.constant 80 : index
    %c116 = arith.constant 116 : index
    %26 = vector.load %arg6[%c80_32, %c116] : memref<144x128xbf16, #tpu.memory_space<vmem>>, vector<16x12xbf16>
    tpu.vector_store %arg6[%c80_32, %c116], %25 {strides = array<i32>} : memref<144x128xbf16, #tpu.memory_space<vmem>>, vector<16x12xbf16>,
    %c0_33 = arith.constant 0 : index
    %c20 = arith.constant 20 : index
    %27 = vector.load %arg1[%c0_33, %c20] : memref<16x128xbf16, #tpu.memory_space<vmem>>, vector<16x108xbf16>
    %c96 = arith.constant 96 : index
    %c0_34 = arith.constant 0 : index
    %28 = vector.load %arg6[%c96, %c0_34] : memref<144x128xbf16, #tpu.memory_space<vmem>>, vector<16x108xbf16>
    tpu.vector_store %arg6[%c96, %c0_34], %27 {strides = array<i32>} : memref<144x128xbf16, #tpu.memory_space<vmem>>, vector<16x108xbf16>,
    %c0_35 = arith.constant 0 : index
    %c0_36 = arith.constant 0 : index
    %c0_37 = arith.constant 0 : index
    %29 = vector.load %arg2[%c0_35, %c0_36, %c0_37] : memref<1x16x128xbf16, #tpu.memory_space<vmem>>, vector<1x16x20xbf16>
    %30 = vector.shape_cast %29 : vector<1x16x20xbf16> to vector<16x20xbf16>
    %c96_38 = arith.constant 96 : index
    %c108 = arith.constant 108 : index
    %31 = vector.load %arg6[%c96_38, %c108] : memref<144x128xbf16, #tpu.memory_space<vmem>>, vector<16x20xbf16>
    tpu.vector_store %arg6[%c96_38, %c108], %30 {strides = array<i32>} : memref<144x128xbf16, #tpu.memory_space<vmem>>, vector<16x20xbf16>,
    %c0_39 = arith.constant 0 : index
    %c21 = arith.constant 21 : index
    %32 = vector.load %arg1[%c0_39, %c21] : memref<16x128xbf16, #tpu.memory_space<vmem>>, vector<16x107xbf16>
    %c112 = arith.constant 112 : index
    %c0_40 = arith.constant 0 : index
    %33 = vector.load %arg6[%c112, %c0_40] : memref<144x128xbf16, #tpu.memory_space<vmem>>, vector<16x107xbf16>
    tpu.vector_store %arg6[%c112, %c0_40], %32 {strides = array<i32>} : memref<144x128xbf16, #tpu.memory_space<vmem>>, vector<16x107xbf16>,
    %c0_41 = arith.constant 0 : index
    %c0_42 = arith.constant 0 : index
    %c0_43 = arith.constant 0 : index
    %34 = vector.load %arg2[%c0_41, %c0_42, %c0_43] : memref<1x16x128xbf16, #tpu.memory_space<vmem>>, vector<1x16x21xbf16>
    %35 = vector.shape_cast %34 : vector<1x16x21xbf16> to vector<16x21xbf16>
    %c112_44 = arith.constant 112 : index
    %c107 = arith.constant 107 : index
    %36 = vector.load %arg6[%c112_44, %c107] : memref<144x128xbf16, #tpu.memory_space<vmem>>, vector<16x21xbf16>
    tpu.vector_store %arg6[%c112_44, %c107], %35 {strides = array<i32>} : memref<144x128xbf16, #tpu.memory_space<vmem>>, vector<16x21xbf16>,
    %c0_45 = arith.constant 0 : index
    %c22 = arith.constant 22 : index
    %37 = vector.load %arg1[%c0_45, %c22] : memref<16x128xbf16, #tpu.memory_space<vmem>>, vector<16x106xbf16>
    %c128 = arith.constant 128 : index
    %c0_46 = arith.constant 0 : index
    %38 = vector.load %arg6[%c128, %c0_46] : memref<144x128xbf16, #tpu.memory_space<vmem>>, vector<16x106xbf16>
    tpu.vector_store %arg6[%c128, %c0_46], %37 {strides = array<i32>} : memref<144x128xbf16, #tpu.memory_space<vmem>>, vector<16x106xbf16>,
    %c0_47 = arith.constant 0 : index
    %c0_48 = arith.constant 0 : index
    %c0_49 = arith.constant 0 : index
    %39 = vector.load %arg2[%c0_47, %c0_48, %c0_49] : memref<1x16x128xbf16, #tpu.memory_space<vmem>>, vector<1x16x22xbf16>
    %40 = vector.shape_cast %39 : vector<1x16x22xbf16> to vector<16x22xbf16>
    %c128_50 = arith.constant 128 : index
    %c106 = arith.constant 106 : index
    %41 = vector.load %arg6[%c128_50, %c106] : memref<144x128xbf16, #tpu.memory_space<vmem>>, vector<16x22xbf16>
    tpu.vector_store %arg6[%c128_50, %c106], %40 {strides = array<i32>} : memref<144x128xbf16, #tpu.memory_space<vmem>>, vector<16x22xbf16>,
    %c0_51 = arith.constant 0 : index
    %c0_52 = arith.constant 0 : index
    %42 = vector.load %arg3[%c0_51, %c0_52] : memref<32x144xbf16, #tpu.memory_space<vmem>>, vector<32x144xbf16>
    %c0_53 = arith.constant 0 : index
    %c0_54 = arith.constant 0 : index
    %43 = vector.load %arg6[%c0_53, %c0_54] : memref<144x128xbf16, #tpu.memory_space<vmem>>, vector<144x128xbf16>
    %cst = arith.constant dense<0.000000e+00> : vector<32x128xf32>
    %44 = tpu.matmul %42, %43, %cst {dimension_numbers = #tpu.dot_dimension_numbers<[1], [0], [0], [1], [0, 0, 1, 1], [], []>} : vector<32x144xbf16>, vector<144x128xbf16>, vector<32x128xf32> -> vector<32x128xf32>
    %c0_55 = arith.constant 0 : index
    %c0_56 = arith.constant 0 : index
    %45 = vector.load %arg4[%c0_55, %c0_56] : memref<32x1xf32, #tpu.memory_space<vmem>>, vector<32x1xf32>
    %46 = vector.broadcast %45 : vector<32x1xf32> to vector<32x128xf32>
    %47 = arith.addf %44, %46 : vector<32x128xf32>
    %cst_57 = arith.constant 0.000000e+00 : f32
    %48 = vector.broadcast %cst_57 : f32 to vector<32x128xf32>
    %49 = arith.cmpf oge, %47, %48 : vector<32x128xf32>
    %cst_58 = arith.constant 5.000000e-02 : f32
    %50 = vector.broadcast %cst_58 : f32 to vector<32x128xf32>
    %51 = arith.mulf %50, %47 : vector<32x128xf32>
    %52 = arith.select %49, %47, %51 : vector<32x128xi1>, vector<32x128xf32>
    %53 = arith.truncf %52 : vector<32x128xf32> to vector<32x128xbf16>
    %c0_59 = arith.constant 0 : index
    %c0_60 = arith.constant 0 : index
    %54 = vector.load %arg5[%c0_59, %c0_60] : memref<32x128xbf16, #tpu.memory_space<vmem>>, vector<32x128xbf16>
    tpu.vector_store %arg5[%c0_59, %c0_60], %53 {strides = array<i32>} : memref<32x128xbf16, #tpu.memory_space<vmem>>, vector<32x128xbf16>,
    return
  }
  func.func @transform_0(%arg0: i32) -> (i32, i32) {
    %c0_i32 = arith.constant 0 : i32
    %c0_i32_0 = arith.constant 0 : i32
    return %c0_i32, %arg0 : i32, i32
  }
  func.func @transform_1(%arg0: i32) -> (i32, i32, i32) {
    %c0_i32 = arith.constant 0 : i32
    %c0_i32_0 = arith.constant 0 : i32
    %c0_i32_1 = arith.constant 0 : i32
    return %arg0, %c0_i32, %c0_i32_0 : i32, i32, i32
  }
  func.func @transform_2(%arg0: i32) -> (i32, i32) {
    %c0_i32 = arith.constant 0 : i32
    %c0_i32_0 = arith.constant 0 : i32
    %c0_i32_1 = arith.constant 0 : i32
    return %c0_i32, %c0_i32_0 : i32, i32
  }
  func.func @transform_3(%arg0: i32) -> (i32, i32) {
    %c0_i32 = arith.constant 0 : i32
    %c0_i32_0 = arith.constant 0 : i32
    %c0_i32_1 = arith.constant 0 : i32
    return %c0_i32, %c0_i32_0 : i32, i32
  }
  func.func @transform_4(%arg0: i32) -> (i32, i32) {
    %c0_i32 = arith.constant 0 : i32
    %c0_i32_0 = arith.constant 0 : i32
    return %c0_i32, %arg0 : i32, i32
  }
}

module attributes {stable_mosaic.version = 11 : i64} {
  func.func @_convt_s2_kernel(%arg0: i32, %arg1: memref<16x384xbf16, #tpu.memory_space<vmem>>, %arg2: memref<1x16x128xbf16, #tpu.memory_space<vmem>>, %arg3: memref<12x144xbf16, #tpu.memory_space<vmem>>, %arg4: memref<12x1xf32, #tpu.memory_space<vmem>>, %arg5: memref<12x384xf32, #tpu.memory_space<vmem>>, %arg6: memref<144x384xbf16, #tpu.memory_space<vmem>>) attributes {dimension_semantics = [#tpu.dimension_semantics<parallel>], iteration_bounds = array<i64: 2>, scalar_prefetch = 0 : i64, scratch_operands = 1 : i64, tpu.core_type = #tpu.core_type<tc>, window_params = [{transform_indices = @transform_0, window_bounds = array<i64: 16, 384>}, {transform_indices = @transform_1, window_bounds = array<i64: 1, 16, 128>}, {pipeline_mode = #tpu.pipeline_mode<synchronous>, transform_indices = @transform_2, window_bounds = array<i64: 12, 144>}, {pipeline_mode = #tpu.pipeline_mode<synchronous>, transform_indices = @transform_3, window_bounds = array<i64: 12, 1>}, {transform_indices = @transform_4, window_bounds = array<i64: 12, 384>}]} {
    %c0 = arith.constant 0 : index
    %c0_0 = arith.constant 0 : index
    %0 = vector.load %arg1[%c0, %c0_0] : memref<16x384xbf16, #tpu.memory_space<vmem>>, vector<16x384xbf16>
    %c0_1 = arith.constant 0 : index
    %c0_2 = arith.constant 0 : index
    %1 = vector.load %arg6[%c0_1, %c0_2] : memref<144x384xbf16, #tpu.memory_space<vmem>>, vector<16x384xbf16>
    tpu.vector_store %arg6[%c0_1, %c0_2], %0 {strides = array<i32>} : memref<144x384xbf16, #tpu.memory_space<vmem>>, vector<16x384xbf16>,
    %c0_3 = arith.constant 0 : index
    %c1 = arith.constant 1 : index
    %2 = vector.load %arg1[%c0_3, %c1] : memref<16x384xbf16, #tpu.memory_space<vmem>>, vector<16x383xbf16>
    %c16 = arith.constant 16 : index
    %c0_4 = arith.constant 0 : index
    %3 = vector.load %arg6[%c16, %c0_4] : memref<144x384xbf16, #tpu.memory_space<vmem>>, vector<16x383xbf16>
    tpu.vector_store %arg6[%c16, %c0_4], %2 {strides = array<i32>} : memref<144x384xbf16, #tpu.memory_space<vmem>>, vector<16x383xbf16>,
    %c0_5 = arith.constant 0 : index
    %c0_6 = arith.constant 0 : index
    %c0_7 = arith.constant 0 : index
    %4 = vector.load %arg2[%c0_5, %c0_6, %c0_7] : memref<1x16x128xbf16, #tpu.memory_space<vmem>>, vector<1x16x1xbf16>
    %5 = vector.shape_cast %4 : vector<1x16x1xbf16> to vector<16x1xbf16>
    %c16_8 = arith.constant 16 : index
    %c383 = arith.constant 383 : index
    %6 = vector.load %arg6[%c16_8, %c383] : memref<144x384xbf16, #tpu.memory_space<vmem>>, vector<16x1xbf16>
    tpu.vector_store %arg6[%c16_8, %c383], %5 {strides = array<i32>} : memref<144x384xbf16, #tpu.memory_space<vmem>>, vector<16x1xbf16>,
    %c0_9 = arith.constant 0 : index
    %c2 = arith.constant 2 : index
    %7 = vector.load %arg1[%c0_9, %c2] : memref<16x384xbf16, #tpu.memory_space<vmem>>, vector<16x382xbf16>
    %c32 = arith.constant 32 : index
    %c0_10 = arith.constant 0 : index
    %8 = vector.load %arg6[%c32, %c0_10] : memref<144x384xbf16, #tpu.memory_space<vmem>>, vector<16x382xbf16>
    tpu.vector_store %arg6[%c32, %c0_10], %7 {strides = array<i32>} : memref<144x384xbf16, #tpu.memory_space<vmem>>, vector<16x382xbf16>,
    %c0_11 = arith.constant 0 : index
    %c0_12 = arith.constant 0 : index
    %c0_13 = arith.constant 0 : index
    %9 = vector.load %arg2[%c0_11, %c0_12, %c0_13] : memref<1x16x128xbf16, #tpu.memory_space<vmem>>, vector<1x16x2xbf16>
    %10 = vector.shape_cast %9 : vector<1x16x2xbf16> to vector<16x2xbf16>
    %c32_14 = arith.constant 32 : index
    %c382 = arith.constant 382 : index
    %11 = vector.load %arg6[%c32_14, %c382] : memref<144x384xbf16, #tpu.memory_space<vmem>>, vector<16x2xbf16>
    tpu.vector_store %arg6[%c32_14, %c382], %10 {strides = array<i32>} : memref<144x384xbf16, #tpu.memory_space<vmem>>, vector<16x2xbf16>,
    %c0_15 = arith.constant 0 : index
    %c18 = arith.constant 18 : index
    %12 = vector.load %arg1[%c0_15, %c18] : memref<16x384xbf16, #tpu.memory_space<vmem>>, vector<16x366xbf16>
    %c48 = arith.constant 48 : index
    %c0_16 = arith.constant 0 : index
    %13 = vector.load %arg6[%c48, %c0_16] : memref<144x384xbf16, #tpu.memory_space<vmem>>, vector<16x366xbf16>
    tpu.vector_store %arg6[%c48, %c0_16], %12 {strides = array<i32>} : memref<144x384xbf16, #tpu.memory_space<vmem>>, vector<16x366xbf16>,
    %c0_17 = arith.constant 0 : index
    %c0_18 = arith.constant 0 : index
    %c0_19 = arith.constant 0 : index
    %14 = vector.load %arg2[%c0_17, %c0_18, %c0_19] : memref<1x16x128xbf16, #tpu.memory_space<vmem>>, vector<1x16x18xbf16>
    %15 = vector.shape_cast %14 : vector<1x16x18xbf16> to vector<16x18xbf16>
    %c48_20 = arith.constant 48 : index
    %c366 = arith.constant 366 : index
    %16 = vector.load %arg6[%c48_20, %c366] : memref<144x384xbf16, #tpu.memory_space<vmem>>, vector<16x18xbf16>
    tpu.vector_store %arg6[%c48_20, %c366], %15 {strides = array<i32>} : memref<144x384xbf16, #tpu.memory_space<vmem>>, vector<16x18xbf16>,
    %c0_21 = arith.constant 0 : index
    %c19 = arith.constant 19 : index
    %17 = vector.load %arg1[%c0_21, %c19] : memref<16x384xbf16, #tpu.memory_space<vmem>>, vector<16x365xbf16>
    %c64 = arith.constant 64 : index
    %c0_22 = arith.constant 0 : index
    %18 = vector.load %arg6[%c64, %c0_22] : memref<144x384xbf16, #tpu.memory_space<vmem>>, vector<16x365xbf16>
    tpu.vector_store %arg6[%c64, %c0_22], %17 {strides = array<i32>} : memref<144x384xbf16, #tpu.memory_space<vmem>>, vector<16x365xbf16>,
    %c0_23 = arith.constant 0 : index
    %c0_24 = arith.constant 0 : index
    %c0_25 = arith.constant 0 : index
    %19 = vector.load %arg2[%c0_23, %c0_24, %c0_25] : memref<1x16x128xbf16, #tpu.memory_space<vmem>>, vector<1x16x19xbf16>
    %20 = vector.shape_cast %19 : vector<1x16x19xbf16> to vector<16x19xbf16>
    %c64_26 = arith.constant 64 : index
    %c365 = arith.constant 365 : index
    %21 = vector.load %arg6[%c64_26, %c365] : memref<144x384xbf16, #tpu.memory_space<vmem>>, vector<16x19xbf16>
    tpu.vector_store %arg6[%c64_26, %c365], %20 {strides = array<i32>} : memref<144x384xbf16, #tpu.memory_space<vmem>>, vector<16x19xbf16>,
    %c0_27 = arith.constant 0 : index
    %c20 = arith.constant 20 : index
    %22 = vector.load %arg1[%c0_27, %c20] : memref<16x384xbf16, #tpu.memory_space<vmem>>, vector<16x364xbf16>
    %c80 = arith.constant 80 : index
    %c0_28 = arith.constant 0 : index
    %23 = vector.load %arg6[%c80, %c0_28] : memref<144x384xbf16, #tpu.memory_space<vmem>>, vector<16x364xbf16>
    tpu.vector_store %arg6[%c80, %c0_28], %22 {strides = array<i32>} : memref<144x384xbf16, #tpu.memory_space<vmem>>, vector<16x364xbf16>,
    %c0_29 = arith.constant 0 : index
    %c0_30 = arith.constant 0 : index
    %c0_31 = arith.constant 0 : index
    %24 = vector.load %arg2[%c0_29, %c0_30, %c0_31] : memref<1x16x128xbf16, #tpu.memory_space<vmem>>, vector<1x16x20xbf16>
    %25 = vector.shape_cast %24 : vector<1x16x20xbf16> to vector<16x20xbf16>
    %c80_32 = arith.constant 80 : index
    %c364 = arith.constant 364 : index
    %26 = vector.load %arg6[%c80_32, %c364] : memref<144x384xbf16, #tpu.memory_space<vmem>>, vector<16x20xbf16>
    tpu.vector_store %arg6[%c80_32, %c364], %25 {strides = array<i32>} : memref<144x384xbf16, #tpu.memory_space<vmem>>, vector<16x20xbf16>,
    %c0_33 = arith.constant 0 : index
    %c36 = arith.constant 36 : index
    %27 = vector.load %arg1[%c0_33, %c36] : memref<16x384xbf16, #tpu.memory_space<vmem>>, vector<16x348xbf16>
    %c96 = arith.constant 96 : index
    %c0_34 = arith.constant 0 : index
    %28 = vector.load %arg6[%c96, %c0_34] : memref<144x384xbf16, #tpu.memory_space<vmem>>, vector<16x348xbf16>
    tpu.vector_store %arg6[%c96, %c0_34], %27 {strides = array<i32>} : memref<144x384xbf16, #tpu.memory_space<vmem>>, vector<16x348xbf16>,
    %c0_35 = arith.constant 0 : index
    %c0_36 = arith.constant 0 : index
    %c0_37 = arith.constant 0 : index
    %29 = vector.load %arg2[%c0_35, %c0_36, %c0_37] : memref<1x16x128xbf16, #tpu.memory_space<vmem>>, vector<1x16x36xbf16>
    %30 = vector.shape_cast %29 : vector<1x16x36xbf16> to vector<16x36xbf16>
    %c96_38 = arith.constant 96 : index
    %c348 = arith.constant 348 : index
    %31 = vector.load %arg6[%c96_38, %c348] : memref<144x384xbf16, #tpu.memory_space<vmem>>, vector<16x36xbf16>
    tpu.vector_store %arg6[%c96_38, %c348], %30 {strides = array<i32>} : memref<144x384xbf16, #tpu.memory_space<vmem>>, vector<16x36xbf16>,
    %c0_39 = arith.constant 0 : index
    %c37 = arith.constant 37 : index
    %32 = vector.load %arg1[%c0_39, %c37] : memref<16x384xbf16, #tpu.memory_space<vmem>>, vector<16x347xbf16>
    %c112 = arith.constant 112 : index
    %c0_40 = arith.constant 0 : index
    %33 = vector.load %arg6[%c112, %c0_40] : memref<144x384xbf16, #tpu.memory_space<vmem>>, vector<16x347xbf16>
    tpu.vector_store %arg6[%c112, %c0_40], %32 {strides = array<i32>} : memref<144x384xbf16, #tpu.memory_space<vmem>>, vector<16x347xbf16>,
    %c0_41 = arith.constant 0 : index
    %c0_42 = arith.constant 0 : index
    %c0_43 = arith.constant 0 : index
    %34 = vector.load %arg2[%c0_41, %c0_42, %c0_43] : memref<1x16x128xbf16, #tpu.memory_space<vmem>>, vector<1x16x37xbf16>
    %35 = vector.shape_cast %34 : vector<1x16x37xbf16> to vector<16x37xbf16>
    %c112_44 = arith.constant 112 : index
    %c347 = arith.constant 347 : index
    %36 = vector.load %arg6[%c112_44, %c347] : memref<144x384xbf16, #tpu.memory_space<vmem>>, vector<16x37xbf16>
    tpu.vector_store %arg6[%c112_44, %c347], %35 {strides = array<i32>} : memref<144x384xbf16, #tpu.memory_space<vmem>>, vector<16x37xbf16>,
    %c0_45 = arith.constant 0 : index
    %c38 = arith.constant 38 : index
    %37 = vector.load %arg1[%c0_45, %c38] : memref<16x384xbf16, #tpu.memory_space<vmem>>, vector<16x346xbf16>
    %c128 = arith.constant 128 : index
    %c0_46 = arith.constant 0 : index
    %38 = vector.load %arg6[%c128, %c0_46] : memref<144x384xbf16, #tpu.memory_space<vmem>>, vector<16x346xbf16>
    tpu.vector_store %arg6[%c128, %c0_46], %37 {strides = array<i32>} : memref<144x384xbf16, #tpu.memory_space<vmem>>, vector<16x346xbf16>,
    %c0_47 = arith.constant 0 : index
    %c0_48 = arith.constant 0 : index
    %c0_49 = arith.constant 0 : index
    %39 = vector.load %arg2[%c0_47, %c0_48, %c0_49] : memref<1x16x128xbf16, #tpu.memory_space<vmem>>, vector<1x16x38xbf16>
    %40 = vector.shape_cast %39 : vector<1x16x38xbf16> to vector<16x38xbf16>
    %c128_50 = arith.constant 128 : index
    %c346 = arith.constant 346 : index
    %41 = vector.load %arg6[%c128_50, %c346] : memref<144x384xbf16, #tpu.memory_space<vmem>>, vector<16x38xbf16>
    tpu.vector_store %arg6[%c128_50, %c346], %40 {strides = array<i32>} : memref<144x384xbf16, #tpu.memory_space<vmem>>, vector<16x38xbf16>,
    %c0_51 = arith.constant 0 : index
    %c0_52 = arith.constant 0 : index
    %42 = vector.load %arg3[%c0_51, %c0_52] : memref<12x144xbf16, #tpu.memory_space<vmem>>, vector<12x144xbf16>
    %c0_53 = arith.constant 0 : index
    %c0_54 = arith.constant 0 : index
    %43 = vector.load %arg6[%c0_53, %c0_54] : memref<144x384xbf16, #tpu.memory_space<vmem>>, vector<144x384xbf16>
    %cst = arith.constant dense<0.000000e+00> : vector<12x384xf32>
    %44 = tpu.matmul %42, %43, %cst {dimension_numbers = #tpu.dot_dimension_numbers<[1], [0], [0], [1], [0, 0, 1, 1], [], []>} : vector<12x144xbf16>, vector<144x384xbf16>, vector<12x384xf32> -> vector<12x384xf32>
    %c0_55 = arith.constant 0 : index
    %c0_56 = arith.constant 0 : index
    %45 = vector.load %arg4[%c0_55, %c0_56] : memref<12x1xf32, #tpu.memory_space<vmem>>, vector<12x1xf32>
    %46 = vector.broadcast %45 : vector<12x1xf32> to vector<12x384xf32>
    %47 = arith.addf %44, %46 : vector<12x384xf32>
    %48 = math.tanh %47 : vector<12x384xf32>
    %c0_57 = arith.constant 0 : index
    %c0_58 = arith.constant 0 : index
    %49 = vector.load %arg5[%c0_57, %c0_58] : memref<12x384xf32, #tpu.memory_space<vmem>>, vector<12x384xf32>
    tpu.vector_store %arg5[%c0_57, %c0_58], %48 {strides = array<i32>} : memref<12x384xf32, #tpu.memory_space<vmem>>, vector<12x384xf32>,
    return
  }
  func.func @transform_0(%arg0: i32) -> (i32, i32) {
    %c0_i32 = arith.constant 0 : i32
    %c0_i32_0 = arith.constant 0 : i32
    return %c0_i32, %arg0 : i32, i32
  }
  func.func @transform_1(%arg0: i32) -> (i32, i32, i32) {
    %c0_i32 = arith.constant 0 : i32
    %c0_i32_0 = arith.constant 0 : i32
    %c0_i32_1 = arith.constant 0 : i32
    return %arg0, %c0_i32, %c0_i32_0 : i32, i32, i32
  }
  func.func @transform_2(%arg0: i32) -> (i32, i32) {
    %c0_i32 = arith.constant 0 : i32
    %c0_i32_0 = arith.constant 0 : i32
    %c0_i32_1 = arith.constant 0 : i32
    return %c0_i32, %c0_i32_0 : i32, i32
  }
  func.func @transform_3(%arg0: i32) -> (i32, i32) {
    %c0_i32 = arith.constant 0 : i32
    %c0_i32_0 = arith.constant 0 : i32
    %c0_i32_1 = arith.constant 0 : i32
    return %c0_i32, %c0_i32_0 : i32, i32
  }
  func.func @transform_4(%arg0: i32) -> (i32, i32) {
    %c0_i32 = arith.constant 0 : i32
    %c0_i32_0 = arith.constant 0 : i32
    return %c0_i32, %arg0 : i32, i32
  }
}

</mosaic_0001>

<bundles_post_ra>
// kernel: forward.5
= control target key start
LH: loop header
LB: loop body
LE: loop exit
PB: predicated region body
PF: predicated region fallthrough
CT: control target
= control target key end

     0   :  { %8 = vsyncpa [#allocation3], 0  ;;  %s251_s0 = inlined_call_operand.vmem [shape: bf16[2,32], index: 0, kind: input, shape index: {}]   ;;  %s252_s1 = inlined_call_operand.hbm [shape: bf16[32,256], index: 1, kind: input, shape index: {}]   ;;  %s253_s2 = inlined_call_operand.hbm [shape: f32[1,256], index: 2, kind: input, shape index: {}]   ;;  %s254_s3 = inlined_call_operand.vmem [shape: bf16[2,256], index: 3, kind: output, shape index: {}]  }
   0x1   :  { %9 = vsyncpa [#allocation5], 0  ;;  %s213_s12 = smov [#allocation2]  }
   0x2   :  { %s17_s13 = sshll.u32 %s213_s12, 4  ;;  %s18_s13 = int_to_ptr.vmem [resolvable:$true] %s17_s13 }
   0x3   :  { %s177_s14 = scalar_lea.vmem %s18_s13, 512  ;;  %p182_p1 = scmp.lt.s32.totalorder %s18_s13, %s18_s13 }
   0x4   :  { %p178_p0 = scmp.ne.s32.totalorder %s18_s13, %s177_s14  ;;  %p183_p2 = scmp.lt.s32.totalorder %s177_s14, %s177_s14 }
   0x6   :  { %p184_p3 = por %p183_p2, %p182_p1 }
   0x8   :  { %p185_p4 = pnand %p184_p3, %p178_p0 }
   0xa   :  { %188 = shalt.err (!%p185_p4)
}
   0xb   :  { %s214_s15 = smov 128   ;;  %s215_s16 = smov 8  }
   0xc   :  { %23 = dma.hbm_to_vmem [thread:$0]  %s252_s1, 512, %s18_s13, [#allocation3], %s214_s15, %s214_s15, %s215_s16  }
   0xd   :  { %s216_s19 = smov [#allocation4]  }
   0xe   :  { %s30_s20 = sshll.u32 %s216_s19, 4  ;;  %s31_s20 = int_to_ptr.vmem [resolvable:$true] %s30_s20 }
   0xf   :  { %s197_s21 = scalar_lea.vmem %s31_s20, 32  ;;  %p202_p6 = scmp.lt.s32.totalorder %s31_s20, %s31_s20 }
  0x10   :  { %p198_p5 = scmp.ne.s32.totalorder %s31_s20, %s197_s21  ;;  %p203_p7 = scmp.lt.s32.totalorder %s197_s21, %s197_s21 }
  0x12   :  { %p204_p8 = por %p203_p7, %p202_p6 }
  0x14   :  { %p205_p9 = pnand %p204_p8, %p198_p5 }
  0x16   :  { %208 = shalt.err (!%p205_p9)
}
  0x17   :  { %33 = dma.hbm_to_vmem [thread:$0]  %s253_s2, 32, %s31_s20, [#allocation5]  }
  0x18   :  { %209 = dma.done.wait [#allocation3], 512  }
  0x19   :  { %210 = vsyncadd [#allocation3], 4294966784 }
  0x1a   :  { %211 = dma.done.wait [#allocation5], 32  }
  0x1b   :  { %212 = vsyncadd [#allocation5], 4294967264  ;;  %v217_v0 = vmov 0   ;;  %v163_v1 = vld [vmem:[#allocation2 + $0x14] ss:$8 sps:$4 sm:$0xff]   ;;  %vm78_vm0 = vcmask 261120   ;;  %v48_v6 = vlaneseq }
  0x1c   :  { %114 = vmatprep.mubr.bf16.mxu0 %v217_v0  ;;  %v165_v2 = vld [vmem:[#allocation2 + $0x10] ss:$8 sps:$4 sm:$0xff]   ;;  %94 = vmatprep.subr.bf16.mxu0 %v163_v1  ;;  %v166_v3 = vld [vmem:[#allocation2 + $0x4] ss:$8 sps:$4 sm:$0xff]   ;;  %v168_v4 = vld [vmem:[#allocation2] ss:$8 sps:$4 sm:$0xff]  }
  0x1d   :  { %95 = vmatpush1.bf16.msra.mxu0 %v165_v2  ;;  %v41_v5 = vld [vmem:[%s251_s0] sm:$0x1]  ;;  %v49_v7 = vshrl.u32 %v48_v6, 7  ;;  %v218_v10 = vmov 1966171168  }
  0x1e   :  { %96 = vmatprep.subr.bf16.mxu0 %v166_v3  ;;  %v129_v11 = vunpack.c.l.s4 %v218_v10  ;;  %v46_v12 = vld [vmem:[#allocation4] sm:$0x3] }
  0x1f   :  { %v50_v8 = vsub.s32 0, %v49_v7  ;;  %v54_v9 = vsub.s32 1, %v49_v7 }
  0x20   :  { %v130_v15 = vunpack.c.0.s8 %v129_v11 }
  0x21   :  { %97 = vmatpush1.bf16.msra.mxu0 %v168_v4  ;;  %v51_v13 = vrot.slane %v46_v12, %v50_v8  ;;  %v55_v14 = vrot.slane %v46_v12, %v54_v9 }
  0x22   :  { %v133_v20 = vsub.s32 %v130_v15, %v49_v7 }
  0x24   :  { %154 = vmatmul.mubr.msk.bf16.vlgmr.msra.gmra.mxu0 %vm78_vm0, %v41_v5 }
  0xe4   :  { %v116_v16 = vpop.f32.mrf.mxu0 }
  0xe5   :  { %v117_v18 = vadd.f32 %v116_v16, %v51_v13 }
  0xe6   :  { %v118_v17 = vpop.f32.mrf.mxu0 }
  0xe7   :  { %v119_v19 = vadd.f32 %v118_v17, %v55_v14 }
  0xe8   :  { %v120_v21 = vpop.f32.mrf.mxu0 }
  0xe9   :  { %v155_v22 = vpack.c.bf16 %v119_v19, %v117_v18 }
  0xea   :  { %v121_v23 = vpop.f32.mrf.mxu0 }
  0xeb   :  { %v134_v24 = vrot.slane %v155_v22, %v133_v20 }
  0xed   :  { %156 = vst.sshfl [vmem:[%s254_s3] sm:$0x5 pattern:$0x73625140] %v134_v24 }
  0xee   :  { %148 = vsyncpa [#allocation3], 1 }
  0xef   :  { %149 = vsyncpa [#allocation5], 1 }

// kernel: forward.6
= control target key start
LH: loop header
LB: loop body
LE: loop exit
PB: predicated region body
PF: predicated region fallthrough
CT: control target
= control target key end

     0   :  { %s2409_s27 = smov 119   ;;  %s2410_s28 = smov 124   ;;  %vm733_vm0 = vcmask 969728   ;;  %vm341_vm1 = vcmask 1010688   ;;  %vm145_vm2 = vcmask 1035264   ;;  %vm390_vm3 = vcmask 1044448   ;;  %s3192_s0 = inlined_call_operand.vmem [shape: bf16[64,256], index: 0, kind: input, shape index: {}]   ;;  %s3193_s1 = inlined_call_operand.vmem [shape: bf16[1,64,128], index: 1, kind: input, shape index: {}]   ;;  %s3194_s2 = inlined_call_operand.vmem [shape: bf16[128,576], index: 2, kind: input, shape index: {}]   ;;  %s3195_s3 = inlined_call_operand.vmem [shape: f32[128,1], index: 3, kind: input, shape index: {}]   ;;  %s3196_s4 = inlined_call_operand.vmem [shape: bf16[128,128], index: 4, kind: output, shape index: {}]  }
   0x1   :  { %v39_v0 = vld [vmem:[%s3192_s0 + $0x30] sm:$0xf]  ;;  %v41_v1 = vld [vmem:[%s3192_s0 + $0x38] sm:$0xf]  ;;  %v37_v2 = vld [vmem:[%s3192_s0 + $0x28] sm:$0xf] }
   0x2   :  { %40 = vst [vmem:[#allocation3 + $0x18] sm:$0xf] %v39_v0  ;;  %42 = vst [vmem:[#allocation3 + $0x1c] sm:$0xf] %v41_v1  ;;  %v35_v3 = vld [vmem:[%s3192_s0 + $0x20] sm:$0xf] }
   0x3   :  { %38 = vst [vmem:[#allocation3 + $0x14] sm:$0xf] %v37_v2  ;;  %36 = vst [vmem:[#allocation3 + $0x10] sm:$0xf] %v35_v3  ;;  %v33_v4 = vld [vmem:[%s3192_s0 + $0x18] sm:$0xf] }
   0x4   :  { %v31_v5 = vld [vmem:[%s3192_s0 + $0x10] sm:$0xf]  ;;  %34 = vst [vmem:[#allocation3 + $0xc] sm:$0xf] %v33_v4  ;;  %s2411_s29 = smov 127   ;;  %s2412_s12 = smov 122  }
   0x5   :  { %32 = vst [vmem:[#allocation3 + $0x8] sm:$0xf] %v31_v5  ;;  %v357_v12 = vld [vmem:[%s3193_s1 + $0x1c] sm:$0xf]  ;;  %v356_v13 = vld [vmem:[%s3193_s1 + $0x18] sm:$0xf] }
   0x6   :  { %v29_v14 = vld [vmem:[%s3192_s0 + $0x8] sm:$0xf]  ;;  %v27_v15 = vld [vmem:[%s3192_s0] sm:$0xf]  ;;  %v749_v18 = vld [vmem:[%s3193_s1 + $0x1c] sm:$0xf] }
   0x7   :  { %30 = vst [vmem:[#allocation3 + $0x4] sm:$0xf] %v29_v14  ;;  %28 = vst [vmem:[#allocation3] sm:$0xf] %v27_v15  ;;  %v748_v19 = vld [vmem:[%s3193_s1 + $0x18] sm:$0xf] }
   0x8   :  { %v161_v20 = vld [vmem:[%s3193_s1 + $0x1c] sm:$0xf]  ;;  %v160_v21 = vld [vmem:[%s3193_s1 + $0x18] sm:$0xf]  ;;  %v355_v30 = vld [vmem:[%s3193_s1 + $0x14] sm:$0xf] }
   0x9   :  { %v699_v6 = vld [vmem:[#allocation3 + $0x18] sm:$0xf]  ;;  %v700_v8 = vld [vmem:[#allocation3 + $0x1c] sm:$0xf]  ;;  %v354_v31 = vld [vmem:[%s3193_s1 + $0x10] sm:$0xf] }
   0xa   :  { %v307_v7 = vld [vmem:[#allocation3 + $0x18] sm:$0xf]  ;;  %721 = vrot.lane.b32.xlu1 %v699_v6, %s2409_s27  ;;  %v308_v9 = vld [vmem:[#allocation3 + $0x1c] sm:$0xf]  ;;  %v306_v24 = vld [vmem:[#allocation3 + $0x14] sm:$0xf] }
   0xb   :  { %329 = vrot.lane.b32.xlu0 %v307_v7, %s2410_s28  ;;  %v112_v10 = vld [vmem:[#allocation3 + $0x1c] sm:$0xf]  ;;  %v111_v11 = vld [vmem:[#allocation3 + $0x18] sm:$0xf]  ;;  %v305_v25 = vld [vmem:[#allocation3 + $0x10] sm:$0xf] }
   0xc   :  { %v504_v16 = vld [vmem:[#allocation3 + $0x1c] sm:$0xf]  ;;  %v503_v17 = vld [vmem:[#allocation3 + $0x18] sm:$0xf]  ;;  %v698_v26 = vld [vmem:[#allocation3 + $0x14] sm:$0xf] }
   0xd   :  { %v553_v22 = vld [vmem:[%s3193_s1 + $0x1c] sm:$0xf]  ;;  %v552_v23 = vld [vmem:[%s3193_s1 + $0x18] sm:$0xf]  ;;  %v697_v27 = vld [vmem:[#allocation3 + $0x10] sm:$0xf] }
   0xe   :  { %723 = vrot.lane.b32.xlu1 %v700_v8, %s2409_s27  ;;  %v110_v28 = vld [vmem:[#allocation3 + $0x14] sm:$0xf]  ;;  %v109_v29 = vld [vmem:[#allocation3 + $0x10] sm:$0xf]  ;;  %v304_v40 = vld [vmem:[#allocation3 + $0xc] sm:$0xf] }
   0xf   :  { %331 = vrot.lane.b32.xlu0 %v308_v9, %s2410_s28  ;;  %v502_v32 = vld [vmem:[#allocation3 + $0x14] sm:$0xf]  ;;  %v501_v33 = vld [vmem:[#allocation3 + $0x10] sm:$0xf]  ;;  %v303_v41 = vld [vmem:[#allocation3 + $0x8] sm:$0xf] }
  0x10   :  { %v747_v34 = vld [vmem:[%s3193_s1 + $0x14] sm:$0xf]  ;;  %v746_v35 = vld [vmem:[%s3193_s1 + $0x10] sm:$0xf]  ;;  %v696_v42 = vld [vmem:[#allocation3 + $0xc] sm:$0xf] }
  0x11   :  { %v159_v36 = vld [vmem:[%s3193_s1 + $0x14] sm:$0xf]  ;;  %v158_v37 = vld [vmem:[%s3193_s1 + $0x10] sm:$0xf]  ;;  %v695_v43 = vld [vmem:[#allocation3 + $0x8] sm:$0xf] }
  0x12   :  { %135 = vrot.lane.b32.xlu1 %v112_v10, %s2411_s29  ;;  %v551_v38 = vld [vmem:[%s3193_s1 + $0x14] sm:$0xf]  ;;  %v550_v39 = vld [vmem:[%s3193_s1 + $0x10] sm:$0xf]  ;;  %v108_v44 = vld [vmem:[#allocation3 + $0xc] sm:$0xf] }
  0x13   :  { %133 = vrot.lane.b32.xlu0 %v111_v11, %s2411_s29  ;;  %v107_v45 = vld [vmem:[#allocation3 + $0x8] sm:$0xf]  ;;  %v353_v46 = vld [vmem:[%s3193_s1 + $0xc] sm:$0xf]  ;;  %v302_v56 = vld [vmem:[#allocation3 + $0x4] sm:$0xf] }
  0x14   :  { %v352_v47 = vld [vmem:[%s3193_s1 + $0x8] sm:$0xf]  ;;  %v500_v48 = vld [vmem:[#allocation3 + $0xc] sm:$0xf]  ;;  %v301_v57 = vld [vmem:[#allocation3] sm:$0xf] }
  0x15   :  { %v499_v49 = vld [vmem:[#allocation3 + $0x8] sm:$0xf]  ;;  %v745_v50 = vld [vmem:[%s3193_s1 + $0xc] sm:$0xf]  ;;  %v694_v58 = vld [vmem:[#allocation3 + $0x4] sm:$0xf] }
  0x16   :  { %380 = vrot.lane.b32.xlu1 %v357_v12, %s2410_s28  ;;  %v744_v51 = vld [vmem:[%s3193_s1 + $0x8] sm:$0xf]  ;;  %v157_v52 = vld [vmem:[%s3193_s1 + $0xc] sm:$0xf]  ;;  %v693_v59 = vld [vmem:[#allocation3] sm:$0xf] }
  0x17   :  { %378 = vrot.lane.b32.xlu0 %v356_v13, %s2410_s28  ;;  %v156_v53 = vld [vmem:[%s3193_s1 + $0x8] sm:$0xf]  ;;  %v549_v54 = vld [vmem:[%s3193_s1 + $0xc] sm:$0xf]  ;;  %v106_v60 = vld [vmem:[#allocation3 + $0x4] sm:$0xf] }
  0x18   :  { %v548_v55 = vld [vmem:[%s3193_s1 + $0x8] sm:$0xf]  ;;  %v105_v61 = vld [vmem:[#allocation3] sm:$0xf]  ;;  %v351_v62 = vld [vmem:[%s3193_s1 + $0x4] sm:$0xf] }
  0x19   :  { %v350_v63 = vld [vmem:[%s3193_s1] sm:$0xf]  ;;  %v498_v0 = vld [vmem:[#allocation3 + $0x4] sm:$0xf]  ;;  %v210_v14 = vld [vmem:[#allocation3 + $0x1c] sm:$0xf] }
  0x1a   :  { %527 = vrot.lane.b32.xlu1 %v504_v16, %s2412_s12  ;;  %v497_v1 = vld [vmem:[#allocation3] sm:$0xf]  ;;  %v743_v2 = vld [vmem:[%s3193_s1 + $0x4] sm:$0xf]  ;;  %v209_v15 = vld [vmem:[#allocation3 + $0x18] sm:$0xf] }
  0x1b   :  { %525 = vrot.lane.b32.xlu0 %v503_v17, %s2412_s12  ;;  %v742_v3 = vld [vmem:[%s3193_s1] sm:$0xf]  ;;  %v155_v6 = vld [vmem:[%s3193_s1 + $0x4] sm:$0xf]  ;;  %vm537_vm4 = vcmask 994304   ;;  %vm782_vm5 = vcmask 1044408  }
  0x1c   :  { %v154_v7 = vld [vmem:[%s3193_s1] sm:$0xf]  ;;  %v547_v10 = vld [vmem:[%s3193_s1 + $0x4] sm:$0xf]  ;;  %vm194_vm6 = vcmask 1044472   ;;  %s2415_s5 = smov 123  }
  0x1d   :  { %v546_v11 = vld [vmem:[%s3193_s1] sm:$0xf]  ;;  %vm586_vm7 = vcmask 1044432   ;;  %vm243_vm8 = vcmask 1027072   ;;  %vm635_vm9 = vcmask 977920   ;;  %vm292_vm10 = vcmask 1044464  }
  0x1e   :  { %772 = vrot.lane.b32.xlu1 %v749_v18, %s2409_s27  ;;  %v602_v18 = vld [vmem:[#allocation3 + $0x1c] sm:$0xf]  ;;  %vm439_vm11 = vcmask 1002496   ;;  %vm684_vm12 = vcmask 1044416   ;;  %vm488_vm13 = vcmask 1044440   ;;  %vm831_vm14 = vcmask 961536  }
  0x1f   :  { %770 = vrot.lane.b32.xlu0 %v748_v19, %s2409_s27  ;;  %v601_v19 = vld [vmem:[#allocation3 + $0x18] sm:$0xf]  ;;  %vm880_vm15 = vcmask 1044400  }
  0x22   :  { %184 = vrot.lane.b32.xlu1 %v161_v20, %s2411_s29 }
  0x23   :  { %182 = vrot.lane.b32.xlu0 %v160_v21, %s2411_s29 }
  0x26   :  { %576 = vrot.lane.b32.xlu1 %v553_v22, %s2412_s12  ;;  %v259_v22 = vld [vmem:[%s3193_s1 + $0x1c] sm:$0xf] }
  0x27   :  { %574 = vrot.lane.b32.xlu0 %v552_v23, %s2412_s12  ;;  %v258_v23 = vld [vmem:[%s3193_s1 + $0x18] sm:$0xf] }
  0x2a   :  { %327 = vrot.lane.b32.xlu1 %v306_v24, %s2410_s28 }
  0x2b   :  { %325 = vrot.lane.b32.xlu0 %v305_v25, %s2410_s28 }
  0x2e   :  { %719 = vrot.lane.b32.xlu1 %v698_v26, %s2409_s27 }
  0x2f   :  { %717 = vrot.lane.b32.xlu0 %v697_v27, %s2409_s27  ;;  %v406_v27 = vld [vmem:[#allocation3 + $0x1c] sm:$0xf] }
  0x32   :  { %131 = vrot.lane.b32.xlu1 %v110_v28, %s2411_s29  ;;  %v405_v28 = vld [vmem:[#allocation3 + $0x18] sm:$0xf] }
  0x33   :  { %129 = vrot.lane.b32.xlu0 %v109_v29, %s2411_s29 }
  0x36   :  { %376 = vrot.lane.b32.xlu1 %v355_v30, %s2410_s28 }
  0x37   :  { %374 = vrot.lane.b32.xlu0 %v354_v31, %s2410_s28  ;;  %v651_v31 = vld [vmem:[%s3193_s1 + $0x1c] sm:$0xf] }
  0x3a   :  { %523 = vrot.lane.b32.xlu1 %v502_v32, %s2412_s12  ;;  %v650_v32 = vld [vmem:[%s3193_s1 + $0x18] sm:$0xf] }
  0x3b   :  { %521 = vrot.lane.b32.xlu0 %v501_v33, %s2412_s12 }
  0x3e   :  { %768 = vrot.lane.b32.xlu1 %v747_v34, %s2409_s27 }
  0x3f   :  { %766 = vrot.lane.b32.xlu0 %v746_v35, %s2409_s27 }
  0x42   :  { %180 = vrot.lane.b32.xlu1 %v159_v36, %s2411_s29  ;;  %v455_v36 = vld [vmem:[%s3193_s1 + $0x1c] sm:$0xf] }
  0x43   :  { %178 = vrot.lane.b32.xlu0 %v158_v37, %s2411_s29  ;;  %v454_v37 = vld [vmem:[%s3193_s1 + $0x18] sm:$0xf] }
  0x46   :  { %572 = vrot.lane.b32.xlu1 %v551_v38, %s2412_s12 }
  0x47   :  { %570 = vrot.lane.b32.xlu0 %v550_v39, %s2412_s12 }
  0x4a   :  { %323 = vrot.lane.b32.xlu1 %v304_v40, %s2410_s28 }
  0x4b   :  { %321 = vrot.lane.b32.xlu0 %v303_v41, %s2410_s28  ;;  %v95_v41 = vld [vmem:[#allocation3 + $0x18] sm:$0xff]  }
  0x4c   :  { %103 = vst [vmem:[#allocation2 + $0x18] sm:$0xff] %v95_v41  }
  0x4e   :  { %715 = vrot.lane.b32.xlu1 %v696_v42, %s2409_s27  ;;  %v208_v42 = vld [vmem:[#allocation3 + $0x14] sm:$0xf] }
  0x4f   :  { %713 = vrot.lane.b32.xlu0 %v695_v43, %s2409_s27  ;;  %v207_v43 = vld [vmem:[#allocation3 + $0x10] sm:$0xf] }
  0x52   :  { %127 = vrot.lane.b32.xlu1 %v108_v44, %s2411_s29 }
  0x53   :  { %125 = vrot.lane.b32.xlu0 %v107_v45, %s2411_s29 }
  0x56   :  { %372 = vrot.lane.b32.xlu1 %v353_v46, %s2410_s28 }
  0x57   :  { %370 = vrot.lane.b32.xlu0 %v352_v47, %s2410_s28  ;;  %v600_v47 = vld [vmem:[#allocation3 + $0x14] sm:$0xf] }
  0x5a   :  { %519 = vrot.lane.b32.xlu1 %v500_v48, %s2412_s12  ;;  %v599_v48 = vld [vmem:[#allocation3 + $0x10] sm:$0xf] }
  0x5b   :  { %517 = vrot.lane.b32.xlu0 %v499_v49, %s2412_s12 }
  0x5e   :  { %764 = vrot.lane.b32.xlu1 %v745_v50, %s2409_s27 }
  0x5f   :  { %762 = vrot.lane.b32.xlu0 %v744_v51, %s2409_s27  ;;  %v257_v51 = vld [vmem:[%s3193_s1 + $0x14] sm:$0xf] }
  0x62   :  { %176 = vrot.lane.b32.xlu1 %v157_v52, %s2411_s29  ;;  %v256_v52 = vld [vmem:[%s3193_s1 + $0x10] sm:$0xf] }
  0x63   :  { %174 = vrot.lane.b32.xlu0 %v156_v53, %s2411_s29 }
  0x66   :  { %568 = vrot.lane.b32.xlu1 %v549_v54, %s2412_s12 }
  0x67   :  { %566 = vrot.lane.b32.xlu0 %v548_v55, %s2412_s12  ;;  %v404_v55 = vld [vmem:[#allocation3 + $0x14] sm:$0xf] }
  0x6a   :  { %319 = vrot.lane.b32.xlu1 %v302_v56, %s2410_s28  ;;  %v403_v56 = vld [vmem:[#allocation3 + $0x10] sm:$0xf] }
  0x6b   :  { %317 = vrot.lane.b32.xlu0 %v301_v57, %s2410_s28 }
  0x6e   :  { %711 = vrot.lane.b32.xlu1 %v694_v58, %s2409_s27 }
  0x6f   :  { %709 = vrot.lane.b32.xlu0 %v693_v59, %s2409_s27  ;;  %v649_v59 = vld [vmem:[%s3193_s1 + $0x14] sm:$0xf] }
  0x72   :  { %123 = vrot.lane.b32.xlu1 %v106_v60, %s2411_s29  ;;  %v648_v60 = vld [vmem:[%s3193_s1 + $0x10] sm:$0xf] }
  0x73   :  { %121 = vrot.lane.b32.xlu0 %v105_v61, %s2411_s29 }
  0x76   :  { %368 = vrot.lane.b32.xlu1 %v351_v62, %s2410_s28 }
  0x77   :  { %366 = vrot.lane.b32.xlu0 %v350_v63, %s2410_s28 }
  0x7a   :  { %515 = vrot.lane.b32.xlu1 %v498_v0, %s2412_s12  ;;  %v453_v0 = vld [vmem:[%s3193_s1 + $0x14] sm:$0xf] }
  0x7b   :  { %513 = vrot.lane.b32.xlu0 %v497_v1, %s2412_s12  ;;  %v452_v1 = vld [vmem:[%s3193_s1 + $0x10] sm:$0xf] }
  0x7c   :  { %v722_v4 = vpop.permute.xlu1 %721 }
  0x7d   :  { %v330_v5 = vpop.permute.xlu0 %329  ;;  %740 = vst.msk [vmem:[#allocation2 + $0xf8] sm:$0xf] %vm733_vm0, %v722_v4  ;;  %v93_v4 = vld [vmem:[#allocation3 + $0x10] sm:$0xff]  }
  0x7e   :  { %348 = vst.msk [vmem:[#allocation2 + $0x78] sm:$0xf] %vm341_vm1, %v330_v5  ;;  %760 = vrot.lane.b32.xlu1 %v743_v2, %s2409_s27  ;;  %101 = vst [vmem:[#allocation2 + $0x10] sm:$0xff] %v93_v4   ;;  %v206_v5 = vld [vmem:[#allocation3 + $0xc] sm:$0xf] }
  0x7f   :  { %758 = vrot.lane.b32.xlu0 %v742_v3, %s2409_s27  ;;  %v847_v4 = vld [vmem:[%s3193_s1 + $0x1c] sm:$0xf] }
  0x80   :  { %v724_v8 = vpop.permute.xlu1 %723 }
  0x81   :  { %v332_v9 = vpop.permute.xlu0 %331  ;;  %741 = vst.msk [vmem:[#allocation2 + $0xfc] sm:$0xf] %vm733_vm0, %v724_v8 }
  0x82   :  { %349 = vst.msk [vmem:[#allocation2 + $0x7c] sm:$0xf] %vm341_vm1, %v332_v9  ;;  %172 = vrot.lane.b32.xlu1 %v155_v6, %s2411_s29  ;;  %v205_v6 = vld [vmem:[#allocation3 + $0x8] sm:$0xf] }
  0x83   :  { %170 = vrot.lane.b32.xlu0 %v154_v7, %s2411_s29  ;;  %s2413_s29 = smov 126  }
  0x84   :  { %v136_v12 = vpop.permute.xlu1 %135 }
  0x85   :  { %v134_v13 = vpop.permute.xlu0 %133  ;;  %153 = vst.msk [vmem:[#allocation2 + $0x3c] sm:$0xf] %vm145_vm2, %v136_v12 }
  0x86   :  { %152 = vst.msk [vmem:[#allocation2 + $0x38] sm:$0xf] %vm145_vm2, %v134_v13  ;;  %564 = vrot.lane.b32.xlu1 %v547_v10, %s2412_s12  ;;  %v598_v10 = vld [vmem:[#allocation3 + $0xc] sm:$0xf] }
  0x87   :  { %562 = vrot.lane.b32.xlu0 %v546_v11, %s2412_s12  ;;  %s2414_s12 = smov 120   ;;  %v597_v11 = vld [vmem:[#allocation3 + $0x8] sm:$0xf] }
  0x88   :  { %v381_v16 = vpop.permute.xlu1 %380 }
  0x89   :  { %v379_v17 = vpop.permute.xlu0 %378  ;;  %398 = vst.msk [vmem:[#allocation2 + $0x7c] sm:$0xf] %vm390_vm3, %v381_v16  ;;  %v254_v16 = vld [vmem:[%s3193_s1 + $0x8] sm:$0xf] }
  0x8a   :  { %397 = vst.msk [vmem:[#allocation2 + $0x78] sm:$0xf] %vm390_vm3, %v379_v17  ;;  %233 = vrot.lane.b32.xlu1 %v210_v14, %s2413_s29 }
  0x8b   :  { %231 = vrot.lane.b32.xlu0 %v209_v15, %s2413_s29  ;;  %v255_v15 = vld [vmem:[%s3193_s1 + $0xc] sm:$0xf] }
  0x8c   :  { %v528_v20 = vpop.permute.xlu1 %527 }
  0x8d   :  { %v526_v21 = vpop.permute.xlu0 %525  ;;  %545 = vst.msk [vmem:[#allocation2 + $0xbc] sm:$0xf] %vm537_vm4, %v528_v20  ;;  %v402_v20 = vld [vmem:[#allocation3 + $0xc] sm:$0xf] }
  0x8e   :  { %544 = vst.msk [vmem:[#allocation2 + $0xb8] sm:$0xf] %vm537_vm4, %v526_v21  ;;  %625 = vrot.lane.b32.xlu1 %v602_v18, %s2414_s12  ;;  %v401_v21 = vld [vmem:[#allocation3 + $0x8] sm:$0xf] }
  0x8f   :  { %623 = vrot.lane.b32.xlu0 %v601_v19, %s2414_s12 }
  0x90   :  { %v773_v24 = vpop.permute.xlu1 %772 }
  0x91   :  { %v771_v25 = vpop.permute.xlu0 %770  ;;  %v2319_v26 = vld [vmem:[#allocation2 + $0x78] sm:$0xff]   ;;  %790 = vst.msk [vmem:[#allocation2 + $0xfc] sm:$0xf] %vm782_vm5, %v773_v24  ;;  %v647_v24 = vld [vmem:[%s3193_s1 + $0xc] sm:$0xf] }
  0x92   :  { %789 = vst.msk [vmem:[#allocation2 + $0xf8] sm:$0xf] %vm782_vm5, %v771_v25  ;;  %282 = vrot.lane.b32.xlu1 %v259_v22, %s2413_s29  ;;  %2136 = vmatprep.subr.bf16.mxu0 %v2319_v26  ;;  %v646_v25 = vld [vmem:[%s3193_s1 + $0x8] sm:$0xf] }
  0x93   :  { %280 = vrot.lane.b32.xlu0 %v258_v23, %s2413_s29 }
  0x94   :  { %v185_v29 = vpop.permute.xlu1 %184 }
  0x95   :  { %v183_v30 = vpop.permute.xlu0 %182  ;;  %202 = vst.msk [vmem:[#allocation2 + $0x3c] sm:$0xf] %vm194_vm6, %v185_v29  ;;  %v451_v29 = vld [vmem:[%s3193_s1 + $0xc] sm:$0xf] }
  0x96   :  { %201 = vst.msk [vmem:[#allocation2 + $0x38] sm:$0xf] %vm194_vm6, %v183_v30  ;;  %429 = vrot.lane.b32.xlu1 %v406_v27, %s2415_s5  ;;  %v450_v30 = vld [vmem:[%s3193_s1 + $0x8] sm:$0xf] }
  0x97   :  { %427 = vrot.lane.b32.xlu0 %v405_v28, %s2415_s5  ;;  %v91_v28 = vld [vmem:[#allocation3 + $0x8] sm:$0xff]  }
  0x98   :  { %v577_v33 = vpop.permute.xlu1 %576  ;;  %99 = vst [vmem:[#allocation2 + $0x8] sm:$0xff] %v91_v28   ;;  %v791_v28 = vld [vmem:[#allocation3] sm:$0xf] }
  0x99   :  { %v575_v34 = vpop.permute.xlu0 %574  ;;  %v2320_v35 = vld [vmem:[#allocation2 + $0xf8] sm:$0xff]   ;;  %594 = vst.msk [vmem:[#allocation2 + $0xbc] sm:$0xf] %vm586_vm7, %v577_v33  ;;  %v89_v33 = vld [vmem:[#allocation3] sm:$0xff]  }
  0x9a   :  { %593 = vst.msk [vmem:[#allocation2 + $0xb8] sm:$0xf] %vm586_vm7, %v575_v34  ;;  %674 = vrot.lane.b32.xlu1 %v651_v31, %s2414_s12  ;;  %2200 = vmatprep.subr.bf16.mxu1 %v2320_v35  ;;  %v204_v34 = vld [vmem:[#allocation3 + $0x4] sm:$0xf]  ;;  %v203_v35 = vld [vmem:[#allocation3] sm:$0xf] }
  0x9b   :  { %672 = vrot.lane.b32.xlu0 %v650_v32, %s2414_s12  ;;  %97 = vst [vmem:[#allocation2] sm:$0xff] %v89_v33  }
  0x9c   :  { %v328_v38 = vpop.permute.xlu1 %327 }
  0x9d   :  { %v326_v39 = vpop.permute.xlu0 %325  ;;  %v2321_v40 = vld [vmem:[#allocation2 + $0x38] sm:$0xff]   ;;  %347 = vst.msk [vmem:[#allocation2 + $0x74] sm:$0xf] %vm341_vm1, %v328_v38 }
  0x9e   :  { %346 = vst.msk [vmem:[#allocation2 + $0x70] sm:$0xf] %vm341_vm1, %v326_v39  ;;  %478 = vrot.lane.b32.xlu1 %v455_v36, %s2415_s5  ;;  %2137 = vmatpush3.bf16.msra.mxu0 %v2321_v40  ;;  %v596_v39 = vld [vmem:[#allocation3 + $0x4] sm:$0xf]  ;;  %v595_v40 = vld [vmem:[#allocation3] sm:$0xf] }
  0x9f   :  { %476 = vrot.lane.b32.xlu0 %v454_v37, %s2415_s5 }
  0xa0   :  { %v720_v44 = vpop.permute.xlu1 %719 }
  0xa1   :  { %v718_v45 = vpop.permute.xlu0 %717  ;;  %v2322_v46 = vld [vmem:[#allocation2 + $0xb8] sm:$0xff]   ;;  %739 = vst.msk [vmem:[#allocation2 + $0xf4] sm:$0xf] %vm733_vm0, %v720_v44  ;;  %v252_v44 = vld [vmem:[%s3193_s1] sm:$0xf] }
  0xa2   :  { %738 = vst.msk [vmem:[#allocation2 + $0xf0] sm:$0xf] %vm733_vm0, %v718_v45  ;;  %229 = vrot.lane.b32.xlu1 %v208_v42, %s2413_s29  ;;  %2201 = vmatpush3.bf16.msra.mxu1 %v2322_v46 }
  0xa3   :  { %227 = vrot.lane.b32.xlu0 %v207_v43, %s2413_s29  ;;  %v253_v43 = vld [vmem:[%s3193_s1 + $0x4] sm:$0xf] }
  0xa4   :  { %v132_v49 = vpop.permute.xlu1 %131 }
  0xa5   :  { %v130_v50 = vpop.permute.xlu0 %129  ;;  %151 = vst.msk [vmem:[#allocation2 + $0x34] sm:$0xf] %vm145_vm2, %v132_v49  ;;  %v400_v49 = vld [vmem:[#allocation3 + $0x4] sm:$0xf] }
  0xa6   :  { %150 = vst.msk [vmem:[#allocation2 + $0x30] sm:$0xf] %vm145_vm2, %v130_v50  ;;  %621 = vrot.lane.b32.xlu1 %v600_v47, %s2414_s12  ;;  %v399_v50 = vld [vmem:[#allocation3] sm:$0xf] }
  0xa7   :  { %619 = vrot.lane.b32.xlu0 %v599_v48, %s2414_s12  ;;  %v2351_v48 = vld [vmem:[%s3194_s2 + $0x4] ss:$20 sps:$4 sm:$0xff]  }
  0xa8   :  { %v377_v53 = vpop.permute.xlu1 %376  ;;  %1578 = vmatprep.mubr.bf16.mxu0 %v2351_v48 }
  0xa9   :  { %v375_v54 = vpop.permute.xlu0 %374  ;;  %396 = vst.msk [vmem:[#allocation2 + $0x74] sm:$0xf] %vm390_vm3, %v377_v53 }
  0xaa   :  { %395 = vst.msk [vmem:[#allocation2 + $0x70] sm:$0xf] %vm390_vm3, %v375_v54  ;;  %278 = vrot.lane.b32.xlu1 %v257_v51, %s2413_s29  ;;  %v645_v54 = vld [vmem:[%s3193_s1 + $0x4] sm:$0xf] }
  0xab   :  { %276 = vrot.lane.b32.xlu0 %v256_v52, %s2413_s29 }
  0xac   :  { %v524_v57 = vpop.permute.xlu1 %523 }
  0xad   :  { %v522_v58 = vpop.permute.xlu0 %521  ;;  %543 = vst.msk [vmem:[#allocation2 + $0xb4] sm:$0xf] %vm537_vm4, %v524_v57 }
  0xae   :  { %542 = vst.msk [vmem:[#allocation2 + $0xb0] sm:$0xf] %vm537_vm4, %v522_v58  ;;  %425 = vrot.lane.b32.xlu1 %v404_v55, %s2415_s5  ;;  %v644_v55 = vld [vmem:[%s3193_s1] sm:$0xf] }
  0xaf   :  { %423 = vrot.lane.b32.xlu0 %v403_v56, %s2415_s5 }
  0xb0   :  { %v769_v61 = vpop.permute.xlu1 %768 }
  0xb1   :  { %v767_v62 = vpop.permute.xlu0 %766  ;;  %v2323_v63 = vld [vmem:[#allocation2 + $0x70] sm:$0xff]   ;;  %788 = vst.msk [vmem:[#allocation2 + $0xf4] sm:$0xf] %vm782_vm5, %v769_v61  ;;  %v448_v61 = vld [vmem:[%s3193_s1] sm:$0xf] }
  0xb2   :  { %787 = vst.msk [vmem:[#allocation2 + $0xf0] sm:$0xf] %vm782_vm5, %v767_v62  ;;  %670 = vrot.lane.b32.xlu1 %v649_v59, %s2414_s12  ;;  %2138 = vmatprep.subr.bf16.mxu0 %v2323_v63  ;;  %v2359_v59 = vld [vmem:[%s3194_s2 + $0xc] ss:$20 sps:$4 sm:$0xff]  }
  0xb3   :  { %668 = vrot.lane.b32.xlu0 %v648_v60, %s2414_s12  ;;  %v449_v60 = vld [vmem:[%s3193_s1 + $0x4] sm:$0xf]  ;;  %1675 = vmatprep.mubr.bf16.mxu1 %v2359_v59 }
  0xb4   :  { %v181_v2 = vpop.permute.xlu1 %180 }
  0xb5   :  { %v179_v3 = vpop.permute.xlu0 %178  ;;  %200 = vst.msk [vmem:[#allocation2 + $0x34] sm:$0xf] %vm194_vm6, %v181_v2 }
  0xb6   :  { %199 = vst.msk [vmem:[#allocation2 + $0x30] sm:$0xf] %vm194_vm6, %v179_v3  ;;  %474 = vrot.lane.b32.xlu1 %v453_v0, %s2415_s5  ;;  %v798_v0 = vld [vmem:[#allocation3 + $0x1c] sm:$0xf] }
  0xb7   :  { %472 = vrot.lane.b32.xlu0 %v452_v1, %s2415_s5  ;;  %v797_v1 = vld [vmem:[#allocation3 + $0x18] sm:$0xf] }
  0xb8   :  { %v573_v7 = vpop.permute.xlu1 %572 }
  0xb9   :  { %v571_v8 = vpop.permute.xlu0 %570  ;;  %v2324_v9 = vld [vmem:[#allocation2 + $0xf0] sm:$0xff]   ;;  %592 = vst.msk [vmem:[#allocation2 + $0xb4] sm:$0xf] %vm586_vm7, %v573_v7 }
  0xba   :  { %591 = vst.msk [vmem:[#allocation2 + $0xb0] sm:$0xf] %vm586_vm7, %v571_v8  ;;  %225 = vrot.lane.b32.xlu1 %v206_v5, %s2413_s29  ;;  %2202 = vmatprep.subr.bf16.mxu1 %v2324_v9  ;;  %v846_v5 = vld [vmem:[%s3193_s1 + $0x18] sm:$0xf]  ;;  %v796_v8 = vld [vmem:[#allocation3 + $0x14] sm:$0xf] }
  0xbb   :  { %223 = vrot.lane.b32.xlu0 %v205_v6, %s2413_s29  ;;  %v795_v9 = vld [vmem:[#allocation3 + $0x10] sm:$0xf] }
  0xbc   :  { %v324_v12 = vpop.permute.xlu1 %323 }
  0xbd   :  { %v322_v13 = vpop.permute.xlu0 %321  ;;  %v2325_v14 = vld [vmem:[#allocation2 + $0x30] sm:$0xff]   ;;  %345 = vst.msk [vmem:[#allocation2 + $0x6c] sm:$0xf] %vm341_vm1, %v324_v12 }
  0xbe   :  { %344 = vst.msk [vmem:[#allocation2 + $0x68] sm:$0xf] %vm341_vm1, %v322_v13  ;;  %617 = vrot.lane.b32.xlu1 %v598_v10, %s2414_s12  ;;  %2139 = vmatpush3.bf16.msra.mxu0 %v2325_v14  ;;  %v845_v13 = vld [vmem:[%s3193_s1 + $0x14] sm:$0xf] }
  0xbf   :  { %615 = vrot.lane.b32.xlu0 %v597_v11, %s2414_s12 }
  0xc0   :  { %v716_v17 = vpop.permute.xlu1 %715 }
  0xc1   :  { %v714_v18 = vpop.permute.xlu0 %713  ;;  %v2326_v19 = vld [vmem:[#allocation2 + $0xb0] sm:$0xff]   ;;  %737 = vst.msk [vmem:[#allocation2 + $0xec] sm:$0xf] %vm733_vm0, %v716_v17  ;;  %v794_v17 = vld [vmem:[#allocation3 + $0xc] sm:$0xf] }
  0xc2   :  { %736 = vst.msk [vmem:[#allocation2 + $0xe8] sm:$0xf] %vm733_vm0, %v714_v18  ;;  %274 = vrot.lane.b32.xlu1 %v255_v15, %s2413_s29  ;;  %2203 = vmatpush3.bf16.msra.mxu1 %v2326_v19  ;;  %v793_v18 = vld [vmem:[#allocation3 + $0x8] sm:$0xf] }
  0xc3   :  { %272 = vrot.lane.b32.xlu0 %v254_v16, %s2413_s29  ;;  %v844_v16 = vld [vmem:[%s3193_s1 + $0x10] sm:$0xf] }
  0xc4   :  { %v128_v22 = vpop.permute.xlu1 %127 }
  0xc5   :  { %v126_v23 = vpop.permute.xlu0 %125  ;;  %149 = vst.msk [vmem:[#allocation2 + $0x2c] sm:$0xf] %vm145_vm2, %v128_v22  ;;  %v843_v22 = vld [vmem:[%s3193_s1 + $0xc] sm:$0xf] }
  0xc6   :  { %148 = vst.msk [vmem:[#allocation2 + $0x28] sm:$0xf] %vm145_vm2, %v126_v23  ;;  %421 = vrot.lane.b32.xlu1 %v402_v20, %s2415_s5  ;;  %v842_v23 = vld [vmem:[%s3193_s1 + $0x8] sm:$0xf] }
  0xc7   :  { %419 = vrot.lane.b32.xlu0 %v401_v21, %s2415_s5 }
  0xc8   :  { %v373_v26 = vpop.permute.xlu1 %372 }
  0xc9   :  { %v371_v27 = vpop.permute.xlu0 %370  ;;  %394 = vst.msk [vmem:[#allocation2 + $0x6c] sm:$0xf] %vm390_vm3, %v373_v26 }
  0xca   :  { %393 = vst.msk [vmem:[#allocation2 + $0x68] sm:$0xf] %vm390_vm3, %v371_v27  ;;  %666 = vrot.lane.b32.xlu1 %v647_v24, %s2414_s12  ;;  %v792_v27 = vld [vmem:[#allocation3 + $0x4] sm:$0xf] }
  0xcb   :  { %664 = vrot.lane.b32.xlu0 %v646_v25, %s2414_s12 }
  0xcc   :  { %v520_v31 = vpop.permute.xlu1 %519 }
  0xcd   :  { %v518_v32 = vpop.permute.xlu0 %517  ;;  %541 = vst.msk [vmem:[#allocation2 + $0xac] sm:$0xf] %vm537_vm4, %v520_v31 }
  0xce   :  { %540 = vst.msk [vmem:[#allocation2 + $0xa8] sm:$0xf] %vm537_vm4, %v518_v32  ;;  %470 = vrot.lane.b32.xlu1 %v451_v29, %s2415_s5  ;;  %v841_v32 = vld [vmem:[%s3193_s1 + $0x4] sm:$0xf] }
  0xcf   :  { %468 = vrot.lane.b32.xlu0 %v450_v30, %s2415_s5 }
  0xd0   :  { %v765_v36 = vpop.permute.xlu1 %764 }
  0xd1   :  { %v763_v37 = vpop.permute.xlu0 %762  ;;  %v2327_v38 = vld [vmem:[#allocation2 + $0x68] sm:$0xff]   ;;  %786 = vst.msk [vmem:[#allocation2 + $0xec] sm:$0xf] %vm782_vm5, %v765_v36 }
  0xd2   :  { %785 = vst.msk [vmem:[#allocation2 + $0xe8] sm:$0xf] %vm782_vm5, %v763_v37  ;;  %221 = vrot.lane.b32.xlu1 %v204_v34, %s2413_s29  ;;  %2140 = vmatprep.subr.bf16.mxu0 %v2327_v38  ;;  %v2338_v38 = vld [vmem:[#allocation2 + $0x18] sm:$0xff]  }
  0xd3   :  { %219 = vrot.lane.b32.xlu0 %v203_v35, %s2413_s29  ;;  %v840_v35 = vld [vmem:[%s3193_s1] sm:$0xf] }
  0xd4   :  { %v177_v41 = vpop.permute.xlu1 %176 }
  0xd5   :  { %v175_v42 = vpop.permute.xlu0 %174  ;;  %198 = vst.msk [vmem:[#allocation2 + $0x2c] sm:$0xf] %vm194_vm6, %v177_v41 }
  0xd6   :  { %197 = vst.msk [vmem:[#allocation2 + $0x28] sm:$0xf] %vm194_vm6, %v175_v42  ;;  %613 = vrot.lane.b32.xlu1 %v596_v39, %s2414_s12 }
  0xd7   :  { %611 = vrot.lane.b32.xlu0 %v595_v40, %s2414_s12 }
  0xd8   :  { %v569_v45 = vpop.permute.xlu1 %568 }
  0xd9   :  { %v567_v46 = vpop.permute.xlu0 %566  ;;  %v2328_v47 = vld [vmem:[#allocation2 + $0xe8] sm:$0xff]   ;;  %590 = vst.msk [vmem:[#allocation2 + $0xac] sm:$0xf] %vm586_vm7, %v569_v45 }
  0xda   :  { %589 = vst.msk [vmem:[#allocation2 + $0xa8] sm:$0xf] %vm586_vm7, %v567_v46  ;;  %270 = vrot.lane.b32.xlu1 %v253_v43, %s2413_s29  ;;  %2204 = vmatprep.subr.bf16.mxu1 %v2328_v47 }
  0xdb   :  { %268 = vrot.lane.b32.xlu0 %v252_v44, %s2413_s29 }
  0xdc   :  { %v320_v51 = vpop.permute.xlu1 %319 }
  0xdd   :  { %v318_v52 = vpop.permute.xlu0 %317  ;;  %v2329_v53 = vld [vmem:[#allocation2 + $0x28] sm:$0xff]   ;;  %343 = vst.msk [vmem:[#allocation2 + $0x64] sm:$0xf] %vm341_vm1, %v320_v51 }
  0xde   :  { %342 = vst.msk [vmem:[#allocation2 + $0x60] sm:$0xf] %vm341_vm1, %v318_v52  ;;  %417 = vrot.lane.b32.xlu1 %v400_v49, %s2415_s5  ;;  %2141 = vmatpush3.bf16.msra.mxu0 %v2329_v53 }
  0xdf   :  { %415 = vrot.lane.b32.xlu0 %v399_v50, %s2415_s5 }
  0xe0   :  { %v712_v56 = vpop.permute.xlu1 %711 }
  0xe1   :  { %v710_v57 = vpop.permute.xlu0 %709  ;;  %v2330_v58 = vld [vmem:[#allocation2 + $0xa8] sm:$0xff]   ;;  %735 = vst.msk [vmem:[#allocation2 + $0xe4] sm:$0xf] %vm733_vm0, %v712_v56 }
  0xe2   :  { %734 = vst.msk [vmem:[#allocation2 + $0xe0] sm:$0xf] %vm733_vm0, %v710_v57  ;;  %662 = vrot.lane.b32.xlu1 %v645_v54, %s2414_s12  ;;  %2205 = vmatpush3.bf16.msra.mxu1 %v2330_v58  ;;  %v2342_v54 = vld [vmem:[#allocation2 + $0x10] sm:$0xff]   ;;  %vm1521_vm0 = vcmask 523264  }
  0xe3   :  { %660 = vrot.lane.b32.xlu0 %v644_v55, %s2414_s12  ;;  %s2416_s12 = smov 118  }
  0xe4   :  { %v124_v62 = vpop.permute.xlu1 %123 }
  0xe5   :  { %v122_v63 = vpop.permute.xlu0 %121  ;;  %147 = vst.msk [vmem:[#allocation2 + $0x24] sm:$0xf] %vm145_vm2, %v124_v62 }
  0xe6   :  { %146 = vst.msk [vmem:[#allocation2 + $0x20] sm:$0xf] %vm145_vm2, %v122_v63  ;;  %466 = vrot.lane.b32.xlu1 %v449_v60, %s2415_s5  ;;  %v2417_v63 = vmov 0  }
  0xe7   :  { %464 = vrot.lane.b32.xlu0 %v448_v61, %s2415_s5  ;;  %2318 = vset.pattern.permute.xlu1 %v2417_v63 }
  0xe8   :  { %v369_v2 = vpop.permute.xlu1 %368  ;;  %2317 = vset.pattern.permute.xlu0 %v2417_v63 }
  0xe9   :  { %v367_v3 = vpop.permute.xlu0 %366  ;;  %392 = vst.msk [vmem:[#allocation2 + $0x64] sm:$0xf] %vm390_vm3, %v369_v2  ;;  %v1011_v2 = vld [vmem:[%s3195_s3 + $0x10] sm:$0xff] }
  0xea   :  { %391 = vst.msk [vmem:[#allocation2 + $0x60] sm:$0xf] %vm390_vm3, %v367_v3  ;;  %821 = vrot.lane.b32.xlu1 %v798_v0, %s2416_s12  ;;  %v1010_v0 = vld [vmem:[%s3195_s3 + $0x8] sm:$0xff]  ;;  %v1012_v3 = vld [vmem:[%s3195_s3 + $0x18] sm:$0xff] }
  0xeb   :  { %819 = vrot.lane.b32.xlu0 %v797_v1, %s2416_s12  ;;  %v1009_v1 = vld [vmem:[%s3195_s3] sm:$0xff] }
  0xec   :  { %v516_v6 = vpop.permute.xlu1 %515 }
  0xed   :  { %v514_v7 = vpop.permute.xlu0 %513  ;;  %539 = vst.msk [vmem:[#allocation2 + $0xa4] sm:$0xf] %vm537_vm4, %v516_v6 }
  0xee   :  { %538 = vst.msk [vmem:[#allocation2 + $0xa0] sm:$0xf] %vm537_vm4, %v514_v7  ;;  %870 = vrot.lane.b32.xlu1 %v847_v4, %s2416_s12  ;;  %v1013_v7 = vld [vmem:[%s3195_s3 + $0x20] sm:$0xff] }
  0xef   :  { %868 = vrot.lane.b32.xlu0 %v846_v5, %s2416_s12 }
  0xf0   :  { %v761_v10 = vpop.permute.xlu1 %760 }
  0xf1   :  { %v759_v11 = vpop.permute.xlu0 %758  ;;  %v2331_v12 = vld [vmem:[#allocation2 + $0x60] sm:$0xff]   ;;  %784 = vst.msk [vmem:[#allocation2 + $0xe4] sm:$0xf] %vm782_vm5, %v761_v10  ;;  %v1014_v10 = vld [vmem:[%s3195_s3 + $0x28] sm:$0xff] }
  0xf2   :  { %783 = vst.msk [vmem:[#allocation2 + $0xe0] sm:$0xf] %vm782_vm5, %v759_v11  ;;  %2142 = vmatprep.subr.bf16.mxu0 %v2331_v12  ;;  %817 = vrot.lane.b32.xlu1 %v796_v8, %s2416_s12  ;;  %v1015_v11 = vld [vmem:[%s3195_s3 + $0x30] sm:$0xff] }
  0xf3   :  { %815 = vrot.lane.b32.xlu0 %v795_v9, %s2416_s12 }
  0xf4   :  { %v173_v14 = vpop.permute.xlu1 %172 }
  0xf5   :  { %v171_v15 = vpop.permute.xlu0 %170  ;;  %196 = vst.msk [vmem:[#allocation2 + $0x24] sm:$0xf] %vm194_vm6, %v173_v14  ;;  %v1016_v14 = vld [vmem:[%s3195_s3 + $0x38] sm:$0xff] }
  0xf6   :  { %195 = vst.msk [vmem:[#allocation2 + $0x20] sm:$0xf] %vm194_vm6, %v171_v15  ;;  %866 = vrot.lane.b32.xlu1 %v845_v13, %s2416_s12  ;;  %v2346_v15 = vld [vmem:[#allocation2 + $0x8] sm:$0xff]  }
  0xf7   :  { %864 = vrot.lane.b32.xlu0 %v844_v16, %s2416_s12  ;;  %v1017_v16 = vld [vmem:[%s3195_s3 + $0x40] sm:$0xff] }
  0xf8   :  { %v565_v19 = vpop.permute.xlu1 %564 }
  0xf9   :  { %v563_v20 = vpop.permute.xlu0 %562  ;;  %v2332_v21 = vld [vmem:[#allocation2 + $0xe0] sm:$0xff]   ;;  %588 = vst.msk [vmem:[#allocation2 + $0xa4] sm:$0xf] %vm586_vm7, %v565_v19 }
  0xfa   :  { %587 = vst.msk [vmem:[#allocation2 + $0xa0] sm:$0xf] %vm586_vm7, %v563_v20  ;;  %2206 = vmatprep.subr.bf16.mxu1 %v2332_v21  ;;  %813 = vrot.lane.b32.xlu1 %v794_v17, %s2416_s12  ;;  %v1018_v17 = vld [vmem:[%s3195_s3 + $0x48] sm:$0xff]  ;;  %v1019_v21 = vld [vmem:[%s3195_s3 + $0x50] sm:$0xff] }
  0xfb   :  { %811 = vrot.lane.b32.xlu0 %v793_v18, %s2416_s12 }
  0xfc   :  { %v234_v24 = vpop.permute.xlu1 %233 }
  0xfd   :  { %v232_v25 = vpop.permute.xlu0 %231  ;;  %v2333_v26 = vld [vmem:[#allocation2 + $0x20] sm:$0xff]   ;;  %251 = vst.msk [vmem:[#allocation2 + $0x5c] sm:$0xf] %vm243_vm8, %v234_v24  ;;  %v1020_v24 = vld [vmem:[%s3195_s3 + $0x58] sm:$0xff] }
  0xfe   :  { %250 = vst.msk [vmem:[#allocation2 + $0x58] sm:$0xf] %vm243_vm8, %v232_v25  ;;  %2143 = vmatpush3.bf16.msra.mxu0 %v2333_v26  ;;  %862 = vrot.lane.b32.xlu1 %v843_v22, %s2416_s12  ;;  %v1021_v25 = vld [vmem:[%s3195_s3 + $0x60] sm:$0xff]  ;;  %v1022_v26 = vld [vmem:[%s3195_s3 + $0x68] sm:$0xff] }
  0xff   :  { %860 = vrot.lane.b32.xlu0 %v842_v23, %s2416_s12 }
 0x100   :  { %v626_v29 = vpop.permute.xlu1 %625 }
 0x101   :  { %v624_v30 = vpop.permute.xlu0 %623  ;;  %v2334_v31 = vld [vmem:[#allocation2 + $0xa0] sm:$0xff]   ;;  %643 = vst.msk [vmem:[#allocation2 + $0xdc] sm:$0xf] %vm635_vm9, %v626_v29 }
 0x102   :  { %642 = vst.msk [vmem:[#allocation2 + $0xd8] sm:$0xf] %vm635_vm9, %v624_v30  ;;  %2207 = vmatpush3.bf16.msra.mxu1 %v2334_v31  ;;  %809 = vrot.lane.b32.xlu1 %v792_v27, %s2416_s12  ;;  %v1023_v30 = vld [vmem:[%s3195_s3 + $0x70] sm:$0xff]  ;;  %v1024_v31 = vld [vmem:[%s3195_s3 + $0x78] sm:$0xff] }
 0x103   :  { %807 = vrot.lane.b32.xlu0 %v791_v28, %s2416_s12 }
 0x104   :  { %v283_v33 = vpop.permute.xlu1 %282 }
 0x105   :  { %v281_v34 = vpop.permute.xlu0 %280  ;;  %300 = vst.msk [vmem:[#allocation2 + $0x5c] sm:$0xf] %vm292_vm10, %v283_v33 }
 0x106   :  { %299 = vst.msk [vmem:[#allocation2 + $0x58] sm:$0xf] %vm292_vm10, %v281_v34  ;;  %858 = vrot.lane.b32.xlu1 %v841_v32, %s2416_s12 }
 0x107   :  { %856 = vrot.lane.b32.xlu0 %v840_v35, %s2416_s12 }
 0x108   :  { %v430_v36 = vpop.permute.xlu1 %429 }
 0x109   :  { %v428_v37 = vpop.permute.xlu0 %427  ;;  %447 = vst.msk [vmem:[#allocation2 + $0x9c] sm:$0xf] %vm439_vm11, %v430_v36 }
 0x10a   :  { %446 = vst.msk [vmem:[#allocation2 + $0x98] sm:$0xf] %vm439_vm11, %v428_v37  ;;  %1032 = vperm.xlu1 %2318, %v1010_v0  }
 0x10b   :  { %1027 = vperm.xlu0 %2317, %v1009_v1   ;;  %v2365_v1 = vld [vmem:[%s3194_s2 + $0x30] ss:$20 sps:$4 sm:$0xff]  }
 0x10c   :  { %v675_v39 = vpop.permute.xlu1 %674 }
 0x10d   :  { %v673_v40 = vpop.permute.xlu0 %672  ;;  %v2335_v41 = vld [vmem:[#allocation2 + $0x58] sm:$0xff]   ;;  %692 = vst.msk [vmem:[#allocation2 + $0xdc] sm:$0xf] %vm684_vm12, %v675_v39  ;;  %v2348_v39 = vld [vmem:[#allocation2] sm:$0xff]  }
 0x10e   :  { %691 = vst.msk [vmem:[#allocation2 + $0xd8] sm:$0xf] %vm684_vm12, %v673_v40  ;;  %2144 = vmatprep.subr.bf16.mxu0 %v2335_v41  ;;  %1037 = vperm.xlu1 %2318, %v1011_v2  }
 0x10f   :  { %2145 = vmatpush3.bf16.msra.mxu0 %v2338_v38  ;;  %1042 = vperm.xlu0 %2317, %v1012_v3   ;;  %v2369_v3 = vld [vmem:[%s3194_s2 + $0x5c] ss:$20 sps:$4 sm:$0xff]  }
 0x110   :  { %v479_v42 = vpop.permute.xlu1 %478 }
 0x111   :  { %v477_v43 = vpop.permute.xlu0 %476  ;;  %496 = vst.msk [vmem:[#allocation2 + $0x9c] sm:$0xf] %vm488_vm13, %v479_v42 }
 0x112   :  { %495 = vst.msk [vmem:[#allocation2 + $0x98] sm:$0xf] %vm488_vm13, %v477_v43  ;;  %1047 = vperm.xlu1 %2318, %v1013_v7   ;;  %v2349_v43 = vld [vmem:[%s3194_s2] ss:$20 sps:$4 sm:$0xff]   ;;  %v2372_v7 = vld [vmem:[%s3194_s2 + $0xa4] ss:$20 sps:$4 sm:$0xff]  }
 0x113   :  { %1052 = vperm.xlu0 %2317, %v1014_v10  }
 0x114   :  { %v230_v44 = vpop.permute.xlu1 %229 }
 0x115   :  { %v228_v45 = vpop.permute.xlu0 %227  ;;  %v2336_v46 = vld [vmem:[#allocation2 + $0xd8] sm:$0xff]   ;;  %249 = vst.msk [vmem:[#allocation2 + $0x54] sm:$0xf] %vm243_vm8, %v230_v44  ;;  %v2353_v44 = vld [vmem:[%s3194_s2 + $0x2c] ss:$20 sps:$4 sm:$0xff]  }
 0x116   :  { %248 = vst.msk [vmem:[#allocation2 + $0x50] sm:$0xf] %vm243_vm8, %v228_v45  ;;  %2208 = vmatprep.subr.bf16.mxu1 %v2336_v46  ;;  %1057 = vperm.xlu1 %2318, %v1015_v11  }
 0x117   :  { %1062 = vperm.xlu0 %2317, %v1016_v14   ;;  %v916_v14 = vld [vmem:[%s3194_s2 + $0xb4] sm:$0xff] }
 0x118   :  { %v622_v47 = vpop.permute.xlu1 %621 }
 0x119   :  { %v620_v48 = vpop.permute.xlu0 %619  ;;  %v2337_v49 = vld [vmem:[#allocation2 + $0x98] sm:$0xff]   ;;  %641 = vst.msk [vmem:[#allocation2 + $0xd4] sm:$0xf] %vm635_vm9, %v622_v47 }
 0x11a   :  { %640 = vst.msk [vmem:[#allocation2 + $0xd0] sm:$0xf] %vm635_vm9, %v620_v48  ;;  %2209 = vmatpush3.bf16.msra.mxu1 %v2337_v49  ;;  %1067 = vperm.xlu1 %2318, %v1017_v16  }
 0x11b   :  { %1072 = vperm.xlu0 %2317, %v1018_v17  }
 0x11c   :  { %v279_v50 = vpop.permute.xlu1 %278 }
 0x11d   :  { %v277_v51 = vpop.permute.xlu0 %276  ;;  %298 = vst.msk [vmem:[#allocation2 + $0x54] sm:$0xf] %vm292_vm10, %v279_v50  ;;  %v2355_v50 = vld [vmem:[%s3194_s2 + $0x28] ss:$20 sps:$4 sm:$0xff]  }
 0x11e   :  { %297 = vst.msk [vmem:[#allocation2 + $0x50] sm:$0xf] %vm292_vm10, %v277_v51  ;;  %1077 = vperm.xlu1 %2318, %v1019_v21   ;;  %v2360_v51 = vld [vmem:[%s3194_s2 + $0x54] ss:$20 sps:$4 sm:$0xff]  }
 0x11f   :  { %1082 = vperm.xlu0 %2317, %v1020_v24   ;;  %v2380_v24 = vld [vmem:[%s3194_s2 + $0xc8] ss:$20 sps:$4 sm:$0xff]  }
 0x120   :  { %v426_v52 = vpop.permute.xlu1 %425 }
 0x121   :  { %v424_v53 = vpop.permute.xlu0 %423  ;;  %445 = vst.msk [vmem:[#allocation2 + $0x94] sm:$0xf] %vm439_vm11, %v426_v52 }
 0x122   :  { %444 = vst.msk [vmem:[#allocation2 + $0x90] sm:$0xf] %vm439_vm11, %v424_v53  ;;  %1087 = vperm.xlu1 %2318, %v1021_v25   ;;  %v2384_v25 = vld [vmem:[%s3194_s2 + $0xf4] ss:$20 sps:$4 sm:$0xff]  }
 0x123   :  { %1092 = vperm.xlu0 %2317, %v1022_v26   ;;  %v2383_v26 = vld [vmem:[%s3194_s2 + $0xa8] ss:$20 sps:$4 sm:$0xff]  }
 0x124   :  { %v671_v55 = vpop.permute.xlu1 %670 }
 0x125   :  { %v669_v56 = vpop.permute.xlu0 %668  ;;  %v2339_v57 = vld [vmem:[#allocation2 + $0x50] sm:$0xff]   ;;  %690 = vst.msk [vmem:[#allocation2 + $0xd4] sm:$0xf] %vm684_vm12, %v671_v55  ;;  %v2357_v55 = vld [vmem:[%s3194_s2 + $0x8] ss:$20 sps:$4 sm:$0xff]  }
 0x126   :  { %689 = vst.msk [vmem:[#allocation2 + $0xd0] sm:$0xf] %vm684_vm12, %v669_v56  ;;  %2146 = vmatprep.subr.bf16.mxu0 %v2339_v57  ;;  %1097 = vperm.xlu1 %2318, %v1023_v30   ;;  %v2363_v56 = vld [vmem:[%s3194_s2 + $0x34] ss:$20 sps:$4 sm:$0xff]   ;;  %v2391_v30 = vld [vmem:[%s3194_s2 + $0x11c] ss:$20 sps:$4 sm:$0xff]  }
 0x127   :  { %2147 = vmatpush3.bf16.msra.mxu0 %v2342_v54  ;;  %1102 = vperm.xlu0 %2317, %v1024_v31   ;;  %v901_v57 = vld [vmem:[%s3194_s2 + $0x50] sm:$0xff] }
 0x128   :  { %v475_v58 = vpop.permute.xlu1 %474  ;;  %v2390_v31 = vld [vmem:[%s3194_s2 + $0xd0] ss:$20 sps:$4 sm:$0xff]  }
 0x129   :  { %v473_v59 = vpop.permute.xlu0 %472  ;;  %494 = vst.msk [vmem:[#allocation2 + $0x94] sm:$0xf] %vm488_vm13, %v475_v58  ;;  %v904_v58 = vld [vmem:[%s3194_s2 + $0x64] sm:$0xff] }
 0x12a   :  { %493 = vst.msk [vmem:[#allocation2 + $0x90] sm:$0xf] %vm488_vm13, %v473_v59 }
 0x12c   :  { %v226_v60 = vpop.permute.xlu1 %225 }
 0x12d   :  { %v224_v61 = vpop.permute.xlu0 %223  ;;  %v2340_v62 = vld [vmem:[#allocation2 + $0xd0] sm:$0xff]   ;;  %247 = vst.msk [vmem:[#allocation2 + $0x4c] sm:$0xf] %vm243_vm8, %v226_v60 }
 0x12e   :  { %246 = vst.msk [vmem:[#allocation2 + $0x48] sm:$0xf] %vm243_vm8, %v224_v61  ;;  %2210 = vmatprep.subr.bf16.mxu1 %v2340_v62  ;;  %v1983_v61 = vcombine.low %v901_v57, %v904_v58  ;;  %v2366_v62 = vld [vmem:[%s3194_s2 + $0x7c] ss:$20 sps:$4 sm:$0xff]  }
 0x130   :  { %v618_v4 = vpop.permute.xlu1 %617 }
 0x131   :  { %v616_v5 = vpop.permute.xlu0 %615  ;;  %v2341_v6 = vld [vmem:[#allocation2 + $0x90] sm:$0xff]   ;;  %639 = vst.msk [vmem:[#allocation2 + $0xcc] sm:$0xf] %vm635_vm9, %v618_v4 }
 0x132   :  { %638 = vst.msk [vmem:[#allocation2 + $0xc8] sm:$0xf] %vm635_vm9, %v616_v5  ;;  %2211 = vmatpush3.bf16.msra.mxu1 %v2341_v6  ;;  %v2368_v6 = vld [vmem:[%s3194_s2 + $0x78] ss:$20 sps:$4 sm:$0xff]  }
 0x134   :  { %v275_v8 = vpop.permute.xlu1 %274 }
 0x135   :  { %v273_v9 = vpop.permute.xlu0 %272  ;;  %296 = vst.msk [vmem:[#allocation2 + $0x4c] sm:$0xf] %vm292_vm10, %v275_v8 }
 0x136   :  { %295 = vst.msk [vmem:[#allocation2 + $0x48] sm:$0xf] %vm292_vm10, %v273_v9  ;;  %v2371_v9 = vld [vmem:[%s3194_s2 + $0x58] ss:$20 sps:$4 sm:$0xff]  }
 0x138   :  { %v422_v12 = vpop.permute.xlu1 %421 }
 0x139   :  { %v420_v13 = vpop.permute.xlu0 %419  ;;  %443 = vst.msk [vmem:[#allocation2 + $0x8c] sm:$0xf] %vm439_vm11, %v422_v12  ;;  %v2375_v12 = vld [vmem:[%s3194_s2 + $0x84] ss:$20 sps:$4 sm:$0xff]  }
 0x13a   :  { %442 = vst.msk [vmem:[#allocation2 + $0x88] sm:$0xf] %vm439_vm11, %v420_v13  ;;  %v913_v13 = vld [vmem:[%s3194_s2 + $0xa0] sm:$0xff] }
 0x13b   :  { %v1993_v17 = vcombine.low %v913_v13, %v916_v14 }
 0x13c   :  { %v667_v18 = vpop.permute.xlu1 %666 }
 0x13d   :  { %v665_v19 = vpop.permute.xlu0 %664  ;;  %v2343_v20 = vld [vmem:[#allocation2 + $0x48] sm:$0xff]   ;;  %688 = vst.msk [vmem:[#allocation2 + $0xcc] sm:$0xf] %vm684_vm12, %v667_v18 }
 0x13e   :  { %687 = vst.msk [vmem:[#allocation2 + $0xc8] sm:$0xf] %vm684_vm12, %v665_v19  ;;  %2148 = vmatprep.subr.bf16.mxu0 %v2343_v20  ;;  %v2378_v18 = vld [vmem:[%s3194_s2 + $0xcc] ss:$20 sps:$4 sm:$0xff]  }
 0x13f   :  { %2149 = vmatpush3.bf16.msra.mxu0 %v2346_v15  ;;  %v2377_v20 = vld [vmem:[%s3194_s2 + $0x80] ss:$20 sps:$4 sm:$0xff]  }
 0x140   :  { %v471_v22 = vpop.permute.xlu1 %470 }
 0x141   :  { %v469_v23 = vpop.permute.xlu0 %468  ;;  %492 = vst.msk [vmem:[#allocation2 + $0x8c] sm:$0xf] %vm488_vm13, %v471_v22 }
 0x142   :  { %491 = vst.msk [vmem:[#allocation2 + $0x88] sm:$0xf] %vm488_vm13, %v469_v23  ;;  %v2381_v23 = vld [vmem:[%s3194_s2 + $0xac] ss:$20 sps:$4 sm:$0xff]  }
 0x144   :  { %v222_v27 = vpop.permute.xlu1 %221 }
 0x145   :  { %v220_v28 = vpop.permute.xlu0 %219  ;;  %v2344_v29 = vld [vmem:[#allocation2 + $0xc8] sm:$0xff]   ;;  %245 = vst.msk [vmem:[#allocation2 + $0x44] sm:$0xf] %vm243_vm8, %v222_v27 }
 0x146   :  { %244 = vst.msk [vmem:[#allocation2 + $0x40] sm:$0xf] %vm243_vm8, %v220_v28  ;;  %2212 = vmatprep.subr.bf16.mxu1 %v2344_v29  ;;  %v2388_v28 = vld [vmem:[%s3194_s2 + $0xd4] ss:$20 sps:$4 sm:$0xff]   ;;  %v2387_v29 = vld [vmem:[%s3194_s2 + $0xf0] ss:$20 sps:$4 sm:$0xff]  }
 0x148   :  { %v614_v32 = vpop.permute.xlu1 %613 }
 0x149   :  { %v612_v33 = vpop.permute.xlu0 %611  ;;  %v2345_v34 = vld [vmem:[#allocation2 + $0x88] sm:$0xff]   ;;  %637 = vst.msk [vmem:[#allocation2 + $0xc4] sm:$0xf] %vm635_vm9, %v614_v32  ;;  %v2394_v32 = vld [vmem:[%s3194_s2 + $0xfc] ss:$20 sps:$4 sm:$0xff]  }
 0x14a   :  { %636 = vst.msk [vmem:[#allocation2 + $0xc0] sm:$0xf] %vm635_vm9, %v612_v33  ;;  %2213 = vmatpush3.bf16.msra.mxu1 %v2345_v34  ;;  %v2393_v33 = vld [vmem:[%s3194_s2 + $0x118] ss:$20 sps:$4 sm:$0xff]   ;;  %v2398_v34 = vld [vmem:[%s3194_s2 + $0x10] ss:$20 sps:$4 sm:$0xff]  }
 0x14c   :  { %v271_v35 = vpop.permute.xlu1 %270 }
 0x14d   :  { %v269_v36 = vpop.permute.xlu0 %268  ;;  %294 = vst.msk [vmem:[#allocation2 + $0x44] sm:$0xf] %vm292_vm10, %v271_v35  ;;  %v2396_v35 = vld [vmem:[%s3194_s2 + $0xf8] ss:$20 sps:$4 sm:$0xff]  }
 0x14e   :  { %293 = vst.msk [vmem:[#allocation2 + $0x40] sm:$0xf] %vm292_vm10, %v269_v36  ;;  %v2400_v36 = vld [vmem:[%s3194_s2 + $0x124] ss:$20 sps:$4 sm:$0xff]  }
 0x150   :  { %v418_v37 = vpop.permute.xlu1 %417 }
 0x151   :  { %v416_v38 = vpop.permute.xlu0 %415  ;;  %441 = vst.msk [vmem:[#allocation2 + $0x84] sm:$0xf] %vm439_vm11, %v418_v37  ;;  %v2399_v37 = vld [vmem:[%s3194_s2 + $0x38] ss:$20 sps:$4 sm:$0xff]  }
 0x152   :  { %440 = vst.msk [vmem:[#allocation2 + $0x80] sm:$0xf] %vm439_vm11, %v416_v38  ;;  %v2403_v38 = vld [vmem:[%s3194_s2 + $0x60] ss:$20 sps:$4 sm:$0xff]  }
 0x154   :  { %v663_v40 = vpop.permute.xlu1 %662 }
 0x155   :  { %v661_v41 = vpop.permute.xlu0 %660  ;;  %v2347_v42 = vld [vmem:[#allocation2 + $0x40] sm:$0xff]   ;;  %686 = vst.msk [vmem:[#allocation2 + $0xc4] sm:$0xf] %vm684_vm12, %v663_v40 }
 0x156   :  { %685 = vst.msk [vmem:[#allocation2 + $0xc0] sm:$0xf] %vm684_vm12, %v661_v41  ;;  %2150 = vmatprep.subr.bf16.mxu0 %v2347_v42  ;;  %v2405_v40 = vld [vmem:[%s3194_s2 + $0xb0] ss:$20 sps:$4 sm:$0xff]   ;;  %v2404_v41 = vld [vmem:[%s3194_s2 + $0x88] ss:$20 sps:$4 sm:$0xff]  }
 0x157   :  { %2151 = vmatpush3.bf16.msra.mxu0 %v2348_v39  ;;  %v2402_v39 = vld [vmem:[%s3194_s2 + $0x120] ss:$20 sps:$4 sm:$0xff]   ;;  %v2406_v42 = vld [vmem:[%s3194_s2 + $0xd8] ss:$20 sps:$4 sm:$0xff]  }
 0x158   :  { %v467_v45 = vpop.permute.xlu1 %466 }
 0x159   :  { %v465_v46 = vpop.permute.xlu0 %464  ;;  %490 = vst.msk [vmem:[#allocation2 + $0x84] sm:$0xf] %vm488_vm13, %v467_v45 }
 0x15a   :  { %489 = vst.msk [vmem:[#allocation2 + $0x80] sm:$0xf] %vm488_vm13, %v465_v46  ;;  %1579 = vmatmul.mubr.bf16.vlgmr.msra.gmra.mxu0 %v2349_v43  ;;  %v2407_v43 = vld [vmem:[%s3194_s2 + $0x100] ss:$20 sps:$4 sm:$0xff]  }
 0x15b   :  { %1586 = vmatprep.mubr.bf16.mxu0 %v2353_v44  ;;  %v2408_v44 = vld [vmem:[%s3194_s2 + $0x128] ss:$20 sps:$4 sm:$0xff]  }
 0x15c   :  { %v822_v47 = vpop.permute.xlu1 %821 }
 0x15d   :  { %v820_v48 = vpop.permute.xlu0 %819  ;;  %v2352_v49 = vld [vmem:[#allocation2 + $0xc0] sm:$0xff]   ;;  %839 = vst.msk [vmem:[#allocation2 + $0x11c] sm:$0xf] %vm831_vm14, %v822_v47 }
 0x15e   :  { %838 = vst.msk [vmem:[#allocation2 + $0x118] sm:$0xf] %vm831_vm14, %v820_v48  ;;  %2214 = vmatprep.subr.bf16.mxu1 %v2352_v49 }
 0x160   :  { %v871_v52 = vpop.permute.xlu1 %870 }
 0x161   :  { %v869_v53 = vpop.permute.xlu0 %868  ;;  %v2356_v54 = vld [vmem:[#allocation2 + $0x80] sm:$0xff]   ;;  %888 = vst.msk [vmem:[#allocation2 + $0x11c] sm:$0xf] %vm880_vm15, %v871_v52 }
 0x162   :  { %887 = vst.msk [vmem:[#allocation2 + $0x118] sm:$0xf] %vm880_vm15, %v869_v53  ;;  %1587 = vmatmul.mubr.bf16.gmra.mxu0 %v2355_v50  ;;  %2215 = vmatpush3.bf16.msra.mxu1 %v2356_v54 }
 0x163   :  { %1594 = vmatprep.mubr.bf16.mxu0 %v2360_v51 }
 0x164   :  { %v818_v59 = vpop.permute.xlu1 %817 }
 0x165   :  { %1676 = vmatmul.mubr.bf16.vlgmr.msra.gmra.mxu1 %v2357_v55  ;;  %837 = vst.msk [vmem:[#allocation2 + $0x114] sm:$0xf] %vm831_vm14, %v818_v59  ;;  %v816_v60 = vpop.permute.xlu0 %815 }
 0x166   :  { %836 = vst.msk [vmem:[#allocation2 + $0x110] sm:$0xf] %vm831_vm14, %v816_v60  ;;  %1683 = vmatprep.mubr.bf16.mxu1 %v2363_v56 }
 0x168   :  { %v867_v0 = vpop.permute.xlu1 %866 }
 0x169   :  { %v2362_v63 = vld [vmem:[#allocation2 + $0x118] sm:$0xff]   ;;  %886 = vst.msk [vmem:[#allocation2 + $0x114] sm:$0xf] %vm880_vm15, %v867_v0  ;;  %v865_v2 = vpop.permute.xlu0 %864 }
 0x16a   :  { %2300 = vmatprep.subr.bf16.mxu1 %v2362_v63  ;;  %1595 = vmatmul.mubr.bf16.gmra.mxu0 %v1983_v61  ;;  %885 = vst.msk [vmem:[#allocation2 + $0x110] sm:$0xf] %vm880_vm15, %v865_v2 }
 0x16b   :  { %2276 = vmatprep.subr.bf16.mxu0 %v2362_v63  ;;  %2304 = vmatpush3.bf16.msra.mxu1 %v2362_v63 }
 0x16c   :  { %2277 = vmatpush3.bf16.msra.mxu0 %v2362_v63  ;;  %1602 = vmatprep.mubr.bf16.mxu0 %v2366_v62  ;;  %v814_v4 = vpop.permute.xlu1 %813 }
 0x16d   :  { %1684 = vmatmul.mubr.bf16.gmra.mxu1 %v2365_v1  ;;  %835 = vst.msk [vmem:[#allocation2 + $0x10c] sm:$0xf] %vm831_vm14, %v814_v4  ;;  %v812_v5 = vpop.permute.xlu0 %811 }
 0x16e   :  { %1691 = vmatprep.mubr.bf16.mxu1 %v2369_v3  ;;  %834 = vst.msk [vmem:[#allocation2 + $0x108] sm:$0xf] %vm831_vm14, %v812_v5 }
 0x170   :  { %v863_v8 = vpop.permute.xlu1 %862 }
 0x171   :  { %v2374_v10 = vld [vmem:[#allocation2 + $0x110] sm:$0xff]   ;;  %884 = vst.msk [vmem:[#allocation2 + $0x10c] sm:$0xf] %vm880_vm15, %v863_v8  ;;  %v861_v11 = vpop.permute.xlu0 %860 }
 0x172   :  { %1603 = vmatmul.mubr.bf16.gmra.mxu0 %v2368_v6  ;;  %883 = vst.msk [vmem:[#allocation2 + $0x108] sm:$0xf] %vm880_vm15, %v861_v11  ;;  %2278 = vmatprep.subr.bf16.mxu0 %v2374_v10 }
 0x173   :  { %1610 = vmatprep.mubr.bf16.mxu0 %v2372_v7  ;;  %2301 = vmatprep.subr.bf16.mxu1 %v2374_v10 }
 0x174   :  { %2279 = vmatpush3.bf16.msra.mxu0 %v2374_v10  ;;  %v810_v15 = vpop.permute.xlu1 %809  ;;  %2305 = vmatpush3.bf16.msra.mxu1 %v2374_v10 }
 0x175   :  { %1692 = vmatmul.mubr.bf16.gmra.mxu1 %v2371_v9  ;;  %833 = vst.msk [vmem:[#allocation2 + $0x104] sm:$0xf] %vm831_vm14, %v810_v15  ;;  %v808_v16 = vpop.permute.xlu0 %807 }
 0x176   :  { %1699 = vmatprep.mubr.bf16.mxu1 %v2375_v12  ;;  %832 = vst.msk [vmem:[#allocation2 + $0x100] sm:$0xf] %vm831_vm14, %v808_v16 }
 0x178   :  { %v859_v19 = vpop.permute.xlu1 %858 }
 0x179   :  { %v2386_v21 = vld [vmem:[#allocation2 + $0x108] sm:$0xff]   ;;  %882 = vst.msk [vmem:[#allocation2 + $0x104] sm:$0xf] %vm880_vm15, %v859_v19  ;;  %v857_v22 = vpop.permute.xlu0 %856 }
 0x17a   :  { %1611 = vmatmul.mubr.bf16.gmra.mxu0 %v1993_v17  ;;  %881 = vst.msk [vmem:[#allocation2 + $0x100] sm:$0xf] %vm880_vm15, %v857_v22  ;;  %2280 = vmatprep.subr.bf16.mxu0 %v2386_v21 }
 0x17b   :  { %1618 = vmatprep.mubr.bf16.mxu0 %v2378_v18  ;;  %2302 = vmatprep.subr.bf16.mxu1 %v2386_v21 }
 0x17c   :  { %2281 = vmatpush3.bf16.msra.mxu0 %v2386_v21  ;;  %2306 = vmatpush3.bf16.msra.mxu1 %v2386_v21 }
 0x17d   :  { %1700 = vmatmul.mubr.bf16.gmra.mxu1 %v2377_v20 }
 0x17e   :  { %1707 = vmatprep.mubr.bf16.mxu1 %v2381_v23 }
 0x181   :  { %v2397_v27 = vld [vmem:[#allocation2 + $0x100] sm:$0xff]  }
 0x182   :  { %1619 = vmatmul.mubr.bf16.gmra.mxu0 %v2380_v24  ;;  %2282 = vmatprep.subr.bf16.mxu0 %v2397_v27 }
 0x183   :  { %1626 = vmatprep.mubr.bf16.mxu0 %v2384_v25  ;;  %2283 = vmatpush3.bf16.msra.mxu0 %v2397_v27 }
 0x184   :  { %2303 = vmatprep.subr.bf16.mxu1 %v2397_v27 }
 0x185   :  { %1708 = vmatmul.mubr.bf16.gmra.mxu1 %v2383_v26  ;;  %v1033_v17 = vpop.permute.xlu1 %1032 }
 0x186   :  { %1715 = vmatprep.mubr.bf16.mxu1 %v2388_v28  ;;  %2307 = vmatpush3.bf16.msra.mxu1 %v2397_v27  ;;  %v1028_v20 = vpop.permute.xlu0 %1027 }
 0x189   :  { %v1038_v23 = vpop.permute.xlu1 %1037 }
 0x18a   :  { %1627 = vmatmul.mubr.bf16.gmra.mxu0 %v2387_v29  ;;  %v1043_v26 = vpop.permute.xlu0 %1042 }
 0x18b   :  { %1634 = vmatprep.mubr.bf16.mxu0 %v2391_v30 }
 0x18d   :  { %1716 = vmatmul.mubr.bf16.gmra.mxu1 %v2390_v31  ;;  %v1048_v29 = vpop.permute.xlu1 %1047 }
 0x18e   :  { %1723 = vmatprep.mubr.bf16.mxu1 %v2394_v32  ;;  %v1053_v32 = vpop.permute.xlu0 %1052 }
 0x192   :  { %1635 = vmatmul.mubr.bf16.gmra.mxu0 %v2393_v33 }
 0x193   :  { %2284 = vmatprep.mubr.msk.bf16.mxu0 %vm1521_vm0, %v2398_v34 }
 0x195   :  { %1724 = vmatmul.mubr.bf16.gmra.mxu1 %v2396_v35 }
 0x196   :  { %1731 = vmatprep.mubr.bf16.mxu1 %v2400_v36  ;;  %v1058_v36 = vpop.permute.xlu1 %1057 }
 0x19a   :  { %2285 = vmatmul.mubr.msk.bf16.vlgmr.msra.gmra.mxu0 %vm1521_vm0, %v2399_v37 }
 0x19b   :  { %2288 = vmatprep.mubr.msk.bf16.mxu0 %vm1521_vm0, %v2403_v38 }
 0x19d   :  { %1732 = vmatmul.mubr.bf16.gmra.mxu1 %v2402_v39 }
 0x19e   :  { %2292 = vmatprep.mubr.msk.bf16.mxu1 %vm1521_vm0, %v2405_v40 }
 0x1a2   :  { %2289 = vmatmul.mubr.msk.bf16.gmra.mxu0 %vm1521_vm0, %v2404_v41  ;;  %v1063_v41 = vpop.permute.xlu0 %1062 }
 0x1a5   :  { %2293 = vmatmul.mubr.msk.bf16.vlgmr.msra.gmra.mxu1 %vm1521_vm0, %v2406_v42 }
 0x1a6   :  { %2296 = vmatprep.mubr.msk.bf16.mxu1 %vm1521_vm0, %v2407_v43 }
 0x1ad   :  { %2297 = vmatmul.mubr.msk.bf16.gmra.mxu1 %vm1521_vm0, %v2408_v44 }
 0x21a   :  { %v2152_v45 = vpop.f32.mrf.mxu0 }
 0x21c   :  { %v2153_v46 = vpop.f32.mrf.mxu0 }
 0x21d   :  { %v2154_v35 = vadd.f32 %v2153_v46, %v2152_v45 }
 0x21e   :  { %v2155_v47 = vpop.f32.mrf.mxu0 }
 0x220   :  { %v2156_v48 = vpop.f32.mrf.mxu0 }
 0x221   :  { %v2157_v40 = vadd.f32 %v2156_v48, %v2155_v47 }
 0x222   :  { %v2158_v49 = vpop.f32.mrf.mxu0 }
 0x224   :  { %v2159_v50 = vpop.f32.mrf.mxu0 }
 0x225   :  { %v2216_v51 = vpop.f32.mrf.mxu1  ;;  %v2160_v38 = vadd.f32 %v2159_v50, %v2158_v49  ;;  %v1584_v49 = vadd.f32 %v2157_v40, %v1033_v17 }
 0x226   :  { %v2161_v52 = vpop.f32.mrf.mxu0 }
 0x227   :  { %v2217_v53 = vpop.f32.mrf.mxu1  ;;  %v1589_v46 = vadd.f32 %v2160_v38, %v1038_v23 }
 0x228   :  { %v2162_v54 = vpop.f32.mrf.mxu0  ;;  %v2218_v44 = vadd.f32 %v2217_v53, %v2216_v51 }
 0x229   :  { %v2219_v55 = vpop.f32.mrf.mxu1 }
 0x22a   :  { %v2164_v56 = vpop.f32.mrf.mxu0 }
 0x22b   :  { %v2220_v57 = vpop.f32.mrf.mxu1 }
 0x22c   :  { %v2165_v58 = vpop.f32.mrf.mxu0 }
 0x22d   :  { %v2222_v59 = vpop.f32.mrf.mxu1 }
 0x22e   :  { %v2167_v60 = vpop.f32.mrf.mxu0 }
 0x22f   :  { %v2223_v61 = vpop.f32.mrf.mxu1 }
 0x230   :  { %v2168_v62 = vpop.f32.mrf.mxu0  ;;  %v2224_v45 = vadd.f32 %v2223_v61, %v2222_v59 }
 0x231   :  { %v3097_v63 = vpop.f32.mrf.mxu1  ;;  %v2169_v48 = vadd.f32 %v2168_v62, %v2167_v60 }
 0x232   :  { %v2170_v0 = vpop.f32.mrf.mxu0  ;;  %v1686_v59 = vadd.f32 %v2224_v45, %v1589_v46 }
 0x233   :  { %v3099_v1 = vpop.f32.mrf.mxu1 }
 0x234   :  { %v2171_v2 = vpop.f32.mrf.mxu0 }
 0x235   :  { %v3101_v3 = vpop.f32.mrf.mxu1  ;;  %v2172_v50 = vadd.f32 %v2171_v2, %v2170_v0 }
 0x236   :  { %v2173_v4 = vpop.f32.mrf.mxu0 }
 0x237   :  { %v3103_v5 = vpop.f32.mrf.mxu1  ;;  %v1605_v62 = vadd.f32 %v2172_v50, %v1058_v36 }
 0x238   :  { %v2174_v6 = vpop.f32.mrf.mxu0  ;;  %v2230_v61 = vadd.f32 %v3103_v5, %v3101_v3 }
 0x239   :  { %v3105_v7 = vpop.f32.mrf.mxu1 }
 0x23a   :  { %3197 = vst [vmem:[#allocation4_spill] sm:$0xff] %v3105_v7  ;;  %v2176_v8 = vpop.f32.mrf.mxu0 }
 0x23b   :  { %v2232_v9 = vpop.f32.mrf.mxu1 }
 0x23c   :  { %v2177_v10 = vpop.f32.mrf.mxu0 }
 0x23d   :  { %v2234_v11 = vpop.f32.mrf.mxu1  ;;  %v2178_v51 = vadd.f32 %v2177_v10, %v2176_v8  ;;  %v1600_v8 = vadd.f32 %v2169_v48, %v1053_v32 }
 0x23e   :  { %v3107_v12 = vpop.f32.mrf.mxu0 }
 0x23f   :  { %3198 = vst [vmem:[#allocation5_spill] sm:$0xff] %v3107_v12  ;;  %v2235_v13 = vpop.f32.mrf.mxu1 }
 0x240   :  { %v3109_v14 = vpop.f32.mrf.mxu0  ;;  %v2236_v60 = vadd.f32 %v2235_v13, %v2234_v11 }
 0x241   :  { %3199 = vst [vmem:[#allocation6_spill] sm:$0xff] %v3109_v14  ;;  %v3111_v15 = vpop.f32.mrf.mxu1  ;;  %v1581_v14 = vadd.f32 %v2154_v35, %v1028_v20  ;;  %v3207_v0 = vld [vmem:[#allocation4_spill] sm:$0xff] }
 0x242   :  { %3200 = vst [vmem:[#allocation7_spill] sm:$0xff] %v3111_v15  ;;  %v3113_v16 = vpop.f32.mrf.mxu0  ;;  %v2221_v15 = vadd.f32 %v2220_v57, %v2219_v55  ;;  %v2227_v55 = vadd.f32 %v3099_v1, %v3097_v63  ;;  %v2233_v2 = vadd.f32 %v2232_v9, %v3207_v0  ;;  %v1702_v40 = vadd.f32 %v2236_v60, %v1605_v62 }
 0x243   :  { %3201 = vst [vmem:[#allocation8_spill] sm:$0xff] %v3113_v16  ;;  %v2238_v18 = vpop.f32.mrf.mxu1  ;;  %v2163_v16 = vadd.f32 %v2162_v54, %v2161_v52  ;;  %v1678_v53 = vadd.f32 %v2218_v44, %v1581_v14 }
 0x244   :  { %v2183_v19 = vpop.f32.mrf.mxu0  ;;  %v1681_v54 = vadd.f32 %v2221_v15, %v1584_v49 }
 0x245   :  { %v2240_v21 = vpop.f32.mrf.mxu1 }
 0x246   :  { %v2185_v22 = vpop.f32.mrf.mxu0  ;;  %v3208_v10 = vld [vmem:[#allocation5_spill] sm:$0xff] }
 0x247   :  { %v2241_v24 = vpop.f32.mrf.mxu1 }
 0x248   :  { %v2186_v25 = vpop.f32.mrf.mxu0  ;;  %v3209_v14 = vld [vmem:[#allocation6_spill] sm:$0xff]  ;;  %v2242_v23 = vadd.f32 %v2241_v24, %v2240_v21 }
 0x249   :  { %v2243_v27 = vpop.f32.mrf.mxu1  ;;  %v2181_v15 = vadd.f32 %v3209_v14, %v3208_v10  ;;  %v3210_v20 = vld [vmem:[#allocation7_spill] sm:$0xff] }
 0x24a   :  { %v2188_v28 = vpop.f32.mrf.mxu0  ;;  %v2239_v63 = vadd.f32 %v2238_v18, %v3210_v20  ;;  %v3211_v1 = vld [vmem:[#allocation8_spill] sm:$0xff]  ;;  %v3146_v18 = vadd.f32 %v2233_v2, %v1600_v8 }
 0x24b   :  { %v2244_v30 = vpop.f32.mrf.mxu1 }
 0x24c   :  { %v2189_v31 = vpop.f32.mrf.mxu0  ;;  %v2245_v13 = vadd.f32 %v2244_v30, %v2243_v27 }
 0x24d   :  { %v3115_v33 = vpop.f32.mrf.mxu1 }
 0x24e   :  { %3202 = vst [vmem:[#allocation9_spill] sm:$0xff] %v3115_v33  ;;  %v3117_v34 = vpop.f32.mrf.mxu0  ;;  %v1068_v33 = vpop.permute.xlu1 %1067 }
 0x24f   :  { %3203 = vst [vmem:[#allocation10_spill] sm:$0xff] %v3117_v34  ;;  %v3119_v37 = vpop.f32.mrf.mxu1  ;;  %v2166_v34 = vadd.f32 %v2165_v58, %v2164_v56  ;;  %v2175_v56 = vadd.f32 %v2174_v6, %v2173_v4  ;;  %v2184_v4 = vadd.f32 %v2183_v19, %v3211_v1 }
 0x250   :  { %v3121_v39 = vpop.f32.mrf.mxu0 }
 0x251   :  { %3204 = vst [vmem:[#allocation11_spill] sm:$0xff] %v3121_v39  ;;  %v3123_v42 = vpop.f32.mrf.mxu1  ;;  %v1073_v39 = vpop.permute.xlu0 %1072  ;;  %v1597_v57 = vadd.f32 %v2166_v34, %v1048_v29  ;;  %v1613_v29 = vadd.f32 %v2178_v51, %v1068_v33  ;;  %v1608_v11 = vadd.f32 %v2175_v56, %v1063_v41  ;;  %v2190_v34 = vadd.f32 %v2189_v31, %v2188_v28 }
 0x252   :  { %3205 = vst [vmem:[#allocation12_spill] sm:$0xff] %v3123_v42  ;;  %v3125_v43 = vpop.f32.mrf.mxu0  ;;  %v1078_v17 = vpop.permute.xlu1 %1077  ;;  %v1616_v19 = vadd.f32 %v2181_v15, %v1073_v39 }
 0x253   :  { %3206 = vst [vmem:[#allocation13_spill] sm:$0xff] %v3125_v43  ;;  %v2250_v12 = vpop.f32.mrf.mxu1  ;;  %v1592_v43 = vadd.f32 %v2163_v16, %v1043_v26  ;;  %v2187_v26 = vadd.f32 %v2186_v25, %v2185_v22  ;;  %v1694_v44 = vadd.f32 %v2230_v61, %v1597_v57  ;;  %v1621_v45 = vadd.f32 %v2184_v4, %v1078_v17 }
 0x254   :  { %v3127_v7 = vpop.f32.mrf.mxu0  ;;  %v1705_v24 = vadd.f32 %v2239_v63, %v1608_v11  ;;  %v1710_v27 = vadd.f32 %v2242_v23, %v1613_v29  ;;  %v3151_v48 = vadd.f32 %v2245_v13, %v1616_v19 }
 0x255   :  { %v3129_v47 = vpop.f32.mrf.mxu1  ;;  %v1083_v3 = vpop.permute.xlu0 %1082  ;;  %v1689_v32 = vadd.f32 %v2227_v55, %v1592_v43  ;;  %v3212_v28 = vld [vmem:[#allocation9_spill] sm:$0xff] }
 0x256   :  { %v3131_v42 = vpop.f32.mrf.mxu0  ;;  %v1624_v25 = vadd.f32 %v2187_v26, %v1083_v3  ;;  %v1088_v33 = vpop.permute.xlu1 %1087  ;;  %v2248_v30 = vadd.f32 %v3119_v37, %v3212_v28  ;;  %v3215_v15 = vld [vmem:[#allocation10_spill] sm:$0xff] }
 0x257   :  { %v2253_v52 = vpop.f32.mrf.mxu1  ;;  %v1629_v49 = vadd.f32 %v2190_v34, %v1088_v33 }
 0x258   :  { %v2198_v58 = vpop.f32.mrf.mxu0  ;;  %v2254_v61 = vadd.f32 %v2253_v52, %v3129_v47  ;;  %v1718_v14 = vadd.f32 %v2248_v30, %v1621_v45  ;;  %v3216_v20 = vld [vmem:[#allocation11_spill] sm:$0xff] }
 0x259   :  { %v3138_v16 = vpop.f32.mrf.mxu1  ;;  %v3213_v31 = vld [vmem:[#allocation12_spill] sm:$0xff]  ;;  %v3153_v39 = vpop.permute.xlu0 %1092  ;;  %v2199_v17 = vadd.f32 %v2198_v58, %v3131_v42 }
 0x25a   :  { %v2286_v6 = vpop.f32.mrf.mxu0  ;;  %v2251_v43 = vadd.f32 %v2250_v12, %v3213_v31  ;;  %v3214_v57 = vld [vmem:[#allocation13_spill] sm:$0xff]  ;;  %v1098_v63 = vpop.permute.xlu1 %1097  ;;  %v1726_v13 = vadd.f32 %v2254_v61, %v1629_v49 }
 0x25b   :  { %v1783_v5 = vadd.f32 %v2286_v6, %v1686_v59  ;;  %v3144_v9 = vpop.f32.mrf.mxu1  ;;  %v2196_v59 = vadd.f32 %v3127_v7, %v3214_v57  ;;  %v2193_v7 = vadd.f32 %v3216_v20, %v3215_v15 }
 0x25c   :  { %v1774_v35 = vpop.f32.mrf.mxu0  ;;  %v1721_v11 = vadd.f32 %v2251_v43, %v1624_v25 }
 0x25d   :  { %v1775_v36 = vadd.f32 %v1774_v35, %v1678_v53  ;;  %v2258_v38 = vpop.f32.mrf.mxu1  ;;  %v1855_v21 = vmul.f32 0.05, %v1783_v5  ;;  %vm1839_vm1 = vcmp.ge.f32.partialorder %v1783_v5, 0.0  ;;  %v1637_v6 = vadd.f32 %v2196_v59, %v1098_v63  ;;  %v1103_v29 = vpop.permute.xlu0 %1102 }
 0x25e   :  { %v2287_v22 = vpop.f32.mrf.mxu0  ;;  %v1640_v34 = vadd.f32 %v2199_v17, %v1103_v29  ;;  %v2257_v35 = vadd.f32 %v3144_v9, %v3138_v16  ;;  %v1632_v57 = vadd.f32 %v2193_v7, %v3153_v39 }
 0x25f   :  { %v1786_v46 = vadd.f32 %v2287_v22, %v1689_v32  ;;  %v2259_v41 = vpop.f32.mrf.mxu1  ;;  %v1853_v51 = vmul.f32 0.05, %v1775_v36  ;;  %v1871_v37 = vsel %vm1839_vm1, %v1783_v5, %v1855_v21  ;;  %vm1837_vm3 = vcmp.ge.f32.partialorder %v1775_v36, 0.0 }
 0x260   :  { %v1777_v50 = vpop.f32.mrf.mxu0  ;;  %v2260_v10 = vadd.f32 %v2259_v41, %v2258_v38 }
 0x261   :  { %vm1840_vm2 = vcmp.ge.f32.partialorder %v1786_v46, 0.0  ;;  %v1856_v53 = vmul.f32 0.05, %v1786_v46  ;;  %v1778_v55 = vadd.f32 %v1777_v50, %v1681_v54  ;;  %v2261_v56 = vpop.f32.mrf.mxu1  ;;  %v1869_v47 = vsel %vm1837_vm3, %v1775_v36, %v1853_v51 }
 0x262   :  { %v2290_v12 = vpop.f32.mrf.mxu0  ;;  %v1734_v38 = vadd.f32 %v2260_v10, %v1637_v6 }
 0x263   :  { %v1872_v0 = vsel %vm1840_vm2, %v1786_v46, %v1856_v53  ;;  %vm1838_vm4 = vcmp.ge.f32.partialorder %v1778_v55, 0.0  ;;  %v1854_v2 = vmul.f32 0.05, %v1778_v55  ;;  %v1799_v60 = vadd.f32 %v2290_v12, %v1702_v40  ;;  %v2262_v62 = vpop.f32.mrf.mxu1 }
 0x264   :  { %v2097_v8 = vpack.c.bf16 %v1872_v0, %v1871_v37  ;;  %v1790_v54 = vpop.f32.mrf.mxu0  ;;  %v2263_v33 = vadd.f32 %v2262_v62, %v2261_v56 }
 0x265   :  { %v1870_v52 = vsel %vm1838_vm4, %v1778_v55, %v1854_v2  ;;  %v1791_v1 = vadd.f32 %v1790_v54, %v1694_v44  ;;  %v2294_v4 = vpop.f32.mrf.mxu1  ;;  %v1859_v26 = vmul.f32 0.05, %v1799_v60  ;;  %vm1843_vm5 = vcmp.ge.f32.partialorder %v1799_v60, 0.0 }
 0x266   :  { %2129 = vst [vmem:[%s3196_s4 + $0x8] sm:$0xff] %v2097_v8   ;;  %v2092_v23 = vpack.c.bf16 %v1870_v52, %v1869_v47  ;;  %v1815_v42 = vadd.f32 %v2294_v4, %v1718_v14  ;;  %v2291_v58 = vpop.f32.mrf.mxu0  ;;  %v1737_v37 = vadd.f32 %v2263_v33, %v1640_v34  ;;  %v1729_v2 = vadd.f32 %v2257_v35, %v1632_v57 }
 0x267   :  { %v1802_v3 = vadd.f32 %v2291_v58, %v1705_v24  ;;  %v1806_v5 = vpop.f32.mrf.mxu1  ;;  %v1857_v32 = vmul.f32 0.05, %v1791_v1  ;;  %v1875_v21 = vsel %vm1843_vm5, %v1799_v60, %v1859_v26  ;;  %vm1841_vm7 = vcmp.ge.f32.partialorder %v1791_v1, 0.0 }
 0x268   :  { %2093 = vst [vmem:[%s3196_s4] sm:$0xff] %v2092_v23   ;;  %v1793_v36 = vpop.f32.mrf.mxu0  ;;  %v1807_v44 = vadd.f32 %v1806_v5, %v1710_v27  ;;  %v1863_v22 = vmul.f32 0.05, %v1815_v42  ;;  %vm1847_vm8 = vcmp.ge.f32.partialorder %v1815_v42, 0.0 }
 0x269   :  { %vm1844_vm6 = vcmp.ge.f32.partialorder %v1802_v3, 0.0  ;;  %v1860_v40 = vmul.f32 0.05, %v1802_v3  ;;  %v1794_v19 = vadd.f32 %v1793_v36, %v3146_v18  ;;  %v2295_v45 = vpop.f32.mrf.mxu1  ;;  %v1873_v28 = vsel %vm1841_vm7, %v1791_v1, %v1857_v32 }
 0x26a   :  { %v1818_v24 = vadd.f32 %v2295_v45, %v1721_v11  ;;  %v1861_v30 = vmul.f32 0.05, %v1807_v44  ;;  %v1879_v43 = vsel %vm1847_vm8, %v1815_v42, %v1863_v22  ;;  %vm1845_vm11 = vcmp.ge.f32.partialorder %v1807_v44, 0.0 }
 0x26b   :  { %v1876_v16 = vsel %vm1844_vm6, %v1802_v3, %v1860_v40  ;;  %vm1842_vm9 = vcmp.ge.f32.partialorder %v1794_v19, 0.0  ;;  %v1858_v9 = vmul.f32 0.05, %v1794_v19  ;;  %v1809_v25 = vpop.f32.mrf.mxu1 }
 0x26c   :  { %v2107_v46 = vpack.c.bf16 %v1876_v16, %v1875_v21  ;;  %vm1848_vm10 = vcmp.ge.f32.partialorder %v1818_v24, 0.0  ;;  %v1864_v41 = vmul.f32 0.05, %v1818_v24  ;;  %v1810_v18 = vadd.f32 %v1809_v25, %v3151_v48 }
 0x26d   :  { %v1874_v27 = vsel %vm1842_vm9, %v1794_v19, %v1858_v9  ;;  %v2298_v31 = vpop.f32.mrf.mxu1  ;;  %v1877_v59 = vsel %vm1845_vm11, %v1807_v44, %v1861_v30 }
 0x26e   :  { %2131 = vst [vmem:[%s3196_s4 + $0x18] sm:$0xff] %v2107_v46   ;;  %v2102_v49 = vpack.c.bf16 %v1874_v27, %v1873_v28  ;;  %v1880_v50 = vsel %vm1848_vm10, %v1818_v24, %v1864_v41  ;;  %vm1846_vm12 = vcmp.ge.f32.partialorder %v1810_v18, 0.0  ;;  %v1862_v53 = vmul.f32 0.05, %v1810_v18 }
 0x26f   :  { %v2117_v51 = vpack.c.bf16 %v1880_v50, %v1879_v43  ;;  %v1831_v55 = vadd.f32 %v2298_v31, %v1734_v38  ;;  %v1822_v56 = vpop.f32.mrf.mxu1 }
 0x270   :  { %2130 = vst [vmem:[%s3196_s4 + $0x10] sm:$0xff] %v2102_v49   ;;  %v1823_v48 = vadd.f32 %v1822_v56, %v1726_v13  ;;  %v1878_v61 = vsel %vm1846_vm12, %v1810_v18, %v1862_v53 }
 0x271   :  { %2133 = vst [vmem:[%s3196_s4 + $0x28] sm:$0xff] %v2117_v51   ;;  %v2299_v12 = vpop.f32.mrf.mxu1  ;;  %v2112_v0 = vpack.c.bf16 %v1878_v61, %v1877_v59  ;;  %v1867_v60 = vmul.f32 0.05, %v1831_v55  ;;  %vm1851_vm13 = vcmp.ge.f32.partialorder %v1831_v55, 0.0 }
 0x272   :  { %v1834_v62 = vadd.f32 %v2299_v12, %v1737_v37  ;;  %v1865_v39 = vmul.f32 0.05, %v1823_v48  ;;  %vm1849_vm14 = vcmp.ge.f32.partialorder %v1823_v48, 0.0 }
 0x273   :  { %v1825_v17 = vpop.f32.mrf.mxu1  ;;  %2132 = vst [vmem:[%s3196_s4 + $0x20] sm:$0xff] %v2112_v0   ;;  %v1883_v14 = vsel %vm1851_vm13, %v1831_v55, %v1867_v60 }
 0x274   :  { %v1826_v8 = vadd.f32 %v1825_v17, %v1729_v2  ;;  %vm1852_vm15 = vcmp.ge.f32.partialorder %v1834_v62, 0.0  ;;  %v1868_v10 = vmul.f32 0.05, %v1834_v62  ;;  %v1881_v20 = vsel %vm1849_vm14, %v1823_v48, %v1865_v39 }
 0x276   :  { %vm1850_vm0 = vcmp.ge.f32.partialorder %v1826_v8, 0.0  ;;  %v1866_v54 = vmul.f32 0.05, %v1826_v8  ;;  %v1884_v15 = vsel %vm1852_vm15, %v1834_v62, %v1868_v10 }
 0x277   :  { %v2127_v7 = vpack.c.bf16 %v1884_v15, %v1883_v14 }
 0x278   :  { %v1882_v63 = vsel %vm1850_vm0, %v1826_v8, %v1866_v54 }
 0x279   :  { %v2122_v47 = vpack.c.bf16 %v1882_v63, %v1881_v20  ;;  %2135 = vst [vmem:[%s3196_s4 + $0x38] sm:$0xff] %v2127_v7  }
 0x27b   :  { %2134 = vst [vmem:[%s3196_s4 + $0x30] sm:$0xff] %v2122_v47  }

// kernel: forward.7
= control target key start
LH: loop header
LB: loop body
LE: loop exit
PB: predicated region body
PF: predicated region fallthrough
CT: control target
= control target key end

     0   :  { %s1448_s0 = inlined_call_operand.vmem [shape: bf16[32,256], index: 0, kind: input, shape index: {}]   ;;  %s1449_s1 = inlined_call_operand.vmem [shape: bf16[1,32,128], index: 1, kind: input, shape index: {}]   ;;  %s1450_s2 = inlined_call_operand.hbm [shape: bf16[64,288], index: 2, kind: input, shape index: {}]   ;;  %s1451_s3 = inlined_call_operand.vmem [shape: f32[64,1], index: 3, kind: input, shape index: {}]   ;;  %s1452_s4 = inlined_call_operand.vmem [shape: bf16[64,128], index: 4, kind: output, shape index: {}]  }
   0x1   :  { %v28_v0 = vld [vmem:[%s1448_s0] sm:$0xf]  ;;  %v30_v1 = vld [vmem:[%s1448_s0 + $0x8] sm:$0xf]  ;;  %v32_v2 = vld [vmem:[%s1448_s0 + $0x10] sm:$0xf] }
   0x2   :  { %29 = vst [vmem:[#allocation3] sm:$0xf] %v28_v0  ;;  %31 = vst [vmem:[#allocation3 + $0x4] sm:$0xf] %v30_v1  ;;  %v34_v3 = vld [vmem:[%s1448_s0 + $0x18] sm:$0xf] }
   0x3   :  { %33 = vst [vmem:[#allocation3 + $0x8] sm:$0xf] %v32_v2 }
   0x4   :  { %9 = vsyncpa [#allocation5], 0  ;;  %35 = vst [vmem:[#allocation3 + $0xc] sm:$0xf] %v34_v3  ;;  %s1196_s23 = smov [#allocation4]  }
   0x5   :  { %s72_s24 = sshll.u32 %s1196_s23, 4  ;;  %s73_s24 = int_to_ptr.vmem [resolvable:$true] %s72_s24 }
   0x6   :  { %s1182_s25 = scalar_lea.vmem %s73_s24, 1536  ;;  %p1187_p1 = scmp.lt.s32.totalorder %s73_s24, %s73_s24 }
   0x7   :  { %p1183_p0 = scmp.ne.s32.totalorder %s73_s24, %s1182_s25  ;;  %p1188_p2 = scmp.lt.s32.totalorder %s1182_s25, %s1182_s25 }
   0x9   :  { %p1189_p3 = por %p1188_p2, %p1187_p1 }
   0xb   :  { %p1190_p4 = pnand %p1189_p3, %p1183_p0 }
   0xd   :  { %1193 = shalt.err (!%p1190_p4)
}
   0xe   :  { %s1197_s26 = smov 192   ;;  %s1198_s27 = smov 12  }
   0xf   :  { %78 = dma.hbm_to_vmem [thread:$0]  %s1450_s2, 1536, %s73_s24, [#allocation5], %s1197_s26, %s1197_s26, %s1198_s27  }
  0x10   :  { %1194 = dma.done.wait [#allocation5], 1536  }
  0x11   :  { %1195 = vsyncadd [#allocation5], 4294965760  ;;  %v397_v4 = vld [vmem:[#allocation3 + $0x8] sm:$0xf]  ;;  %s1199_s0 = smov 115   ;;  %s1200_s30 = smov 122  }
  0x12   :  { %v197_v5 = vld [vmem:[#allocation3 + $0x8] sm:$0xf]  ;;  %407 = vrot.lane.b32.xlu0 %v397_v4, %s1199_s0  ;;  %v398_v6 = vld [vmem:[#allocation3 + $0xc] sm:$0xf]  ;;  %v422_v8 = vld [vmem:[%s1449_s1 + $0x8] sm:$0xf] }
  0x13   :  { %207 = vrot.lane.b32.xlu1 %v197_v5, %s1200_s30  ;;  %v198_v7 = vld [vmem:[#allocation3 + $0xc] sm:$0xf]  ;;  %v423_v9 = vld [vmem:[%s1449_s1 + $0xc] sm:$0xf]  ;;  %v222_v10 = vld [vmem:[%s1449_s1 + $0x8] sm:$0xf] }
  0x14   :  { %v223_v11 = vld [vmem:[%s1449_s1 + $0xc] sm:$0xf]  ;;  %v395_v12 = vld [vmem:[#allocation3] sm:$0xf]  ;;  %v396_v13 = vld [vmem:[#allocation3 + $0x4] sm:$0xf] }
  0x15   :  { %v196_v14 = vld [vmem:[#allocation3 + $0x4] sm:$0xf]  ;;  %v195_v15 = vld [vmem:[#allocation3] sm:$0xf]  ;;  %v421_v16 = vld [vmem:[%s1449_s1 + $0x4] sm:$0xf] }
  0x16   :  { %409 = vrot.lane.b32.xlu0 %v398_v6, %s1199_s0  ;;  %v420_v17 = vld [vmem:[%s1449_s1] sm:$0xf]  ;;  %v221_v18 = vld [vmem:[%s1449_s1 + $0x4] sm:$0xf]  ;;  %v348_v20 = vld [vmem:[#allocation3 + $0xc] sm:$0xf] }
  0x17   :  { %209 = vrot.lane.b32.xlu1 %v198_v7, %s1200_s30  ;;  %v220_v19 = vld [vmem:[%s1449_s1] sm:$0xf]  ;;  %v347_v21 = vld [vmem:[#allocation3 + $0x8] sm:$0xf]  ;;  %s1201_s20 = smov 116   ;;  %s1202_s21 = smov 126  }
  0x18   :  { %v148_v22 = vld [vmem:[#allocation3 + $0xc] sm:$0xf]  ;;  %v147_v23 = vld [vmem:[#allocation3 + $0x8] sm:$0xf]  ;;  %v373_v24 = vld [vmem:[%s1449_s1 + $0xc] sm:$0xf] }
  0x19   :  { %v372_v25 = vld [vmem:[%s1449_s1 + $0x8] sm:$0xf]  ;;  %v173_v26 = vld [vmem:[%s1449_s1 + $0xc] sm:$0xf]  ;;  %v346_v28 = vld [vmem:[#allocation3 + $0x4] sm:$0xf] }
  0x1a   :  { %432 = vrot.lane.b32.xlu0 %v422_v8, %s1199_s0  ;;  %v172_v27 = vld [vmem:[%s1449_s1 + $0x8] sm:$0xf]  ;;  %v345_v29 = vld [vmem:[#allocation3] sm:$0xf]  ;;  %v146_v30 = vld [vmem:[#allocation3 + $0x4] sm:$0xf] }
  0x1b   :  { %434 = vrot.lane.b32.xlu1 %v423_v9, %s1199_s0  ;;  %v145_v31 = vld [vmem:[#allocation3] sm:$0xf]  ;;  %v371_v32 = vld [vmem:[%s1449_s1 + $0x4] sm:$0xf]  ;;  %v370_v33 = vld [vmem:[%s1449_s1] sm:$0xf] }
  0x1c   :  { %v171_v34 = vld [vmem:[%s1449_s1 + $0x4] sm:$0xf]  ;;  %v170_v35 = vld [vmem:[%s1449_s1] sm:$0xf]  ;;  %v298_v36 = vld [vmem:[#allocation3 + $0xc] sm:$0xf] }
  0x1d   :  { %v297_v37 = vld [vmem:[#allocation3 + $0x8] sm:$0xf]  ;;  %s1203_s10 = smov 120   ;;  %v98_v38 = vld [vmem:[#allocation3 + $0xc] sm:$0xf]  ;;  %s1204_s11 = smov 127  }
  0x1e   :  { %232 = vrot.lane.b32.xlu0 %v222_v10, %s1200_s30  ;;  %v97_v39 = vld [vmem:[#allocation3 + $0x8] sm:$0xf]  ;;  %v323_v40 = vld [vmem:[%s1449_s1 + $0xc] sm:$0xf]  ;;  %v322_v41 = vld [vmem:[%s1449_s1 + $0x8] sm:$0xf] }
  0x1f   :  { %234 = vrot.lane.b32.xlu1 %v223_v11, %s1200_s30  ;;  %v123_v42 = vld [vmem:[%s1449_s1 + $0xc] sm:$0xf]  ;;  %v122_v43 = vld [vmem:[%s1449_s1 + $0x8] sm:$0xf]  ;;  %v296_v44 = vld [vmem:[#allocation3 + $0x4] sm:$0xf] }
  0x20   :  { %v295_v45 = vld [vmem:[#allocation3] sm:$0xf]  ;;  %v96_v46 = vld [vmem:[#allocation3 + $0x4] sm:$0xf]  ;;  %v321_v48 = vld [vmem:[%s1449_s1 + $0x4] sm:$0xf] }
  0x21   :  { %v95_v47 = vld [vmem:[#allocation3] sm:$0xf]  ;;  %v320_v49 = vld [vmem:[%s1449_s1] sm:$0xf]  ;;  %v121_v50 = vld [vmem:[%s1449_s1 + $0x4] sm:$0xf] }
  0x22   :  { %403 = vrot.lane.b32.xlu0 %v395_v12, %s1199_s0  ;;  %v120_v51 = vld [vmem:[%s1449_s1] sm:$0xf]  ;;  %v89_v52 = vld [vmem:[#allocation3 + $0x8] sm:$0xff]   ;;  %v87_v55 = vld [vmem:[#allocation3] sm:$0xff]   ;;  %s1205_s28 = smov 121   ;;  %s1206_s9 = smov 114  }
  0x23   :  { %405 = vrot.lane.b32.xlu1 %v396_v13, %s1199_s0  ;;  %93 = vst [vmem:[#allocation2 + $0x8] sm:$0xff] %v89_v52   ;;  %v248_v53 = vld [vmem:[#allocation3 + $0xc] sm:$0xf]  ;;  %v247_v54 = vld [vmem:[#allocation3 + $0x8] sm:$0xf]  ;;  %91 = vst [vmem:[#allocation2] sm:$0xff] %v87_v55  }
  0x24   :  { %v273_v56 = vld [vmem:[%s1449_s1 + $0xc] sm:$0xf]  ;;  %v272_v57 = vld [vmem:[%s1449_s1 + $0x8] sm:$0xf]  ;;  %v246_v58 = vld [vmem:[#allocation3 + $0x4] sm:$0xf] }
  0x25   :  { %v245_v59 = vld [vmem:[#allocation3] sm:$0xf]  ;;  %v271_v60 = vld [vmem:[%s1449_s1 + $0x4] sm:$0xf]  ;;  %v270_v61 = vld [vmem:[%s1449_s1] sm:$0xf] }
  0x26   :  { %203 = vrot.lane.b32.xlu0 %v195_v15, %s1200_s30  ;;  %v1158_v62 = vld [vmem:[#allocation4 + $0x4] ss:$12 sps:$4 sm:$0xff]   ;;  %v1161_v63 = vld [vmem:[#allocation4 + $0x4c] ss:$12 sps:$4 sm:$0xff]   ;;  %v448_v0 = vld [vmem:[#allocation3 + $0xc] sm:$0xf] }
  0x27   :  { %205 = vrot.lane.b32.xlu1 %v196_v14, %s1200_s30  ;;  %808 = vmatprep.mubr.bf16.mxu0 %v1158_v62  ;;  %v447_v1 = vld [vmem:[#allocation3 + $0x8] sm:$0xf]  ;;  %vm415_vm0 = vcmask 936960   ;;  %vm215_vm1 = vcmask 994304   ;;  %v473_v2 = vld [vmem:[%s1449_s1 + $0xc] sm:$0xf] }
  0x28   :  { %832 = vmatprep.mubr.bf16.mxu1 %v1161_v63  ;;  %v472_v3 = vld [vmem:[%s1449_s1 + $0x8] sm:$0xf]  ;;  %v446_v6 = vld [vmem:[#allocation3 + $0x4] sm:$0xf]  ;;  %v445_v7 = vld [vmem:[#allocation3] sm:$0xf] }
  0x29   :  { %vm440_vm2 = vcmask 1044376   ;;  %v471_v10 = vld [vmem:[%s1449_s1 + $0x4] sm:$0xf]  ;;  %v470_v11 = vld [vmem:[%s1449_s1] sm:$0xf]  ;;  %vm240_vm3 = vcmask 1044432  }
  0x2a   :  { %428 = vrot.lane.b32.xlu0 %v420_v17, %s1199_s0  ;;  %vm365_vm4 = vcmask 945152   ;;  %vm165_vm5 = vcmask 1027072   ;;  %vm390_vm6 = vcmask 1044384   ;;  %vm190_vm7 = vcmask 1044464  }
  0x2b   :  { %430 = vrot.lane.b32.xlu1 %v421_v16, %s1199_s0  ;;  %vm315_vm8 = vcmask 977920   ;;  %vm115_vm9 = vcmask 1035264   ;;  %vm340_vm10 = vcmask 1044416   ;;  %vm140_vm11 = vcmask 1044472  }
  0x2c   :  { %vm265_vm12 = vcmask 986112   ;;  %vm290_vm13 = vcmask 1044424   ;;  %vm465_vm14 = vcmask 928768   ;;  %vm490_vm15 = vcmask 1044368  }
  0x2e   :  { %228 = vrot.lane.b32.xlu0 %v220_v19, %s1200_s30  ;;  %v548_v19 = vld [vmem:[%s1451_s3 + $0x8] sm:$0xff] }
  0x2f   :  { %230 = vrot.lane.b32.xlu1 %v221_v18, %s1200_s30 }
  0x32   :  { %357 = vrot.lane.b32.xlu0 %v347_v21, %s1201_s20  ;;  %v1207_v21 = vmov 0  }
  0x33   :  { %359 = vrot.lane.b32.xlu1 %v348_v20, %s1201_s20  ;;  %v547_v20 = vld [vmem:[%s1451_s3] sm:$0xff]  ;;  %1138 = vset.pattern.permute.xlu0 %v1207_v21 }
  0x34   :  { %1139 = vset.pattern.permute.xlu1 %v1207_v21 }
  0x36   :  { %157 = vrot.lane.b32.xlu0 %v147_v23, %s1202_s21 }
  0x37   :  { %159 = vrot.lane.b32.xlu1 %v148_v22, %s1202_s21 }
  0x3a   :  { %382 = vrot.lane.b32.xlu0 %v372_v25, %s1201_s20  ;;  %v549_v25 = vld [vmem:[%s1451_s3 + $0x10] sm:$0xff] }
  0x3b   :  { %384 = vrot.lane.b32.xlu1 %v373_v24, %s1201_s20 }
  0x3e   :  { %182 = vrot.lane.b32.xlu0 %v172_v27, %s1202_s21 }
  0x3f   :  { %184 = vrot.lane.b32.xlu1 %v173_v26, %s1202_s21  ;;  %v550_v26 = vld [vmem:[%s1451_s3 + $0x18] sm:$0xff] }
  0x42   :  { %353 = vrot.lane.b32.xlu0 %v345_v29, %s1201_s20  ;;  %v551_v29 = vld [vmem:[%s1451_s3 + $0x20] sm:$0xff] }
  0x43   :  { %355 = vrot.lane.b32.xlu1 %v346_v28, %s1201_s20 }
  0x46   :  { %153 = vrot.lane.b32.xlu0 %v145_v31, %s1202_s21 }
  0x47   :  { %155 = vrot.lane.b32.xlu1 %v146_v30, %s1202_s21  ;;  %v552_v30 = vld [vmem:[%s1451_s3 + $0x28] sm:$0xff] }
  0x4a   :  { %378 = vrot.lane.b32.xlu0 %v370_v33, %s1201_s20  ;;  %v553_v33 = vld [vmem:[%s1451_s3 + $0x30] sm:$0xff] }
  0x4b   :  { %380 = vrot.lane.b32.xlu1 %v371_v32, %s1201_s20 }
  0x4e   :  { %178 = vrot.lane.b32.xlu0 %v170_v35, %s1202_s21 }
  0x4f   :  { %180 = vrot.lane.b32.xlu1 %v171_v34, %s1202_s21  ;;  %v554_v34 = vld [vmem:[%s1451_s3 + $0x38] sm:$0xff] }
  0x52   :  { %307 = vrot.lane.b32.xlu0 %v297_v37, %s1203_s10 }
  0x53   :  { %309 = vrot.lane.b32.xlu1 %v298_v36, %s1203_s10 }
  0x56   :  { %107 = vrot.lane.b32.xlu0 %v97_v39, %s1204_s11 }
  0x57   :  { %109 = vrot.lane.b32.xlu1 %v98_v38, %s1204_s11 }
  0x5a   :  { %332 = vrot.lane.b32.xlu0 %v322_v41, %s1203_s10 }
  0x5b   :  { %334 = vrot.lane.b32.xlu1 %v323_v40, %s1203_s10 }
  0x5e   :  { %132 = vrot.lane.b32.xlu0 %v122_v43, %s1204_s11 }
  0x5f   :  { %134 = vrot.lane.b32.xlu1 %v123_v42, %s1204_s11 }
  0x62   :  { %303 = vrot.lane.b32.xlu0 %v295_v45, %s1203_s10 }
  0x63   :  { %305 = vrot.lane.b32.xlu1 %v296_v44, %s1203_s10 }
  0x66   :  { %103 = vrot.lane.b32.xlu0 %v95_v47, %s1204_s11 }
  0x67   :  { %105 = vrot.lane.b32.xlu1 %v96_v46, %s1204_s11 }
  0x6a   :  { %328 = vrot.lane.b32.xlu0 %v320_v49, %s1203_s10 }
  0x6b   :  { %330 = vrot.lane.b32.xlu1 %v321_v48, %s1203_s10 }
  0x6e   :  { %128 = vrot.lane.b32.xlu0 %v120_v51, %s1204_s11 }
  0x6f   :  { %130 = vrot.lane.b32.xlu1 %v121_v50, %s1204_s11 }
  0x72   :  { %257 = vrot.lane.b32.xlu0 %v247_v54, %s1205_s28 }
  0x73   :  { %259 = vrot.lane.b32.xlu1 %v248_v53, %s1205_s28 }
  0x76   :  { %282 = vrot.lane.b32.xlu0 %v272_v57, %s1205_s28 }
  0x77   :  { %284 = vrot.lane.b32.xlu1 %v273_v56, %s1205_s28 }
  0x7a   :  { %253 = vrot.lane.b32.xlu0 %v245_v59, %s1205_s28 }
  0x7b   :  { %255 = vrot.lane.b32.xlu1 %v246_v58, %s1205_s28 }
  0x7e   :  { %278 = vrot.lane.b32.xlu0 %v270_v61, %s1205_s28 }
  0x7f   :  { %280 = vrot.lane.b32.xlu1 %v271_v60, %s1205_s28 }
  0x82   :  { %457 = vrot.lane.b32.xlu0 %v447_v1, %s1206_s9 }
  0x83   :  { %459 = vrot.lane.b32.xlu1 %v448_v0, %s1206_s9 }
  0x84   :  { %v408_v4 = vpop.permute.xlu0 %407 }
  0x85   :  { %v208_v5 = vpop.permute.xlu1 %207  ;;  %418 = vst.msk [vmem:[#allocation2 + $0x78] sm:$0xf] %vm415_vm0, %v408_v4 }
  0x86   :  { %218 = vst.msk [vmem:[#allocation2 + $0x38] sm:$0xf] %vm215_vm1, %v208_v5  ;;  %482 = vrot.lane.b32.xlu0 %v472_v3, %s1206_s9 }
  0x87   :  { %484 = vrot.lane.b32.xlu1 %v473_v2, %s1206_s9 }
  0x88   :  { %v410_v8 = vpop.permute.xlu0 %409 }
  0x89   :  { %v210_v9 = vpop.permute.xlu1 %209  ;;  %419 = vst.msk [vmem:[#allocation2 + $0x7c] sm:$0xf] %vm415_vm0, %v410_v8 }
  0x8a   :  { %219 = vst.msk [vmem:[#allocation2 + $0x3c] sm:$0xf] %vm215_vm1, %v210_v9  ;;  %453 = vrot.lane.b32.xlu0 %v445_v7, %s1206_s9 }
  0x8b   :  { %455 = vrot.lane.b32.xlu1 %v446_v6, %s1206_s9 }
  0x8c   :  { %v433_v12 = vpop.permute.xlu0 %432 }
  0x8d   :  { %v435_v13 = vpop.permute.xlu1 %434  ;;  %443 = vst.msk [vmem:[#allocation2 + $0x78] sm:$0xf] %vm440_vm2, %v433_v12 }
  0x8e   :  { %444 = vst.msk [vmem:[#allocation2 + $0x7c] sm:$0xf] %vm440_vm2, %v435_v13  ;;  %478 = vrot.lane.b32.xlu0 %v470_v11, %s1206_s9 }
  0x8f   :  { %480 = vrot.lane.b32.xlu1 %v471_v10, %s1206_s9 }
  0x90   :  { %v233_v14 = vpop.permute.xlu0 %232 }
  0x91   :  { %v235_v15 = vpop.permute.xlu1 %234  ;;  %243 = vst.msk [vmem:[#allocation2 + $0x38] sm:$0xf] %vm240_vm3, %v233_v14 }
  0x92   :  { %244 = vst.msk [vmem:[#allocation2 + $0x3c] sm:$0xf] %vm240_vm3, %v235_v15  ;;  %557 = vperm.xlu0 %1138, %v547_v20  }
  0x93   :  { %562 = vperm.xlu1 %1139, %v548_v19   ;;  %v1153_v19 = vld [vmem:[#allocation2 + $0x8] sm:$0xff]  }
  0x94   :  { %v404_v16 = vpop.permute.xlu0 %403 }
  0x95   :  { %v406_v17 = vpop.permute.xlu1 %405  ;;  %v1140_v18 = vld [vmem:[#allocation2 + $0x78] sm:$0xff]   ;;  %416 = vst.msk [vmem:[#allocation2 + $0x70] sm:$0xf] %vm415_vm0, %v404_v16 }
  0x96   :  { %417 = vst.msk [vmem:[#allocation2 + $0x74] sm:$0xf] %vm415_vm0, %v406_v17  ;;  %1052 = vmatprep.subr.bf16.mxu0 %v1140_v18  ;;  %1110 = vmatprep.subr.bf16.mxu1 %v1140_v18  ;;  %vm763_vm0 = vcmask 261120  }
  0x97   :  { %567 = vperm.xlu1 %1139, %v549_v25   ;;  %572 = vperm.xlu0 %1138, %v550_v26   ;;  %v1155_v25 = vld [vmem:[#allocation2] sm:$0xff]  }
  0x98   :  { %v204_v23 = vpop.permute.xlu0 %203 }
  0x99   :  { %v206_v22 = vpop.permute.xlu1 %205  ;;  %v1141_v24 = vld [vmem:[#allocation2 + $0x38] sm:$0xff]   ;;  %216 = vst.msk [vmem:[#allocation2 + $0x30] sm:$0xf] %vm215_vm1, %v204_v23 }
  0x9a   :  { %217 = vst.msk [vmem:[#allocation2 + $0x34] sm:$0xf] %vm215_vm1, %v206_v22  ;;  %1053 = vmatpush3.bf16.msra.mxu0 %v1141_v24  ;;  %1118 = vmatpush3.bf16.msra.mxu1 %v1141_v24 }
  0x9b   :  { %577 = vperm.xlu1 %1139, %v551_v29   ;;  %582 = vperm.xlu0 %1138, %v552_v30   ;;  %v1156_v29 = vld [vmem:[#allocation4] ss:$12 sps:$4 sm:$0xff]   ;;  %v1159_v30 = vld [vmem:[#allocation4 + $0x48] ss:$12 sps:$4 sm:$0xff]  }
  0x9c   :  { %v429_v28 = vpop.permute.xlu0 %428 }
  0x9d   :  { %v431_v27 = vpop.permute.xlu1 %430  ;;  %441 = vst.msk [vmem:[#allocation2 + $0x70] sm:$0xf] %vm440_vm2, %v429_v28 }
  0x9e   :  { %442 = vst.msk [vmem:[#allocation2 + $0x74] sm:$0xf] %vm440_vm2, %v431_v27 }
  0x9f   :  { %587 = vperm.xlu1 %1139, %v553_v33   ;;  %592 = vperm.xlu0 %1138, %v554_v34  }
  0xa0   :  { %v229_v32 = vpop.permute.xlu0 %228 }
  0xa1   :  { %v231_v31 = vpop.permute.xlu1 %230  ;;  %241 = vst.msk [vmem:[#allocation2 + $0x30] sm:$0xf] %vm240_vm3, %v229_v32  ;;  %v1169_v32 = vld [vmem:[#allocation4 + $0x8] ss:$12 sps:$4 sm:$0xff]  }
  0xa2   :  { %242 = vst.msk [vmem:[#allocation2 + $0x34] sm:$0xf] %vm240_vm3, %v231_v31  ;;  %v1163_v31 = vld [vmem:[#allocation4 + $0x1c] ss:$12 sps:$4 sm:$0xff]  }
  0xa4   :  { %v358_v36 = vpop.permute.xlu0 %357 }
  0xa5   :  { %v360_v35 = vpop.permute.xlu1 %359  ;;  %v1142_v37 = vld [vmem:[#allocation2 + $0x70] sm:$0xff]   ;;  %368 = vst.msk [vmem:[#allocation2 + $0x68] sm:$0xf] %vm365_vm4, %v358_v36 }
  0xa6   :  { %369 = vst.msk [vmem:[#allocation2 + $0x6c] sm:$0xf] %vm365_vm4, %v360_v35  ;;  %1054 = vmatprep.subr.bf16.mxu0 %v1142_v37  ;;  %1111 = vmatprep.subr.bf16.mxu1 %v1142_v37 }
  0xa8   :  { %v158_v39 = vpop.permute.xlu0 %157 }
  0xa9   :  { %v160_v38 = vpop.permute.xlu1 %159  ;;  %v1143_v40 = vld [vmem:[#allocation2 + $0x30] sm:$0xff]   ;;  %168 = vst.msk [vmem:[#allocation2 + $0x28] sm:$0xf] %vm165_vm5, %v158_v39 }
  0xaa   :  { %169 = vst.msk [vmem:[#allocation2 + $0x2c] sm:$0xf] %vm165_vm5, %v160_v38  ;;  %1055 = vmatpush3.bf16.msra.mxu0 %v1143_v40  ;;  %1119 = vmatpush3.bf16.msra.mxu1 %v1143_v40  ;;  %v1165_v38 = vld [vmem:[#allocation4 + $0x18] ss:$12 sps:$4 sm:$0xff]   ;;  %v1167_v39 = vld [vmem:[#allocation4 + $0x34] ss:$12 sps:$4 sm:$0xff]  }
  0xac   :  { %v383_v42 = vpop.permute.xlu0 %382 }
  0xad   :  { %v385_v41 = vpop.permute.xlu1 %384  ;;  %393 = vst.msk [vmem:[#allocation2 + $0x68] sm:$0xf] %vm390_vm6, %v383_v42  ;;  %v1171_v42 = vld [vmem:[#allocation4 + $0x20] ss:$12 sps:$4 sm:$0xff]  }
  0xae   :  { %394 = vst.msk [vmem:[#allocation2 + $0x6c] sm:$0xf] %vm390_vm6, %v385_v41  ;;  %v1170_v41 = vld [vmem:[#allocation4 + $0x30] ss:$12 sps:$4 sm:$0xff]  }
  0xb0   :  { %v183_v44 = vpop.permute.xlu0 %182 }
  0xb1   :  { %v185_v43 = vpop.permute.xlu1 %184  ;;  %193 = vst.msk [vmem:[#allocation2 + $0x28] sm:$0xf] %vm190_vm7, %v183_v44  ;;  %v1173_v44 = vld [vmem:[#allocation4 + $0x50] ss:$12 sps:$4 sm:$0xff]  }
  0xb2   :  { %194 = vst.msk [vmem:[#allocation2 + $0x2c] sm:$0xf] %vm190_vm7, %v185_v43  ;;  %v1172_v43 = vld [vmem:[#allocation4 + $0x38] ss:$12 sps:$4 sm:$0xff]  }
  0xb4   :  { %v354_v46 = vpop.permute.xlu0 %353 }
  0xb5   :  { %v356_v45 = vpop.permute.xlu1 %355  ;;  %v1144_v47 = vld [vmem:[#allocation2 + $0x68] sm:$0xff]   ;;  %366 = vst.msk [vmem:[#allocation2 + $0x60] sm:$0xf] %vm365_vm4, %v354_v46 }
  0xb6   :  { %367 = vst.msk [vmem:[#allocation2 + $0x64] sm:$0xf] %vm365_vm4, %v356_v45  ;;  %1056 = vmatprep.subr.bf16.mxu0 %v1144_v47  ;;  %1112 = vmatprep.subr.bf16.mxu1 %v1144_v47 }
  0xb8   :  { %v154_v49 = vpop.permute.xlu0 %153 }
  0xb9   :  { %v156_v48 = vpop.permute.xlu1 %155  ;;  %v1145_v50 = vld [vmem:[#allocation2 + $0x28] sm:$0xff]   ;;  %166 = vst.msk [vmem:[#allocation2 + $0x20] sm:$0xf] %vm165_vm5, %v154_v49 }
  0xba   :  { %167 = vst.msk [vmem:[#allocation2 + $0x24] sm:$0xf] %vm165_vm5, %v156_v48  ;;  %1057 = vmatpush3.bf16.msra.mxu0 %v1145_v50  ;;  %1120 = vmatpush3.bf16.msra.mxu1 %v1145_v50 }
  0xbc   :  { %v379_v52 = vpop.permute.xlu0 %378 }
  0xbd   :  { %v381_v51 = vpop.permute.xlu1 %380  ;;  %391 = vst.msk [vmem:[#allocation2 + $0x60] sm:$0xf] %vm390_vm6, %v379_v52 }
  0xbe   :  { %392 = vst.msk [vmem:[#allocation2 + $0x64] sm:$0xf] %vm390_vm6, %v381_v51 }
  0xc0   :  { %v179_v54 = vpop.permute.xlu0 %178 }
  0xc1   :  { %v181_v53 = vpop.permute.xlu1 %180  ;;  %191 = vst.msk [vmem:[#allocation2 + $0x20] sm:$0xf] %vm190_vm7, %v179_v54 }
  0xc2   :  { %192 = vst.msk [vmem:[#allocation2 + $0x24] sm:$0xf] %vm190_vm7, %v181_v53 }
  0xc4   :  { %v308_v56 = vpop.permute.xlu0 %307 }
  0xc5   :  { %v310_v55 = vpop.permute.xlu1 %309  ;;  %v1146_v57 = vld [vmem:[#allocation2 + $0x60] sm:$0xff]   ;;  %318 = vst.msk [vmem:[#allocation2 + $0x58] sm:$0xf] %vm315_vm8, %v308_v56 }
  0xc6   :  { %319 = vst.msk [vmem:[#allocation2 + $0x5c] sm:$0xf] %vm315_vm8, %v310_v55  ;;  %1058 = vmatprep.subr.bf16.mxu0 %v1146_v57  ;;  %1113 = vmatprep.subr.bf16.mxu1 %v1146_v57 }
  0xc8   :  { %v108_v59 = vpop.permute.xlu0 %107 }
  0xc9   :  { %v110_v58 = vpop.permute.xlu1 %109  ;;  %v1147_v60 = vld [vmem:[#allocation2 + $0x20] sm:$0xff]   ;;  %118 = vst.msk [vmem:[#allocation2 + $0x18] sm:$0xf] %vm115_vm9, %v108_v59 }
  0xca   :  { %119 = vst.msk [vmem:[#allocation2 + $0x1c] sm:$0xf] %vm115_vm9, %v110_v58  ;;  %1059 = vmatpush3.bf16.msra.mxu0 %v1147_v60  ;;  %1121 = vmatpush3.bf16.msra.mxu1 %v1147_v60 }
  0xcc   :  { %v333_v62 = vpop.permute.xlu0 %332 }
  0xcd   :  { %v335_v61 = vpop.permute.xlu1 %334  ;;  %343 = vst.msk [vmem:[#allocation2 + $0x58] sm:$0xf] %vm340_vm10, %v333_v62 }
  0xce   :  { %344 = vst.msk [vmem:[#allocation2 + $0x5c] sm:$0xf] %vm340_vm10, %v335_v61 }
  0xd0   :  { %v133_v0 = vpop.permute.xlu0 %132 }
  0xd1   :  { %v135_v63 = vpop.permute.xlu1 %134  ;;  %143 = vst.msk [vmem:[#allocation2 + $0x18] sm:$0xf] %vm140_vm11, %v133_v0 }
  0xd2   :  { %144 = vst.msk [vmem:[#allocation2 + $0x1c] sm:$0xf] %vm140_vm11, %v135_v63 }
  0xd4   :  { %v304_v2 = vpop.permute.xlu0 %303 }
  0xd5   :  { %v306_v1 = vpop.permute.xlu1 %305  ;;  %v1148_v3 = vld [vmem:[#allocation2 + $0x58] sm:$0xff]   ;;  %316 = vst.msk [vmem:[#allocation2 + $0x50] sm:$0xf] %vm315_vm8, %v304_v2 }
  0xd6   :  { %317 = vst.msk [vmem:[#allocation2 + $0x54] sm:$0xf] %vm315_vm8, %v306_v1  ;;  %1060 = vmatprep.subr.bf16.mxu0 %v1148_v3  ;;  %1114 = vmatprep.subr.bf16.mxu1 %v1148_v3 }
  0xd8   :  { %v104_v5 = vpop.permute.xlu0 %103 }
  0xd9   :  { %v106_v4 = vpop.permute.xlu1 %105  ;;  %v1149_v6 = vld [vmem:[#allocation2 + $0x18] sm:$0xff]   ;;  %116 = vst.msk [vmem:[#allocation2 + $0x10] sm:$0xf] %vm115_vm9, %v104_v5 }
  0xda   :  { %117 = vst.msk [vmem:[#allocation2 + $0x14] sm:$0xf] %vm115_vm9, %v106_v4  ;;  %1061 = vmatpush3.bf16.msra.mxu0 %v1149_v6  ;;  %1122 = vmatpush3.bf16.msra.mxu1 %v1149_v6 }
  0xdc   :  { %v329_v8 = vpop.permute.xlu0 %328 }
  0xdd   :  { %v331_v7 = vpop.permute.xlu1 %330  ;;  %341 = vst.msk [vmem:[#allocation2 + $0x50] sm:$0xf] %vm340_vm10, %v329_v8 }
  0xde   :  { %342 = vst.msk [vmem:[#allocation2 + $0x54] sm:$0xf] %vm340_vm10, %v331_v7 }
  0xe0   :  { %v129_v10 = vpop.permute.xlu0 %128 }
  0xe1   :  { %v131_v9 = vpop.permute.xlu1 %130  ;;  %141 = vst.msk [vmem:[#allocation2 + $0x10] sm:$0xf] %vm140_vm11, %v129_v10 }
  0xe2   :  { %142 = vst.msk [vmem:[#allocation2 + $0x14] sm:$0xf] %vm140_vm11, %v131_v9 }
  0xe4   :  { %v258_v12 = vpop.permute.xlu0 %257 }
  0xe5   :  { %v260_v11 = vpop.permute.xlu1 %259  ;;  %v1150_v13 = vld [vmem:[#allocation2 + $0x50] sm:$0xff]   ;;  %268 = vst.msk [vmem:[#allocation2 + $0x48] sm:$0xf] %vm265_vm12, %v258_v12 }
  0xe6   :  { %269 = vst.msk [vmem:[#allocation2 + $0x4c] sm:$0xf] %vm265_vm12, %v260_v11  ;;  %1062 = vmatprep.subr.bf16.mxu0 %v1150_v13  ;;  %1115 = vmatprep.subr.bf16.mxu1 %v1150_v13 }
  0xe8   :  { %v283_v15 = vpop.permute.xlu0 %282 }
  0xe9   :  { %v285_v14 = vpop.permute.xlu1 %284  ;;  %v1151_v16 = vld [vmem:[#allocation2 + $0x10] sm:$0xff]   ;;  %293 = vst.msk [vmem:[#allocation2 + $0x48] sm:$0xf] %vm290_vm13, %v283_v15 }
  0xea   :  { %294 = vst.msk [vmem:[#allocation2 + $0x4c] sm:$0xf] %vm290_vm13, %v285_v14  ;;  %1063 = vmatpush3.bf16.msra.mxu0 %v1151_v16  ;;  %1123 = vmatpush3.bf16.msra.mxu1 %v1151_v16 }
  0xec   :  { %v254_v18 = vpop.permute.xlu0 %253 }
  0xed   :  { %v256_v17 = vpop.permute.xlu1 %255  ;;  %266 = vst.msk [vmem:[#allocation2 + $0x40] sm:$0xf] %vm265_vm12, %v254_v18 }
  0xee   :  { %267 = vst.msk [vmem:[#allocation2 + $0x44] sm:$0xf] %vm265_vm12, %v256_v17 }
  0xf0   :  { %v279_v21 = vpop.permute.xlu0 %278 }
  0xf1   :  { %v281_v20 = vpop.permute.xlu1 %280  ;;  %v1152_v22 = vld [vmem:[#allocation2 + $0x48] sm:$0xff]   ;;  %291 = vst.msk [vmem:[#allocation2 + $0x40] sm:$0xf] %vm290_vm13, %v279_v21 }
  0xf2   :  { %292 = vst.msk [vmem:[#allocation2 + $0x44] sm:$0xf] %vm290_vm13, %v281_v20  ;;  %1064 = vmatprep.subr.bf16.mxu0 %v1152_v22  ;;  %1116 = vmatprep.subr.bf16.mxu1 %v1152_v22 }
  0xf3   :  { %1065 = vmatpush3.bf16.msra.mxu0 %v1153_v19  ;;  %1124 = vmatpush3.bf16.msra.mxu1 %v1153_v19 }
  0xf4   :  { %v458_v24 = vpop.permute.xlu0 %457 }
  0xf5   :  { %v460_v23 = vpop.permute.xlu1 %459  ;;  %468 = vst.msk [vmem:[#allocation2 + $0x88] sm:$0xf] %vm465_vm14, %v458_v24 }
  0xf6   :  { %469 = vst.msk [vmem:[#allocation2 + $0x8c] sm:$0xf] %vm465_vm14, %v460_v23 }
  0xf8   :  { %v483_v27 = vpop.permute.xlu0 %482 }
  0xf9   :  { %v485_v26 = vpop.permute.xlu1 %484  ;;  %v1154_v28 = vld [vmem:[#allocation2 + $0x40] sm:$0xff]   ;;  %493 = vst.msk [vmem:[#allocation2 + $0x88] sm:$0xf] %vm490_vm15, %v483_v27 }
  0xfa   :  { %494 = vst.msk [vmem:[#allocation2 + $0x8c] sm:$0xf] %vm490_vm15, %v485_v26  ;;  %1066 = vmatprep.subr.bf16.mxu0 %v1154_v28  ;;  %1117 = vmatprep.subr.bf16.mxu1 %v1154_v28 }
  0xfb   :  { %1067 = vmatpush3.bf16.msra.mxu0 %v1155_v25  ;;  %1125 = vmatpush3.bf16.msra.mxu1 %v1155_v25 }
  0xfc   :  { %v454_v34 = vpop.permute.xlu0 %453 }
  0xfd   :  { %v456_v33 = vpop.permute.xlu1 %455  ;;  %466 = vst.msk [vmem:[#allocation2 + $0x80] sm:$0xf] %vm465_vm14, %v454_v34 }
  0xfe   :  { %467 = vst.msk [vmem:[#allocation2 + $0x84] sm:$0xf] %vm465_vm14, %v456_v33  ;;  %809 = vmatmul.mubr.bf16.vlgmr.msra.gmra.mxu0 %v1156_v29  ;;  %833 = vmatmul.mubr.bf16.vlgmr.msra.gmra.mxu1 %v1159_v30 }
  0xff   :  { %816 = vmatprep.mubr.bf16.mxu0 %v1163_v31  ;;  %1102 = vmatprep.mubr.msk.bf16.mxu1 %vm763_vm0, %v1169_v32 }
 0x100   :  { %v479_v36 = vpop.permute.xlu0 %478 }
 0x101   :  { %v481_v35 = vpop.permute.xlu1 %480  ;;  %v1162_v37 = vld [vmem:[#allocation2 + $0x88] sm:$0xff]   ;;  %491 = vst.msk [vmem:[#allocation2 + $0x80] sm:$0xf] %vm490_vm15, %v479_v36 }
 0x102   :  { %492 = vst.msk [vmem:[#allocation2 + $0x84] sm:$0xf] %vm490_vm15, %v481_v35  ;;  %1098 = vmatprep.subr.bf16.mxu1 %v1162_v37 }
 0x103   :  { %1099 = vmatpush3.bf16.msra.mxu1 %v1162_v37 }
 0x106   :  { %817 = vmatmul.mubr.bf16.gmra.mxu0 %v1165_v38 }
 0x107   :  { %824 = vmatprep.mubr.bf16.mxu0 %v1167_v39 }
 0x109   :  { %v1166_v40 = vld [vmem:[#allocation2 + $0x80] sm:$0xff]  }
 0x10a   :  { %1100 = vmatprep.subr.bf16.mxu1 %v1166_v40 }
 0x10b   :  { %1101 = vmatpush3.bf16.msra.mxu1 %v1166_v40 }
 0x10d   :  { %v558_v52 = vpop.permute.xlu0 %557 }
 0x10e   :  { %825 = vmatmul.mubr.bf16.gmra.mxu0 %v1170_v41  ;;  %1103 = vmatmul.mubr.msk.bf16.vlgmr.msra.gmra.mxu1 %vm763_vm0, %v1171_v42  ;;  %v563_v46 = vpop.permute.xlu1 %562 }
 0x10f   :  { %1106 = vmatprep.mubr.msk.bf16.mxu1 %vm763_vm0, %v1172_v43 }
 0x112   :  { %v568_v53 = vpop.permute.xlu1 %567  ;;  %v573_v59 = vpop.permute.xlu0 %572 }
 0x116   :  { %1107 = vmatmul.mubr.msk.bf16.gmra.mxu1 %vm763_vm0, %v1173_v44  ;;  %v578_v60 = vpop.permute.xlu1 %577  ;;  %v583_v10 = vpop.permute.xlu0 %582 }
 0x11a   :  { %v588_v11 = vpop.permute.xlu1 %587  ;;  %v593_v29 = vpop.permute.xlu0 %592 }
 0x1be   :  { %v1068_v45 = vpop.f32.mrf.mxu0  ;;  %v1086_v48 = vpop.f32.mrf.mxu1 }
 0x1c0   :  { %v1069_v47 = vpop.f32.mrf.mxu0  ;;  %v1087_v50 = vpop.f32.mrf.mxu1 }
 0x1c1   :  { %v1070_v62 = vadd.f32 %v1069_v47, %v1068_v45  ;;  %v1088_v9 = vadd.f32 %v1087_v50, %v1086_v48 }
 0x1c2   :  { %v1071_v49 = vpop.f32.mrf.mxu0  ;;  %v1089_v55 = vpop.f32.mrf.mxu1 }
 0x1c3   :  { %v811_v7 = vadd.f32 %v1070_v62, %v558_v52  ;;  %v835_v22 = vadd.f32 %v1088_v9, %v588_v11 }
 0x1c4   :  { %v1072_v51 = vpop.f32.mrf.mxu0  ;;  %v1090_v63 = vpop.f32.mrf.mxu1 }
 0x1c5   :  { %v1073_v5 = vadd.f32 %v1072_v51, %v1071_v49  ;;  %v1091_v24 = vadd.f32 %v1090_v63, %v1089_v55 }
 0x1c6   :  { %v1074_v54 = vpop.f32.mrf.mxu0 }
 0x1c7   :  { %v814_v20 = vadd.f32 %v1073_v5, %v563_v46  ;;  %v838_v38 = vadd.f32 %v1091_v24, %v593_v29 }
 0x1c8   :  { %v1075_v56 = vpop.f32.mrf.mxu0 }
 0x1c9   :  { %v1076_v57 = vadd.f32 %v1075_v56, %v1074_v54 }
 0x1ca   :  { %v1077_v58 = vpop.f32.mrf.mxu0 }
 0x1cb   :  { %v819_v61 = vadd.f32 %v1076_v57, %v568_v53 }
 0x1cc   :  { %v1078_v0 = vpop.f32.mrf.mxu0 }
 0x1cd   :  { %v1079_v1 = vadd.f32 %v1078_v0, %v1077_v58 }
 0x1ce   :  { %v1080_v2 = vpop.f32.mrf.mxu0  ;;  %v1104_v3 = vpop.f32.mrf.mxu1 }
 0x1cf   :  { %v884_v4 = vadd.f32 %v1104_v3, %v819_v61  ;;  %v822_v12 = vadd.f32 %v1079_v1, %v573_v59 }
 0x1d0   :  { %v1081_v6 = vpop.f32.mrf.mxu0  ;;  %v875_v8 = vpop.f32.mrf.mxu1 }
 0x1d1   :  { %v916_v13 = vmul.f32 0.05, %v884_v4  ;;  %v876_v14 = vadd.f32 %v875_v8, %v811_v7  ;;  %vm908_vm1 = vcmp.ge.f32.partialorder %v884_v4, 0.0  ;;  %v1082_v17 = vadd.f32 %v1081_v6, %v1080_v2 }
 0x1d2   :  { %v1083_v15 = vpop.f32.mrf.mxu0  ;;  %v1105_v16 = vpop.f32.mrf.mxu1 }
 0x1d3   :  { %v887_v18 = vadd.f32 %v1105_v16, %v822_v12  ;;  %v924_v25 = vsel %vm908_vm1, %v884_v4, %v916_v13  ;;  %v914_v26 = vmul.f32 0.05, %v876_v14  ;;  %vm906_vm3 = vcmp.ge.f32.partialorder %v876_v14, 0.0 }
 0x1d4   :  { %v1084_v19 = vpop.f32.mrf.mxu0  ;;  %v878_v21 = vpop.f32.mrf.mxu1  ;;  %v827_v32 = vadd.f32 %v1082_v17, %v578_v60 }
 0x1d5   :  { %vm909_vm2 = vcmp.ge.f32.partialorder %v887_v18, 0.0  ;;  %v917_v23 = vmul.f32 0.05, %v887_v18  ;;  %v879_v27 = vadd.f32 %v878_v21, %v814_v20  ;;  %v1085_v31 = vadd.f32 %v1084_v19, %v1083_v15 }
 0x1d6   :  { %v1108_v28 = vpop.f32.mrf.mxu1  ;;  %v922_v39 = vsel %vm906_vm3, %v876_v14, %v914_v26 }
 0x1d7   :  { %v925_v30 = vsel %vm909_vm2, %v887_v18, %v917_v23  ;;  %vm907_vm4 = vcmp.ge.f32.partialorder %v879_v27, 0.0  ;;  %v915_v34 = vmul.f32 0.05, %v879_v27  ;;  %v900_v35 = vadd.f32 %v1108_v28, %v835_v22 }
 0x1d8   :  { %v1037_v33 = vpack.c.bf16 %v925_v30, %v924_v25  ;;  %v891_v36 = vpop.f32.mrf.mxu1  ;;  %v830_v43 = vadd.f32 %v1085_v31, %v583_v10 }
 0x1d9   :  { %v892_v37 = vadd.f32 %v891_v36, %v827_v32  ;;  %v923_v40 = vsel %vm907_vm4, %v879_v27, %v915_v34  ;;  %v920_v44 = vmul.f32 0.05, %v900_v35  ;;  %vm912_vm5 = vcmp.ge.f32.partialorder %v900_v35, 0.0 }
 0x1da   :  { %1049 = vst [vmem:[%s1452_s4 + $0x8] sm:$0xff] %v1037_v33   ;;  %v1109_v41 = vpop.f32.mrf.mxu1  ;;  %v1032_v42 = vpack.c.bf16 %v923_v40, %v922_v39 }
 0x1db   :  { %v903_v45 = vadd.f32 %v1109_v41, %v838_v38  ;;  %v918_v47 = vmul.f32 0.05, %v892_v37  ;;  %vm910_vm6 = vcmp.ge.f32.partialorder %v892_v37, 0.0  ;;  %v928_v51 = vsel %vm912_vm5, %v900_v35, %v920_v44 }
 0x1dc   :  { %v894_v46 = vpop.f32.mrf.mxu1  ;;  %1033 = vst [vmem:[%s1452_s4] sm:$0xff] %v1032_v42  }
 0x1dd   :  { %v895_v48 = vadd.f32 %v894_v46, %v830_v43  ;;  %vm913_vm7 = vcmp.ge.f32.partialorder %v903_v45, 0.0  ;;  %v921_v49 = vmul.f32 0.05, %v903_v45  ;;  %v926_v53 = vsel %vm910_vm6, %v892_v37, %v918_v47 }
 0x1df   :  { %vm911_vm8 = vcmp.ge.f32.partialorder %v895_v48, 0.0  ;;  %v919_v50 = vmul.f32 0.05, %v895_v48  ;;  %v929_v52 = vsel %vm913_vm7, %v903_v45, %v921_v49 }
 0x1e0   :  { %v1047_v54 = vpack.c.bf16 %v929_v52, %v928_v51 }
 0x1e1   :  { %v927_v55 = vsel %vm911_vm8, %v895_v48, %v919_v50 }
 0x1e2   :  { %v1042_v56 = vpack.c.bf16 %v927_v55, %v926_v53  ;;  %1051 = vst [vmem:[%s1452_s4 + $0x18] sm:$0xff] %v1047_v54  }
 0x1e4   :  { %1050 = vst [vmem:[%s1452_s4 + $0x10] sm:$0xff] %v1042_v56  }
 0x1e5   :  { %974 = vsyncpa [#allocation5], 1 }

// kernel: forward.8
= control target key start
LH: loop header
LB: loop body
LE: loop exit
PB: predicated region body
PF: predicated region fallthrough
CT: control target
= control target key end

     0   :  { %s984_s15 = smov 0   ;;  %s986_s16 = smov 0   ;;  %s1124_s0 = inlined_call_operand.vmem [shape: bf16[16,384], index: 0, kind: input, shape index: {}]   ;;  %s1125_s1 = inlined_call_operand.vmem [shape: bf16[2,16,128], index: 1, kind: input, shape index: {}]   ;;  %s1126_s2 = inlined_call_operand.vmem [shape: bf16[32,144], index: 2, kind: input, shape index: {}]   ;;  %s1127_s3 = inlined_call_operand.vmem [shape: f32[32,1], index: 3, kind: input, shape index: {}]   ;;  %s1128_s4 = inlined_call_operand.vmem [shape: bf16[32,256], index: 4, kind: output, shape index: {}]  }
   0x1   :  { %s988_s17 = smov 0  }
   0x2 LB: > { %s997_s18 = sadd.s32 4294967295, %s948_s17   ;;  %s999_s19 = sadd.s32 1, %s948_s17   ;;  %s948_s17 = sphi %s988_s17, %s1132_s17   ;;  %s944_s16 = sphi %s986_s16, %s1131_s16   ;;  %s940_s15 = sphi %s984_s15, %s1130_s15  }
   0x3   : > { %s18_s20 = ssub.s32 %s948_s17, %s999_s19  ;;  %s21_s21 = sadd.s32 1, %s944_s16 }
   0x4   : > { %p19_p0 = scmp.eq.s32.totalorder %s18_s20, 0  ;;  %p28_p1 = scmp.ne.s32.totalorder %s944_s16, %s940_s15 }
   0x5   : > { %p29_p2 = scmp.eq.s32.totalorder %s948_s17, 0  ;;  %p126_p3 = scmp.eq.s32.totalorder %s997_s18, 1 }
   0x6   : > { %s1007_s22 = scalar_select %p19_p0, %s944_s16, %s21_s21  }
   0x7   : > { %p30_p4 = por %p29_p2, %p28_p1  ;;  %p1009_p5 = por %p126_p3, %p28_p1 }
   0x8   : > { %p811_p6 = scmp.ge.s32.totalorder %s948_s17, 2 }
   0xa   : > { %154 = sbr.rel (%p811_p6) target bundleno = 20 (0x14), region = 24 }
   0xf   : > { %157 = sbr.rel (!%p30_p4) target bundleno = 20 (0x14), region = 28  ;;  %s159_s24 = sand.u32 (%p30_p4), 1, %s944_s16  }
  0x10   : > { %s813_s25 = sshll.u32 (%p30_p4), %s948_s17, 2  ;;  %s812_s26 = sshll.u32 (%p30_p4), %s159_s24, 3 }
  0x11   : > { %s163_s29 = scalar_lea.vmem (%p30_p4), %s1124_s0, %s813_s25  ;;  %s161_s30 = scalar_lea.vmem (%p30_p4), [#allocation3], %s812_s26 }
  0x12   : > { %v180_v0 = vld [vmem:[%s163_s29] sm:$0xf] (%p30_p4)  ;;  %v182_v1 = vld [vmem:[%s163_s29 + $0xc] sm:$0xf] (%p30_p4) }
  0x13   : > { %181 = vst [vmem:[%s161_s30] sm:$0xf] (%p30_p4), %v180_v0  ;;  %183 = vst [vmem:[%s161_s30 + $0x4] sm:$0xf] (%p30_p4), %v182_v1 }
  0x14 PF: > { %p814_p7 = scmp.ge.s32.totalorder %s948_s17, 1  ;;  %p218_p8 = scmp.lt.s32.totalorder %s948_s17, 3 }
  0x16   : > { %p219_p9 = pnand %p814_p7, %p218_p8 }
  0x17   : > { %s225_s5 = sand.u32 (!%p219_p9), 1, %s940_s15   ;;  %p254_p10 = scmp.lt.s32.totalorder (!%p219_p9), %s997_s18, 1 }
  0x18   : > { %222 = sbr.rel (%p219_p9) target bundleno = 434 (0x1b2), region = 73  ;;  %s815_s6 = sshll.u32 (!%p219_p9), %s225_s5, 3 }
  0x19   : > { %s1021_s7 = scalar_lea.vmem (!%p219_p9), [#allocation3], %s815_s6  ;;  %s950_s9 = smov (!%p219_p9), 107  }
  0x1a   : > { %s952_s14 = smov (!%p219_p9), 108   ;;  %s953_s17 = smov (!%p219_p9), 116  }
  0x1b   : > { %s954_s20 = smov (!%p219_p9), 117   ;;  %s955_s21 = smov (!%p219_p9), 118  }
  0x1c   : > { %s956_s24 = smov (!%p219_p9), 126   ;;  %s957_s25 = smov (!%p219_p9), 127  }
  0x1d   : > { %v420_v2 = vld [vmem:[%s1021_s7] sm:$0xf]  ;;  %s255_s8 = scalar_select %p254_p10, %s997_s18, 1  ;;  %v421_v3 = vld [vmem:[%s1021_s7 + $0x4] sm:$0xf]  ;;  %v951_v5 = vmov 0  }
  0x1e   : > { %424 = vrot.lane.b32.xlu0 %v420_v2, %s950_s9  ;;  %597 = vmatprep.subr.bf16.mxu0 %v951_v5  ;;  %v394_v7 = vld [vmem:[%s1021_s7] sm:$0xf]  ;;  %v395_v8 = vld [vmem:[%s1021_s7 + $0x4] sm:$0xf]  ;;  %s958_s26 = smov 106   ;;  %vm590_vm0 = vcmask 130048  }
  0x1f   : > { %s842_s10 = sshll.u32 %s255_s8, 3  ;;  %858 = vmatprep.subr.bf16.mxu1 %v951_v5  ;;  %910 = vset.pattern.permute.xlu1 %v951_v5  ;;  %v368_v11 = vld [vmem:[%s1021_s7] sm:$0xf]  ;;  %v369_v12 = vld [vmem:[%s1021_s7 + $0x4] sm:$0xf]  ;;  %v494_v38 = vld [vmem:[%s1127_s3] sm:$0xff] }
  0x20   : > { %s1029_s13 = scalar_lea.vmem %s1125_s1, %s842_s10  ;;  %909 = vset.pattern.permute.xlu0 %v951_v5  ;;  %v342_v15 = vld [vmem:[%s1021_s7] sm:$0xf]  ;;  %v343_v16 = vld [vmem:[%s1021_s7 + $0x4] sm:$0xf]  ;;  %v497_v40 = vld [vmem:[%s1127_s3 + $0x18] sm:$0xff]  ;;  %vm430_vm1 = vcmask 871424  }
  0x21   : > { %v433_v4 = vld [vmem:[%s1029_s13] sm:$0xf]  ;;  %v434_v6 = vld [vmem:[%s1029_s13 + $0x4] sm:$0xf]  ;;  %v316_v19 = vld [vmem:[%s1021_s7] sm:$0xf] }
  0x22   : > { %437 = vrot.lane.b32.xlu1 %v433_v4, %s950_s9  ;;  %426 = vrot.lane.b32.xlu0 %v421_v3, %s950_s9  ;;  %v407_v9 = vld [vmem:[%s1029_s13] sm:$0xf]  ;;  %v408_v10 = vld [vmem:[%s1029_s13 + $0x4] sm:$0xf]  ;;  %vm443_vm2 = vcmask 1044312   ;;  %vm404_vm3 = vcmask 879616  }
  0x23   : > { %v381_v13 = vld [vmem:[%s1029_s13] sm:$0xf]  ;;  %v382_v14 = vld [vmem:[%s1029_s13 + $0x4] sm:$0xf]  ;;  %v317_v20 = vld [vmem:[%s1021_s7 + $0x4] sm:$0xf] }
  0x24   : > { %v355_v17 = vld [vmem:[%s1029_s13] sm:$0xf]  ;;  %v356_v18 = vld [vmem:[%s1029_s13 + $0x4] sm:$0xf]  ;;  %v290_v23 = vld [vmem:[%s1021_s7] sm:$0xf] }
  0x25   : > { %v329_v21 = vld [vmem:[%s1029_s13] sm:$0xf]  ;;  %v330_v22 = vld [vmem:[%s1029_s13 + $0x4] sm:$0xf]  ;;  %v291_v24 = vld [vmem:[%s1021_s7 + $0x4] sm:$0xf] }
  0x26   : > { %439 = vrot.lane.b32.xlu1 %v434_v6, %s950_s9  ;;  %398 = vrot.lane.b32.xlu0 %v394_v7, %s952_s14  ;;  %v303_v25 = vld [vmem:[%s1029_s13] sm:$0xf]  ;;  %v304_v26 = vld [vmem:[%s1029_s13 + $0x4] sm:$0xf]  ;;  %vm417_vm4 = vcmask 1044320   ;;  %vm378_vm5 = vcmask 945152  }
  0x27   : > { %v264_v27 = vld [vmem:[%s1021_s7] sm:$0xf]  ;;  %v265_v29 = vld [vmem:[%s1021_s7 + $0x4] sm:$0xf]  ;;  %v277_v30 = vld [vmem:[%s1029_s13] sm:$0xf] }
  0x28   : > { %v260_v28 = vld [vmem:[%s1021_s7] sm:$0xff]   ;;  %v278_v31 = vld [vmem:[%s1029_s13 + $0x4] sm:$0xf]  ;;  %v459_v34 = vld [vmem:[%s1029_s13] sm:$0xf]  ;;  %vm391_vm6 = vcmask 1044384  }
  0x29   : > { %262 = vst [vmem:[#allocation2] sm:$0xff] %v260_v28   ;;  %v446_v32 = vld [vmem:[%s1021_s7] sm:$0xf]  ;;  %v447_v33 = vld [vmem:[%s1021_s7 + $0x4] sm:$0xf]  ;;  %vm352_vm7 = vcmask 953344  }
  0x2a   : > { %400 = vrot.lane.b32.xlu1 %v395_v8, %s952_s14  ;;  %411 = vrot.lane.b32.xlu0 %v407_v9, %s952_s14  ;;  %v922_v35 = vld [vmem:[%s1126_s2 + $0x4] ss:$8 sps:$4 sm:$0xff]   ;;  %v925_v37 = vld [vmem:[%s1126_s2 + $0x14] ss:$8 sps:$4 sm:$0xff]   ;;  %vm365_vm8 = vcmask 1044392   ;;  %vm326_vm9 = vcmask 961536  }
  0x2b   : > { %v460_v36 = vld [vmem:[%s1029_s13 + $0x4] sm:$0xf]  ;;  %832 = vmatprep.mubr.msk.bf16.mxu0 %vm590_vm0, %v922_v35  ;;  %833 = vmatprep.mubr.msk.bf16.mxu1 %vm590_vm0, %v925_v37  ;;  %v495_v39 = vld [vmem:[%s1127_s3 + $0x8] sm:$0xff]  ;;  %v496_v41 = vld [vmem:[%s1127_s3 + $0x10] sm:$0xff]  ;;  %vm339_vm10 = vcmask 1044400   ;;  %vm300_vm11 = vcmask 1027072  }
  0x2c   : > { %vm313_vm12 = vcmask 1044464   ;;  %vm274_vm13 = vcmask 1035264   ;;  %vm287_vm14 = vcmask 1044472   ;;  %vm456_vm15 = vcmask 863232   ;;  %s839_s15 = sshll.u32 (%p1009_p5), %s997_s18, 2 }
  0x2d   : > { %vm469_vm0 = vcmask 1044304   ;;  %s686_s27 = scalar_lea.vmem (%p1009_p5), %s1128_s4, %s839_s15 }
  0x2e   : > { %413 = vrot.lane.b32.xlu1 %v408_v10, %s952_s14  ;;  %372 = vrot.lane.b32.xlu0 %v368_v11, %s953_s17 }
  0x32   : > { %374 = vrot.lane.b32.xlu1 %v369_v12, %s953_s17  ;;  %385 = vrot.lane.b32.xlu0 %v381_v13, %s953_s17 }
  0x36   : > { %387 = vrot.lane.b32.xlu1 %v382_v14, %s953_s17  ;;  %346 = vrot.lane.b32.xlu0 %v342_v15, %s954_s20 }
  0x3a   : > { %348 = vrot.lane.b32.xlu1 %v343_v16, %s954_s20  ;;  %359 = vrot.lane.b32.xlu0 %v355_v17, %s954_s20 }
  0x3e   : > { %361 = vrot.lane.b32.xlu1 %v356_v18, %s954_s20  ;;  %320 = vrot.lane.b32.xlu0 %v316_v19, %s955_s21  ;;  %v918_v18 = vld [vmem:[#allocation2] sm:$0xff]  }
  0x42   : > { %322 = vrot.lane.b32.xlu1 %v317_v20, %s955_s21  ;;  %333 = vrot.lane.b32.xlu0 %v329_v21, %s955_s21  ;;  %v920_v20 = vld [vmem:[%s1126_s2] ss:$8 sps:$4 sm:$0xff]   ;;  %v923_v21 = vld [vmem:[%s1126_s2 + $0x10] ss:$8 sps:$4 sm:$0xff]  }
  0x46   : > { %335 = vrot.lane.b32.xlu1 %v330_v22, %s955_s21  ;;  %294 = vrot.lane.b32.xlu0 %v290_v23, %s956_s24 }
  0x4a   : > { %296 = vrot.lane.b32.xlu1 %v291_v24, %s956_s24  ;;  %307 = vrot.lane.b32.xlu0 %v303_v25, %s956_s24 }
  0x4e   : > { %309 = vrot.lane.b32.xlu1 %v304_v26, %s956_s24  ;;  %268 = vrot.lane.b32.xlu0 %v264_v27, %s957_s25  ;;  %s816_s24 = sshll.u32 %s225_s5, 4 }
  0x52   : > { %270 = vrot.lane.b32.xlu1 %v265_v29, %s957_s25  ;;  %281 = vrot.lane.b32.xlu0 %v277_v30, %s957_s25 }
  0x56   : > { %283 = vrot.lane.b32.xlu1 %v278_v31, %s957_s25  ;;  %450 = vrot.lane.b32.xlu0 %v446_v32, %s958_s26  ;;  %s253_s25 = scalar_lea.vmem [#allocation4], %s816_s24 }
  0x5a   : > { %452 = vrot.lane.b32.xlu1 %v447_v33, %s958_s26  ;;  %463 = vrot.lane.b32.xlu0 %v459_v34, %s958_s26 }
  0x5e   : > { %465 = vrot.lane.b32.xlu1 %v460_v36, %s958_s26  ;;  %500 = vperm.xlu0 %909, %v494_v38  }
  0x62   : > { %505 = vperm.xlu1 %910, %v495_v39   ;;  %515 = vperm.xlu0 %909, %v497_v40  }
  0x66   : > { %510 = vperm.xlu1 %910, %v496_v41  }
  0x90   : > { %v425_v42 = vpop.permute.xlu0 %424 }
  0x91   : > { %431 = vst.msk [vmem:[#allocation2 + $0x38] sm:$0xf] %vm430_vm1, %v425_v42 }
  0x94   : > { %v438_v43 = vpop.permute.xlu1 %437  ;;  %v427_v44 = vpop.permute.xlu0 %426 }
  0x95   : > { %444 = vst.msk [vmem:[#allocation2 + $0x38] sm:$0xf] %vm443_vm2, %v438_v43 }
  0x96   : > { %432 = vst.msk [vmem:[#allocation2 + $0x3c] sm:$0xf] %vm430_vm1, %v427_v44 }
  0x98   : > { %v440_v45 = vpop.permute.xlu1 %439  ;;  %v399_v46 = vpop.permute.xlu0 %398 }
  0x99   : > { %445 = vst.msk [vmem:[#allocation2 + $0x3c] sm:$0xf] %vm443_vm2, %v440_v45 }
  0x9a   : > { %405 = vst.msk [vmem:[#allocation2 + $0x30] sm:$0xf] %vm404_vm3, %v399_v46 }
  0x9c   : > { %v401_v47 = vpop.permute.xlu1 %400  ;;  %v412_v48 = vpop.permute.xlu0 %411 }
  0x9d   : > { %406 = vst.msk [vmem:[#allocation2 + $0x34] sm:$0xf] %vm404_vm3, %v401_v47 }
  0x9e   : > { %418 = vst.msk [vmem:[#allocation2 + $0x30] sm:$0xf] %vm417_vm4, %v412_v48 }
  0xa0   : > { %v414_v49 = vpop.permute.xlu1 %413  ;;  %v911_v50 = vld [vmem:[#allocation2 + $0x38] sm:$0xff]   ;;  %v373_v51 = vpop.permute.xlu0 %372 }
  0xa1   : > { %419 = vst.msk [vmem:[#allocation2 + $0x34] sm:$0xf] %vm417_vm4, %v414_v49  ;;  %598 = vmatpush1.bf16.msra.mxu0 %v911_v50  ;;  %867 = vmatpush1.bf16.msra.mxu1 %v911_v50 }
  0xa2   : > { %379 = vst.msk [vmem:[#allocation2 + $0x28] sm:$0xf] %vm378_vm5, %v373_v51  ;;  %599 = vmatprep.subr.bf16.mxu0 %v951_v5  ;;  %859 = vmatprep.subr.bf16.mxu1 %v951_v5 }
  0xa4   : > { %v375_v52 = vpop.permute.xlu1 %374  ;;  %v386_v53 = vpop.permute.xlu0 %385 }
  0xa5   : > { %380 = vst.msk [vmem:[#allocation2 + $0x2c] sm:$0xf] %vm378_vm5, %v375_v52 }
  0xa6   : > { %392 = vst.msk [vmem:[#allocation2 + $0x28] sm:$0xf] %vm391_vm6, %v386_v53 }
  0xa8   : > { %v388_v54 = vpop.permute.xlu1 %387  ;;  %v912_v55 = vld [vmem:[#allocation2 + $0x30] sm:$0xff]   ;;  %v347_v56 = vpop.permute.xlu0 %346 }
  0xa9   : > { %393 = vst.msk [vmem:[#allocation2 + $0x2c] sm:$0xf] %vm391_vm6, %v388_v54  ;;  %600 = vmatpush1.bf16.msra.mxu0 %v912_v55  ;;  %868 = vmatpush1.bf16.msra.mxu1 %v912_v55 }
  0xaa   : > { %353 = vst.msk [vmem:[#allocation2 + $0x20] sm:$0xf] %vm352_vm7, %v347_v56  ;;  %601 = vmatprep.subr.bf16.mxu0 %v951_v5  ;;  %860 = vmatprep.subr.bf16.mxu1 %v951_v5 }
  0xac   : > { %v349_v57 = vpop.permute.xlu1 %348  ;;  %v360_v58 = vpop.permute.xlu0 %359 }
  0xad   : > { %354 = vst.msk [vmem:[#allocation2 + $0x24] sm:$0xf] %vm352_vm7, %v349_v57 }
  0xae   : > { %366 = vst.msk [vmem:[#allocation2 + $0x20] sm:$0xf] %vm365_vm8, %v360_v58 }
  0xb0   : > { %v362_v59 = vpop.permute.xlu1 %361  ;;  %v913_v60 = vld [vmem:[#allocation2 + $0x28] sm:$0xff]   ;;  %v321_v61 = vpop.permute.xlu0 %320 }
  0xb1   : > { %367 = vst.msk [vmem:[#allocation2 + $0x24] sm:$0xf] %vm365_vm8, %v362_v59  ;;  %602 = vmatpush1.bf16.msra.mxu0 %v913_v60  ;;  %869 = vmatpush1.bf16.msra.mxu1 %v913_v60 }
  0xb2   : > { %327 = vst.msk [vmem:[#allocation2 + $0x18] sm:$0xf] %vm326_vm9, %v321_v61  ;;  %603 = vmatprep.subr.bf16.mxu0 %v951_v5  ;;  %861 = vmatprep.subr.bf16.mxu1 %v951_v5 }
  0xb4   : > { %v323_v62 = vpop.permute.xlu1 %322  ;;  %v334_v63 = vpop.permute.xlu0 %333 }
  0xb5   : > { %328 = vst.msk [vmem:[#allocation2 + $0x1c] sm:$0xf] %vm326_vm9, %v323_v62 }
  0xb6   : > { %340 = vst.msk [vmem:[#allocation2 + $0x18] sm:$0xf] %vm339_vm10, %v334_v63 }
  0xb8   : > { %v336_v0 = vpop.permute.xlu1 %335  ;;  %v914_v1 = vld [vmem:[#allocation2 + $0x20] sm:$0xff]   ;;  %v295_v2 = vpop.permute.xlu0 %294 }
  0xb9   : > { %341 = vst.msk [vmem:[#allocation2 + $0x1c] sm:$0xf] %vm339_vm10, %v336_v0  ;;  %604 = vmatpush1.bf16.msra.mxu0 %v914_v1  ;;  %870 = vmatpush1.bf16.msra.mxu1 %v914_v1 }
  0xba   : > { %301 = vst.msk [vmem:[#allocation2 + $0x10] sm:$0xf] %vm300_vm11, %v295_v2  ;;  %605 = vmatprep.subr.bf16.mxu0 %v951_v5  ;;  %862 = vmatprep.subr.bf16.mxu1 %v951_v5 }
  0xbc   : > { %v297_v3 = vpop.permute.xlu1 %296  ;;  %v308_v4 = vpop.permute.xlu0 %307 }
  0xbd   : > { %302 = vst.msk [vmem:[#allocation2 + $0x14] sm:$0xf] %vm300_vm11, %v297_v3 }
  0xbe   : > { %314 = vst.msk [vmem:[#allocation2 + $0x10] sm:$0xf] %vm313_vm12, %v308_v4 }
  0xc0   : > { %v310_v6 = vpop.permute.xlu1 %309  ;;  %v915_v7 = vld [vmem:[#allocation2 + $0x18] sm:$0xff]   ;;  %v269_v8 = vpop.permute.xlu0 %268 }
  0xc1   : > { %315 = vst.msk [vmem:[#allocation2 + $0x14] sm:$0xf] %vm313_vm12, %v310_v6  ;;  %606 = vmatpush1.bf16.msra.mxu0 %v915_v7  ;;  %871 = vmatpush1.bf16.msra.mxu1 %v915_v7 }
  0xc2   : > { %275 = vst.msk [vmem:[#allocation2 + $0x8] sm:$0xf] %vm274_vm13, %v269_v8  ;;  %607 = vmatprep.subr.bf16.mxu0 %v951_v5  ;;  %863 = vmatprep.subr.bf16.mxu1 %v951_v5 }
  0xc4   : > { %v271_v9 = vpop.permute.xlu1 %270  ;;  %v282_v10 = vpop.permute.xlu0 %281 }
  0xc5   : > { %276 = vst.msk [vmem:[#allocation2 + $0xc] sm:$0xf] %vm274_vm13, %v271_v9 }
  0xc6   : > { %288 = vst.msk [vmem:[#allocation2 + $0x8] sm:$0xf] %vm287_vm14, %v282_v10 }
  0xc8   : > { %v284_v11 = vpop.permute.xlu1 %283  ;;  %v916_v12 = vld [vmem:[#allocation2 + $0x10] sm:$0xff]   ;;  %v451_v13 = vpop.permute.xlu0 %450 }
  0xc9   : > { %289 = vst.msk [vmem:[#allocation2 + $0xc] sm:$0xf] %vm287_vm14, %v284_v11  ;;  %608 = vmatpush1.bf16.msra.mxu0 %v916_v12  ;;  %872 = vmatpush1.bf16.msra.mxu1 %v916_v12 }
  0xca   : > { %457 = vst.msk [vmem:[#allocation2 + $0x40] sm:$0xf] %vm456_vm15, %v451_v13  ;;  %609 = vmatprep.subr.bf16.mxu0 %v951_v5  ;;  %864 = vmatprep.subr.bf16.mxu1 %v951_v5 }
  0xcc   : > { %v453_v14 = vpop.permute.xlu1 %452  ;;  %v464_v15 = vpop.permute.xlu0 %463 }
  0xcd   : > { %458 = vst.msk [vmem:[#allocation2 + $0x44] sm:$0xf] %vm456_vm15, %v453_v14 }
  0xce   : > { %470 = vst.msk [vmem:[#allocation2 + $0x40] sm:$0xf] %vm469_vm0, %v464_v15 }
  0xd0   : > { %v466_v16 = vpop.permute.xlu1 %465  ;;  %v917_v17 = vld [vmem:[#allocation2 + $0x8] sm:$0xff]  }
  0xd1   : > { %471 = vst.msk [vmem:[#allocation2 + $0x44] sm:$0xf] %vm469_vm0, %v466_v16  ;;  %610 = vmatpush1.bf16.msra.mxu0 %v917_v17  ;;  %873 = vmatpush1.bf16.msra.mxu1 %v917_v17 }
  0xd2   : > { %611 = vmatprep.subr.bf16.mxu0 %v951_v5  ;;  %865 = vmatprep.subr.bf16.mxu1 %v951_v5 }
  0xd5   : > { %612 = vmatpush1.bf16.msra.mxu0 %v918_v18  ;;  %874 = vmatpush1.bf16.msra.mxu1 %v918_v18 }
  0xd6   : > { %627 = vmatprep.subr.bf16.mxu0 %v951_v5  ;;  %866 = vmatprep.subr.bf16.mxu1 %v951_v5 }
  0xd8   : > { %v919_v19 = vld [vmem:[#allocation2 + $0x40] sm:$0xff]  }
  0xd9   : > { %628 = vmatpush2.bf16.msra.mxu0 %v919_v19  ;;  %875 = vmatpush2.bf16.msra.mxu1 %v919_v19  ;;  %v501_v23 = vpop.permute.xlu0 %500 }
  0xdc   : > { %630 = vmatmul.mubr.bf16.vlgmr.msra.gmra.mxu0 %v920_v20  ;;  %638 = vmatmul.mubr.bf16.vlgmr.msra.gmra.mxu1 %v923_v21 }
  0xdd   : > { %v506_v22 = vpop.permute.xlu1 %505  ;;  %v516_v30 = vpop.permute.xlu0 %515 }
  0xe1   : > { %v511_v24 = vpop.permute.xlu1 %510 }
 0x19c   : > { %v631_v25 = vpop.f32.mrf.mxu0  ;;  %v639_v26 = vpop.f32.mrf.mxu1 }
 0x19d   : > { %v632_v5 = vadd.f32 %v631_v25, %v501_v23  ;;  %v640_v27 = vadd.f32 %v639_v26, %v511_v24 }
 0x19e   : > { %v633_v28 = vpop.f32.mrf.mxu0  ;;  %v641_v29 = vpop.f32.mrf.mxu1 }
 0x19f   : > { %v650_v33 = vmul.f32 0.05, %v632_v5  ;;  %v652_v34 = vmul.f32 0.05, %v640_v27  ;;  %vm646_vm1 = vcmp.ge.f32.partialorder %v632_v5, 0.0  ;;  %vm648_vm2 = vcmp.ge.f32.partialorder %v640_v27, 0.0 }
 0x1a0   : > { %v634_v31 = vpop.f32.mrf.mxu0  ;;  %v642_v32 = vpop.f32.mrf.mxu1 }
 0x1a1   : > { %v635_v35 = vadd.f32 %v634_v31, %v506_v22  ;;  %v643_v36 = vadd.f32 %v642_v32, %v516_v30  ;;  %v654_v41 = vsel %vm646_vm1, %v632_v5, %v650_v33  ;;  %v656_v42 = vsel %vm648_vm2, %v640_v27, %v652_v34 }
 0x1a2   : > { %v636_v37 = vpop.f32.mrf.mxu0  ;;  %v644_v38 = vpop.f32.mrf.mxu1 }
 0x1a3   : > { %vm647_vm3 = vcmp.ge.f32.partialorder %v635_v35, 0.0  ;;  %v651_v39 = vmul.f32 0.05, %v635_v35  ;;  %vm649_vm4 = vcmp.ge.f32.partialorder %v643_v36, 0.0  ;;  %v653_v40 = vmul.f32 0.05, %v643_v36 }
 0x1a4   : > { %684 = sbr.rel (!%p1009_p5) target bundleno = 434 (0x1b2), region = 81 }
 0x1a5   : > { %v655_v43 = vsel %vm647_vm3, %v635_v35, %v651_v39  ;;  %v657_v44 = vsel %vm649_vm4, %v643_v36, %v653_v40 }
 0x1a6   : > { %v850_v45 = vpack.c.bf16 %v655_v43, %v654_v41  ;;  %v855_v46 = vpack.c.bf16 %v657_v44, %v656_v42 }
 0x1a8   : > { %851 = vst [vmem:[%s253_s25] sm:$0xff] %v850_v45   ;;  %857 = vst [vmem:[%s253_s25 + $0x8] sm:$0xff] %v855_v46  }
 0x1af   : > { %v703_v47 = vld [vmem:[%s253_s25] sm:$0xf]  ;;  %v705_v48 = vld [vmem:[%s253_s25 + $0x4] sm:$0xf]  ;;  %v707_v49 = vld [vmem:[%s253_s25 + $0x8] sm:$0xf] }
 0x1b0   : > { %v709_v50 = vld [vmem:[%s253_s25 + $0xc] sm:$0xf]  ;;  %704 = vst [vmem:[%s686_s27] sm:$0xf] %v703_v47  ;;  %706 = vst [vmem:[%s686_s27 + $0x8] sm:$0xf] %v705_v48 }
 0x1b1   : > { %708 = vst [vmem:[%s686_s27 + $0x10] sm:$0xf] %v707_v49  ;;  %710 = vst [vmem:[%s686_s27 + $0x18] sm:$0xf] %v709_v50 }
 0x1b2 PF: > { %p11_p11 = scmp.ge.s32.totalorder %s999_s19, 4   ;;  %s1130_s15 = smov %s944_s16 }
 0x1b3   : > { %s1131_s16 = smov %s1007_s22  ;;  %s1132_s17 = smov %s999_s19 }
 0x1b4   :  { %13 = sbr.rel (!%p11_p11) target bundleno = 2 (0x2), region = 156 }

// kernel: forward.9
= control target key start
LH: loop header
LB: loop body
LE: loop exit
PB: predicated region body
PF: predicated region fallthrough
CT: control target
= control target key end

     0   :  { %s1217_s15 = smov 0   ;;  %s1219_s16 = smov 0   ;;  %s1397_s0 = inlined_call_operand.vmem [shape: bf16[16,1152], index: 0, kind: input, shape index: {}]   ;;  %s1398_s1 = inlined_call_operand.vmem [shape: bf16[2,16,128], index: 1, kind: input, shape index: {}]   ;;  %s1399_s2 = inlined_call_operand.vmem [shape: bf16[12,144], index: 2, kind: input, shape index: {}]   ;;  %s1400_s3 = inlined_call_operand.vmem [shape: f32[12,1], index: 3, kind: input, shape index: {}]   ;;  %s1401_s4 = inlined_call_operand.vmem [shape: f32[12,768], index: 4, kind: output, shape index: {}]  }
   0x1   :  { %s1221_s17 = smov 0  }
   0x2 LB: > { %s1233_s18 = sadd.s32 4294967295, %s1181_s17   ;;  %s1236_s19 = sadd.s32 1, %s1181_s17   ;;  %s1181_s17 = sphi %s1221_s17, %s1405_s17   ;;  %s1177_s16 = sphi %s1219_s16, %s1404_s16   ;;  %s1173_s15 = sphi %s1217_s15, %s1403_s15  }
   0x3   : > { %s18_s20 = ssub.s32 %s1181_s17, %s1236_s19  ;;  %s21_s21 = sadd.s32 1, %s1177_s16 }
   0x4   : > { %p19_p0 = scmp.eq.s32.totalorder %s18_s20, 0  ;;  %p28_p1 = scmp.ne.s32.totalorder %s1177_s16, %s1173_s15 }
   0x5   : > { %p29_p2 = scmp.eq.s32.totalorder %s1181_s17, 0  ;;  %p126_p3 = scmp.eq.s32.totalorder %s1233_s18, 1 }
   0x6   : > { %s1246_s22 = scalar_select %p19_p0, %s1177_s16, %s21_s21  }
   0x7   : > { %p30_p4 = por %p29_p2, %p28_p1  ;;  %p1248_p5 = por %p126_p3, %p28_p1 }
   0x8   : > { %p1051_p6 = scmp.ge.s32.totalorder %s1181_s17, 2 }
   0xa   : > { %154 = sbr.rel (%p1051_p6) target bundleno = 22 (0x16), region = 24 }
   0xf   : > { %157 = sbr.rel (!%p30_p4) target bundleno = 22 (0x16), region = 28  ;;  %s159_s24 = sand.u32 (%p30_p4), 1, %s1177_s16  }
  0x10   : > { %s1094_s25 = smul.u32 (%p30_p4), 12, %s1181_s17 }
  0x11   : > { %s1097_s26 = smul.u32 (%p30_p4), 24, %s159_s24 }
  0x12   : > { %s164_s29 = scalar_lea.vmem (%p30_p4), %s1397_s0, %s1094_s25 }
  0x13   : > { %v179_v0 = vld [vmem:[%s164_s29] sm:$0xff] (%p30_p4)  ;;  %v1053_v2 = vld [vmem:[%s164_s29 + $0x8] sm:$0xf] (%p30_p4)  ;;  %s161_s30 = scalar_lea.vmem (%p30_p4), [#allocation3], %s1097_s26  ;;  %v1055_v3 = vld [vmem:[%s164_s29 + $0x2c] sm:$0xf] (%p30_p4) }
  0x14   : > { %v181_v1 = vld [vmem:[%s164_s29 + $0x24] sm:$0xff]  ;;  %180 = vst [vmem:[%s161_s30] sm:$0xff] %v179_v0  ;;  %1054 = vst [vmem:[%s161_s30 + $0x8] sm:$0xf] %v1053_v2 }
  0x15   : > { %182 = vst [vmem:[%s161_s30 + $0xc] sm:$0xff] %v181_v1  ;;  %1056 = vst [vmem:[%s161_s30 + $0x14] sm:$0xf] %v1055_v3 }
  0x16 PF: > { %p1057_p7 = scmp.ge.s32.totalorder %s1181_s17, 1  ;;  %p207_p8 = scmp.lt.s32.totalorder %s1181_s17, 3 }
  0x18   : > { %p208_p9 = pnand %p1057_p7, %p207_p8 }
  0x19   : > { %s214_s5 = sand.u32 (!%p208_p9), 1, %s1173_s15   ;;  %p244_p10 = scmp.lt.s32.totalorder (!%p208_p9), %s1233_s18, 1 }
  0x1a   : > { %211 = sbr.rel (%p208_p9) target bundleno = 472 (0x1d8), region = 58  ;;  %s1183_s8 = smov (!%p208_p9), 91  }
  0x1b   : > { %s1098_s6 = smul.u32 (!%p208_p9), 24, %s214_s5  ;;  %s1184_s11 = smov (!%p208_p9), 92  }
  0x1c   : > { %s1186_s17 = smov (!%p208_p9), 108   ;;  %s1187_s20 = smov (!%p208_p9), 109  }
  0x1d   : > { %s1263_s7 = scalar_lea.vmem (!%p208_p9), [#allocation3], %s1098_s6  ;;  %s1188_s21 = smov (!%p208_p9), 110  }
  0x1e   : > { %s1189_s24 = smov (!%p208_p9), 126   ;;  %s1190_s25 = smov (!%p208_p9), 127  }
  0x1f   : > { %v1266_v4 = vld [vmem:[%s1263_s7 + $0xc] sm:$0xff]  ;;  %v1269_v5 = vld [vmem:[%s1263_s7] sm:$0xff]  ;;  %v545_v6 = vld [vmem:[%s1263_s7 + $0x14] sm:$0xf]  ;;  %s245_s9 = scalar_select %p244_p10, %s1233_s18, 1  ;;  %v1185_v12 = vmov 0  }
  0x20   : > { %554 = vrot.lane.b32.xlu1 %v1266_v4, %s1183_s8  ;;  %550 = vrot.lane.b32.xlu0 %v1269_v5, %s1183_s8  ;;  %v543_v7 = vld [vmem:[%s1263_s7 + $0x8] sm:$0xf]  ;;  %v498_v9 = vld [vmem:[%s1263_s7 + $0x14] sm:$0xf]  ;;  %s1191_s28 = smov 90   ;;  %vm839_vm0 = vcmask 130048  }
  0x21   : > { %v496_v8 = vld [vmem:[%s1263_s7 + $0x8] sm:$0xf]  ;;  %s1095_s10 = sshll.u32 %s245_s9, 3  ;;  %886 = vmatprep.subr.bf16.mxu1 %v1185_v12  ;;  %1133 = vset.pattern.permute.xlu0 %v1185_v12  ;;  %v451_v14 = vld [vmem:[%s1263_s7 + $0x14] sm:$0xf]  ;;  %vm572_vm1 = vcmask 740352  }
  0x22   : > { %s1283_s14 = scalar_lea.vmem %s1398_s1, %s1095_s10  ;;  %1134 = vset.pattern.permute.xlu1 %v1185_v12  ;;  %v449_v13 = vld [vmem:[%s1263_s7 + $0x8] sm:$0xf]  ;;  %v404_v18 = vld [vmem:[%s1263_s7 + $0x14] sm:$0xf]  ;;  %v675_v43 = vld [vmem:[%s1400_s3 + $0x8] sm:$0xf] }
  0x23   : > { %v577_v10 = vld [vmem:[%s1283_s14 + $0x4] sm:$0xf]  ;;  %v576_v11 = vld [vmem:[%s1283_s14] sm:$0xf]  ;;  %vm279_vm2 = vcmask 1043456   ;;  %vm563_vm3 = vcmask 744448  }
  0x24   : > { %556 = vrot.lane.b32.xlu1 %v545_v6, %s1183_s8  ;;  %552 = vrot.lane.b32.xlu0 %v543_v7, %s1183_s8  ;;  %v530_v15 = vld [vmem:[%s1283_s14 + $0x4] sm:$0xf]  ;;  %v529_v16 = vld [vmem:[%s1283_s14] sm:$0xf]  ;;  %vm525_vm4 = vcmask 748544   ;;  %vm516_vm5 = vcmask 752640  }
  0x25   : > { %v402_v17 = vld [vmem:[%s1263_s7 + $0x8] sm:$0xf]  ;;  %v483_v19 = vld [vmem:[%s1283_s14 + $0x4] sm:$0xf]  ;;  %vm586_vm6 = vcmask 1044184   ;;  %vm478_vm7 = vcmask 879616  }
  0x26   : > { %v482_v20 = vld [vmem:[%s1283_s14] sm:$0xf]  ;;  %v357_v22 = vld [vmem:[%s1263_s7 + $0x14] sm:$0xf]  ;;  %vm469_vm8 = vcmask 883712   ;;  %vm539_vm9 = vcmask 1044192  }
  0x27   : > { %v355_v21 = vld [vmem:[%s1263_s7 + $0x8] sm:$0xf]  ;;  %v436_v23 = vld [vmem:[%s1283_s14 + $0x4] sm:$0xf]  ;;  %vm431_vm10 = vcmask 887808   ;;  %vm422_vm11 = vcmask 891904  }
  0x28   : > { %505 = vrot.lane.b32.xlu1 %v496_v8, %s1184_s11  ;;  %503 = vrot.lane.b32.xlu0 %v1269_v5, %s1184_s11  ;;  %v435_v24 = vld [vmem:[%s1283_s14] sm:$0xf]  ;;  %v310_v26 = vld [vmem:[%s1263_s7 + $0x14] sm:$0xf]  ;;  %vm492_vm12 = vcmask 1044320   ;;  %vm384_vm13 = vcmask 896000  }
  0x29   : > { %v308_v25 = vld [vmem:[%s1263_s7 + $0x8] sm:$0xf]  ;;  %v389_v27 = vld [vmem:[%s1283_s14 + $0x4] sm:$0xf]  ;;  %vm375_vm14 = vcmask 900096   ;;  %vm445_vm15 = vcmask 1044328  }
  0x2a   : > { %v388_v28 = vld [vmem:[%s1283_s14] sm:$0xf]  ;;  %v262_v30 = vld [vmem:[%s1263_s7 + $0x14] sm:$0xf]  ;;  %s1099_s10 = smul.u32 48, %s214_s5 }
  0x2b   : > { %v260_v29 = vld [vmem:[%s1263_s7 + $0x8] sm:$0xf]  ;;  %v342_v31 = vld [vmem:[%s1283_s14 + $0x4] sm:$0xf]  ;;  %s1096_s15 = smul.u32 (%p1248_p5), 24, %s1233_s18 }
  0x2c   : > { %509 = vrot.lane.b32.xlu1 %v498_v9, %s1184_s11  ;;  %507 = vrot.lane.b32.xlu0 %v1266_v4, %s1184_s11  ;;  %v341_v32 = vld [vmem:[%s1283_s14] sm:$0xf]  ;;  %v254_v34 = vld [vmem:[%s1263_s7 + $0x14] sm:$0xf] }
  0x2d   : > { %v252_v33 = vld [vmem:[%s1263_s7 + $0x8] sm:$0xf]  ;;  %258 = vst [vmem:[#allocation2 + $0x14] sm:$0xf] %v254_v34  ;;  %v295_v35 = vld [vmem:[%s1283_s14 + $0x4] sm:$0xf]  ;;  %s948_s13 = scalar_lea.vmem (%p1248_p5), %s1401_s4, %s1096_s15 }
  0x2e   : > { %256 = vst [vmem:[#allocation2 + $0x8] sm:$0xf] %v252_v33  ;;  %v294_v36 = vld [vmem:[%s1283_s14] sm:$0xf]  ;;  %v592_v39 = vld [vmem:[%s1263_s7 + $0x14] sm:$0xf] }
  0x2f   : > { %v590_v37 = vld [vmem:[%s1263_s7 + $0x8] sm:$0xf]  ;;  %v1146_v38 = vld [vmem:[%s1399_s2 + $0x4] ss:$8 sps:$4 sm:$0x3f]  }
  0x30   : > { %582 = vrot.lane.b32.xlu1 %v577_v10, %s1183_s8  ;;  %580 = vrot.lane.b32.xlu0 %v576_v11, %s1183_s8  ;;  %v624_v40 = vld [vmem:[%s1283_s14 + $0x4] sm:$0xf]  ;;  %v623_v41 = vld [vmem:[%s1283_s14] sm:$0xf] }
  0x31   : > { %1090 = vmatprep.mubr.msk.bf16.mxu1 %vm839_vm0, %v1146_v38  ;;  %1089 = vmatprep.mubr.msk.bf16.mxu0 %vm839_vm0, %v1146_v38  ;;  %v674_v42 = vld [vmem:[%s1400_s3] sm:$0xff]  ;;  %vm337_vm0 = vcmask 1027072  }
  0x34   : > { %458 = vrot.lane.b32.xlu1 %v449_v13, %s1186_s17  ;;  %456 = vrot.lane.b32.xlu0 %v1269_v5, %s1186_s17 }
  0x38   : > { %462 = vrot.lane.b32.xlu1 %v451_v14, %s1186_s17  ;;  %460 = vrot.lane.b32.xlu0 %v1266_v4, %s1186_s17 }
  0x3c   : > { %535 = vrot.lane.b32.xlu1 %v530_v15, %s1184_s11  ;;  %533 = vrot.lane.b32.xlu0 %v529_v16, %s1184_s11  ;;  %s242_s11 = scalar_lea.vmem [#allocation4], %s1099_s10 }
  0x40   : > { %411 = vrot.lane.b32.xlu1 %v402_v17, %s1187_s20  ;;  %409 = vrot.lane.b32.xlu0 %v1269_v5, %s1187_s20 }
  0x44   : > { %415 = vrot.lane.b32.xlu1 %v404_v18, %s1187_s20  ;;  %413 = vrot.lane.b32.xlu0 %v1266_v4, %s1187_s20 }
  0x48   : > { %488 = vrot.lane.b32.xlu1 %v483_v19, %s1186_s17  ;;  %486 = vrot.lane.b32.xlu0 %v482_v20, %s1186_s17 }
  0x4c   : > { %364 = vrot.lane.b32.xlu1 %v355_v21, %s1188_s21  ;;  %362 = vrot.lane.b32.xlu0 %v1269_v5, %s1188_s21 }
  0x50   : > { %368 = vrot.lane.b32.xlu1 %v357_v22, %s1188_s21  ;;  %366 = vrot.lane.b32.xlu0 %v1266_v4, %s1188_s21 }
  0x54   : > { %441 = vrot.lane.b32.xlu1 %v436_v23, %s1187_s20  ;;  %439 = vrot.lane.b32.xlu0 %v435_v24, %s1187_s20 }
  0x58   : > { %317 = vrot.lane.b32.xlu1 %v308_v25, %s1189_s24  ;;  %315 = vrot.lane.b32.xlu0 %v1269_v5, %s1189_s24 }
  0x5c   : > { %321 = vrot.lane.b32.xlu1 %v310_v26, %s1189_s24  ;;  %319 = vrot.lane.b32.xlu0 %v1266_v4, %s1189_s24 }
  0x60   : > { %394 = vrot.lane.b32.xlu1 %v389_v27, %s1188_s21  ;;  %392 = vrot.lane.b32.xlu0 %v388_v28, %s1188_s21 }
  0x64   : > { %269 = vrot.lane.b32.xlu1 %v260_v29, %s1190_s25  ;;  %267 = vrot.lane.b32.xlu0 %v1269_v5, %s1190_s25 }
  0x68   : > { %273 = vrot.lane.b32.xlu1 %v262_v30, %s1190_s25  ;;  %271 = vrot.lane.b32.xlu0 %v1266_v4, %s1190_s25 }
  0x6c   : > { %347 = vrot.lane.b32.xlu1 %v342_v31, %s1189_s24  ;;  %345 = vrot.lane.b32.xlu0 %v341_v32, %s1189_s24 }
  0x70   : > { %300 = vrot.lane.b32.xlu1 %v295_v35, %s1190_s25  ;;  %298 = vrot.lane.b32.xlu0 %v294_v36, %s1190_s25 }
  0x74   : > { %599 = vrot.lane.b32.xlu1 %v590_v37, %s1191_s28  ;;  %597 = vrot.lane.b32.xlu0 %v1269_v5, %s1191_s28 }
  0x78   : > { %603 = vrot.lane.b32.xlu1 %v592_v39, %s1191_s28  ;;  %601 = vrot.lane.b32.xlu0 %v1266_v4, %s1191_s28 }
  0x7c   : > { %629 = vrot.lane.b32.xlu1 %v624_v40, %s1191_s28  ;;  %627 = vrot.lane.b32.xlu0 %v623_v41, %s1191_s28 }
  0x80   : > { %678 = vperm.xlu0 %1133, %v674_v42   ;;  %683 = vperm.xlu1 %1134, %v675_v43  }
  0x92   : > { %v555_v44 = vpop.permute.xlu1 %554  ;;  %v551_v45 = vpop.permute.xlu0 %550 }
  0x93   : > { %v560_v48 = vrot.slane %v555_v44, 4  ;;  %v558_v49 = vrot.slane %v551_v45, 4 }
  0x96   : > { %v557_v46 = vpop.permute.xlu1 %556  ;;  %v553_v47 = vpop.permute.xlu0 %552 }
  0x97   : > { %v561_v50 = vrot.slane %v557_v46, 4  ;;  %575 = vst.msk [vmem:[#allocation2 + $0xbc] sm:$0xf] %vm572_vm1, %v557_v46  ;;  %v559_v51 = vrot.slane %v553_v47, 4  ;;  %573 = vst.msk [vmem:[#allocation2 + $0xb0] sm:$0xf] %vm572_vm1, %v553_v47 }
  0x98   : > { %vm328_vm1 = vcmask 1031168  }
  0x99   : > { %v565_v52 = vsel %vm279_vm2, %v560_v48, %v561_v50  ;;  %v562_v53 = vsel %vm279_vm2, %v558_v49, %v559_v51 }
  0x9a   : > { %v566_v54 = vsel %vm563_vm3, %v555_v44, %v565_v52  ;;  %v564_v55 = vsel %vm563_vm3, %v551_v45, %v562_v53  ;;  %v506_v56 = vpop.permute.xlu1 %505  ;;  %v504_v57 = vpop.permute.xlu0 %503  ;;  %vm398_vm3 = vcmask 1044336  }
  0x9b   : > { %v512_v58 = vrot.slane %v506_v56, 4  ;;  %526 = vst.msk [vmem:[#allocation2 + $0x98] sm:$0xf] %vm525_vm4, %v506_v56  ;;  %v511_v59 = vrot.slane %v504_v57, 4  ;;  %v1084_v60 = vcombine.high %v564_v55, %v566_v54  ;;  %v1083_v61 = vcombine.low %v564_v55, %v566_v54 }
  0x9d   : > { %v515_v62 = vsel %vm279_vm2, %v511_v59, %v512_v58  ;;  %843 = vmatprep.subr.bf16.mxu0 %v1084_v60 }
  0x9e   : > { %v517_v63 = vsel %vm516_vm5, %v504_v57, %v515_v62  ;;  %v510_v0 = vpop.permute.xlu1 %509  ;;  %v508_v1 = vpop.permute.xlu0 %507  ;;  %844 = vmatpush1.bf16.msra.mxu0 %v1083_v61 }
  0x9f   : > { %v514_v2 = vrot.slane %v510_v0, 4  ;;  %528 = vst.msk [vmem:[#allocation2 + $0xa4] sm:$0xf] %vm525_vm4, %v510_v0  ;;  %v513_v3 = vrot.slane %v508_v1, 4  ;;  %vm290_vm4 = vcmask 1035264  }
  0xa1   : > { %v518_v6 = vsel %vm279_vm2, %v513_v3, %v514_v2 }
  0xa2   : > { %v519_v7 = vsel %vm516_vm5, %v508_v1, %v518_v6  ;;  %v583_v8 = vpop.permute.xlu1 %582  ;;  %v581_v9 = vpop.permute.xlu0 %580  ;;  %vm281_vm5 = vcmask 1039360  }
  0xa3   : > { %588 = vst.msk [vmem:[#allocation2 + $0xbc] sm:$0xf] %vm586_vm6, %v583_v8  ;;  %587 = vst.msk [vmem:[#allocation2 + $0xb0] sm:$0xf] %vm586_vm6, %v581_v9  ;;  %v1081_v10 = vcombine.high %v517_v63, %v519_v7  ;;  %v1080_v11 = vcombine.low %v517_v63, %v519_v7  ;;  %vm351_vm6 = vcmask 1044464  }
  0xa5   : > { %845 = vmatprep.subr.bf16.mxu0 %v1081_v10 }
  0xa6   : > { %v459_v13 = vpop.permute.xlu1 %458  ;;  %v457_v14 = vpop.permute.xlu0 %456  ;;  %846 = vmatpush1.bf16.msra.mxu0 %v1080_v11 }
  0xa7   : > { %v465_v15 = vrot.slane %v459_v13, 4  ;;  %479 = vst.msk [vmem:[#allocation2 + $0x80] sm:$0xf] %vm478_vm7, %v459_v13  ;;  %v464_v16 = vrot.slane %v457_v14, 4 }
  0xa9   : > { %v468_v17 = vsel %vm279_vm2, %v464_v16, %v465_v15 }
  0xaa   : > { %v470_v18 = vsel %vm469_vm8, %v457_v14, %v468_v17  ;;  %v463_v19 = vpop.permute.xlu1 %462  ;;  %v461_v20 = vpop.permute.xlu0 %460  ;;  %v1135_v21 = vld [vmem:[#allocation2 + $0xb0] ss:$12 sps:$4 sm:$0xff]  }
  0xab   : > { %v467_v22 = vrot.slane %v463_v19, 4  ;;  %481 = vst.msk [vmem:[#allocation2 + $0x8c] sm:$0xf] %vm478_vm7, %v463_v19  ;;  %v466_v23 = vrot.slane %v461_v20, 4  ;;  %887 = vmatpush1.bf16.msra.mxu1 %v1135_v21  ;;  %vm304_vm7 = vcmask 1044472  }
  0xac   : > { %888 = vmatprep.subr.bf16.mxu1 %v1185_v12 }
  0xad   : > { %v471_v24 = vsel %vm279_vm2, %v466_v23, %v467_v22 }
  0xae   : > { %v472_v25 = vsel %vm469_vm8, %v461_v20, %v471_v24  ;;  %v536_v26 = vpop.permute.xlu1 %535  ;;  %v534_v27 = vpop.permute.xlu0 %533  ;;  %vm619_vm8 = vcmask 732160  }
  0xaf   : > { %541 = vst.msk [vmem:[#allocation2 + $0xa4] sm:$0xf] %vm539_vm9, %v536_v26  ;;  %540 = vst.msk [vmem:[#allocation2 + $0x98] sm:$0xf] %vm539_vm9, %v534_v27  ;;  %v1078_v28 = vcombine.high %v470_v18, %v472_v25  ;;  %v1077_v29 = vcombine.low %v470_v18, %v472_v25  ;;  %vm610_vm9 = vcmask 736256  }
  0xb1   : > { %847 = vmatprep.subr.bf16.mxu0 %v1078_v28 }
  0xb2   : > { %v412_v30 = vpop.permute.xlu1 %411  ;;  %v410_v31 = vpop.permute.xlu0 %409  ;;  %848 = vmatpush1.bf16.msra.mxu0 %v1077_v29 }
  0xb3   : > { %v418_v32 = vrot.slane %v412_v30, 4  ;;  %432 = vst.msk [vmem:[#allocation2 + $0x68] sm:$0xf] %vm431_vm10, %v412_v30  ;;  %v417_v33 = vrot.slane %v410_v31, 4 }
  0xb5   : > { %v421_v34 = vsel %vm279_vm2, %v417_v33, %v418_v32 }
  0xb6   : > { %v423_v35 = vsel %vm422_vm11, %v410_v31, %v421_v34  ;;  %v416_v36 = vpop.permute.xlu1 %415  ;;  %v414_v37 = vpop.permute.xlu0 %413  ;;  %v1136_v38 = vld [vmem:[#allocation2 + $0x98] ss:$12 sps:$4 sm:$0xff]  }
  0xb7   : > { %v420_v39 = vrot.slane %v416_v36, 4  ;;  %434 = vst.msk [vmem:[#allocation2 + $0x74] sm:$0xf] %vm431_vm10, %v416_v36  ;;  %v419_v40 = vrot.slane %v414_v37, 4  ;;  %889 = vmatpush1.bf16.msra.mxu1 %v1136_v38  ;;  %vm633_vm10 = vcmask 1044176  }
  0xb8   : > { %890 = vmatprep.subr.bf16.mxu1 %v1185_v12 }
  0xb9   : > { %v424_v41 = vsel %vm279_vm2, %v419_v40, %v420_v39  ;;  %v1062_v40 = vcombine.low %v1269_v5, %v1266_v4 }
  0xba   : > { %v425_v42 = vsel %vm422_vm11, %v414_v37, %v424_v41  ;;  %v489_v43 = vpop.permute.xlu1 %488  ;;  %v487_v44 = vpop.permute.xlu0 %486  ;;  %v1063_v37 = vcombine.high %v1269_v5, %v1266_v4 }
  0xbb   : > { %494 = vst.msk [vmem:[#allocation2 + $0x8c] sm:$0xf] %vm492_vm12, %v489_v43  ;;  %493 = vst.msk [vmem:[#allocation2 + $0x80] sm:$0xf] %vm492_vm12, %v487_v44  ;;  %v1075_v45 = vcombine.high %v423_v35, %v425_v42  ;;  %v1074_v46 = vcombine.low %v423_v35, %v425_v42 }
  0xbd   : > { %849 = vmatprep.subr.bf16.mxu0 %v1075_v45 }
  0xbe   : > { %v365_v47 = vpop.permute.xlu1 %364  ;;  %v363_v48 = vpop.permute.xlu0 %362  ;;  %850 = vmatpush1.bf16.msra.mxu0 %v1074_v46 }
  0xbf   : > { %v371_v49 = vrot.slane %v365_v47, 4  ;;  %385 = vst.msk [vmem:[#allocation2 + $0x50] sm:$0xf] %vm384_vm13, %v365_v47  ;;  %v370_v50 = vrot.slane %v363_v48, 4 }
  0xc1   : > { %v374_v51 = vsel %vm279_vm2, %v370_v50, %v371_v49 }
  0xc2   : > { %v376_v52 = vsel %vm375_vm14, %v363_v48, %v374_v51  ;;  %v369_v53 = vpop.permute.xlu1 %368  ;;  %v367_v54 = vpop.permute.xlu0 %366  ;;  %v1137_v55 = vld [vmem:[#allocation2 + $0x80] ss:$12 sps:$4 sm:$0xff]   ;;  %v1142_v51 = vld [vmem:[#allocation2 + $0x8] ss:$12 sps:$4 sm:$0xff]  }
  0xc3   : > { %v373_v56 = vrot.slane %v369_v53, 4  ;;  %387 = vst.msk [vmem:[#allocation2 + $0x5c] sm:$0xf] %vm384_vm13, %v369_v53  ;;  %v372_v57 = vrot.slane %v367_v54, 4  ;;  %891 = vmatpush1.bf16.msra.mxu1 %v1137_v55 }
  0xc4   : > { %892 = vmatprep.subr.bf16.mxu1 %v1185_v12 }
  0xc5   : > { %v377_v58 = vsel %vm279_vm2, %v372_v57, %v373_v56 }
  0xc6   : > { %v378_v59 = vsel %vm375_vm14, %v367_v54, %v377_v58  ;;  %v442_v60 = vpop.permute.xlu1 %441  ;;  %v440_v61 = vpop.permute.xlu0 %439  ;;  %v1144_v58 = vld [vmem:[%s1399_s2] ss:$8 sps:$4 sm:$0x3f]  }
  0xc7   : > { %447 = vst.msk [vmem:[#allocation2 + $0x74] sm:$0xf] %vm445_vm15, %v442_v60  ;;  %446 = vst.msk [vmem:[#allocation2 + $0x68] sm:$0xf] %vm445_vm15, %v440_v61  ;;  %v1072_v62 = vcombine.high %v376_v52, %v378_v59  ;;  %v1071_v63 = vcombine.low %v376_v52, %v378_v59 }
  0xc9   : > { %851 = vmatprep.subr.bf16.mxu0 %v1072_v62 }
  0xca   : > { %v318_v0 = vpop.permute.xlu1 %317  ;;  %v316_v1 = vpop.permute.xlu0 %315  ;;  %852 = vmatpush1.bf16.msra.mxu0 %v1071_v63 }
  0xcb   : > { %v324_v2 = vrot.slane %v318_v0, 4  ;;  %338 = vst.msk [vmem:[#allocation2 + $0x38] sm:$0xf] %vm337_vm0, %v318_v0  ;;  %v323_v3 = vrot.slane %v316_v1, 4 }
  0xcd   : > { %v327_v6 = vsel %vm279_vm2, %v323_v3, %v324_v2 }
  0xce   : > { %v329_v7 = vsel %vm328_vm1, %v316_v1, %v327_v6  ;;  %v322_v8 = vpop.permute.xlu1 %321  ;;  %v320_v9 = vpop.permute.xlu0 %319  ;;  %v1138_v10 = vld [vmem:[#allocation2 + $0x68] ss:$12 sps:$4 sm:$0xff]  }
  0xcf   : > { %v326_v11 = vrot.slane %v322_v8, 4  ;;  %340 = vst.msk [vmem:[#allocation2 + $0x44] sm:$0xf] %vm337_vm0, %v322_v8  ;;  %v325_v13 = vrot.slane %v320_v9, 4  ;;  %893 = vmatpush1.bf16.msra.mxu1 %v1138_v10 }
  0xd0   : > { %894 = vmatprep.subr.bf16.mxu1 %v1185_v12 }
  0xd1   : > { %v330_v14 = vsel %vm279_vm2, %v325_v13, %v326_v11 }
  0xd2   : > { %v331_v15 = vsel %vm328_vm1, %v320_v9, %v330_v14  ;;  %v395_v16 = vpop.permute.xlu1 %394  ;;  %v393_v17 = vpop.permute.xlu0 %392 }
  0xd3   : > { %400 = vst.msk [vmem:[#allocation2 + $0x5c] sm:$0xf] %vm398_vm3, %v395_v16  ;;  %399 = vst.msk [vmem:[#allocation2 + $0x50] sm:$0xf] %vm398_vm3, %v393_v17  ;;  %v1069_v18 = vcombine.high %v329_v7, %v331_v15  ;;  %v1068_v19 = vcombine.low %v329_v7, %v331_v15 }
  0xd5   : > { %853 = vmatprep.subr.bf16.mxu0 %v1069_v18 }
  0xd6   : > { %v270_v20 = vpop.permute.xlu1 %269  ;;  %v268_v21 = vpop.permute.xlu0 %267  ;;  %854 = vmatpush1.bf16.msra.mxu0 %v1068_v19 }
  0xd7   : > { %v276_v22 = vrot.slane %v270_v20, 4  ;;  %291 = vst.msk [vmem:[#allocation2 + $0x20] sm:$0xf] %vm290_vm4, %v270_v20  ;;  %v275_v23 = vrot.slane %v268_v21, 4 }
  0xd9   : > { %v280_v24 = vsel %vm279_vm2, %v275_v23, %v276_v22 }
  0xda   : > { %v282_v25 = vsel %vm281_vm5, %v268_v21, %v280_v24  ;;  %v274_v26 = vpop.permute.xlu1 %273  ;;  %v272_v27 = vpop.permute.xlu0 %271  ;;  %v1139_v28 = vld [vmem:[#allocation2 + $0x50] ss:$12 sps:$4 sm:$0xff]  }
  0xdb   : > { %v278_v29 = vrot.slane %v274_v26, 4  ;;  %293 = vst.msk [vmem:[#allocation2 + $0x2c] sm:$0xf] %vm290_vm4, %v274_v26  ;;  %v277_v30 = vrot.slane %v272_v27, 4  ;;  %895 = vmatpush1.bf16.msra.mxu1 %v1139_v28 }
  0xdc   : > { %896 = vmatprep.subr.bf16.mxu1 %v1185_v12 }
  0xdd   : > { %v283_v31 = vsel %vm279_vm2, %v277_v30, %v278_v29 }
  0xde   : > { %v284_v32 = vsel %vm281_vm5, %v272_v27, %v283_v31  ;;  %v348_v33 = vpop.permute.xlu1 %347  ;;  %v346_v34 = vpop.permute.xlu0 %345 }
  0xdf   : > { %353 = vst.msk [vmem:[#allocation2 + $0x44] sm:$0xf] %vm351_vm6, %v348_v33  ;;  %352 = vst.msk [vmem:[#allocation2 + $0x38] sm:$0xf] %vm351_vm6, %v346_v34  ;;  %v1066_v35 = vcombine.high %v282_v25, %v284_v32  ;;  %v1065_v36 = vcombine.low %v282_v25, %v284_v32 }
  0xe1   : > { %855 = vmatprep.subr.bf16.mxu0 %v1066_v35 }
  0xe2   : > { %v301_v38 = vpop.permute.xlu1 %300  ;;  %v299_v39 = vpop.permute.xlu0 %298  ;;  %856 = vmatpush1.bf16.msra.mxu0 %v1065_v36 }
  0xe3   : > { %306 = vst.msk [vmem:[#allocation2 + $0x2c] sm:$0xf] %vm304_vm7, %v301_v38  ;;  %305 = vst.msk [vmem:[#allocation2 + $0x20] sm:$0xf] %vm304_vm7, %v299_v39  ;;  %857 = vmatprep.subr.bf16.mxu0 %v1063_v37 }
  0xe6   : > { %v600_v41 = vpop.permute.xlu1 %599  ;;  %v598_v42 = vpop.permute.xlu0 %597  ;;  %v1140_v43 = vld [vmem:[#allocation2 + $0x38] ss:$12 sps:$4 sm:$0xff]   ;;  %858 = vmatpush1.bf16.msra.mxu0 %v1062_v40 }
  0xe7   : > { %v606_v44 = vrot.slane %v600_v41, 4  ;;  %620 = vst.msk [vmem:[#allocation2 + $0xc8] sm:$0xf] %vm619_vm8, %v600_v41  ;;  %v605_v45 = vrot.slane %v598_v42, 4  ;;  %897 = vmatpush1.bf16.msra.mxu1 %v1140_v43 }
  0xe8   : > { %898 = vmatprep.subr.bf16.mxu1 %v1185_v12 }
  0xe9   : > { %v609_v46 = vsel %vm279_vm2, %v605_v45, %v606_v44 }
  0xea   : > { %v611_v4 = vsel %vm610_vm9, %v598_v42, %v609_v46  ;;  %v604_v5 = vpop.permute.xlu1 %603  ;;  %v602_v47 = vpop.permute.xlu0 %601  ;;  %v1141_v48 = vld [vmem:[#allocation2 + $0x20] ss:$12 sps:$4 sm:$0xff]  }
  0xeb   : > { %v608_v49 = vrot.slane %v604_v5, 4  ;;  %622 = vst.msk [vmem:[#allocation2 + $0xd4] sm:$0xf] %vm619_vm8, %v604_v5  ;;  %v607_v50 = vrot.slane %v602_v47, 4  ;;  %899 = vmatpush1.bf16.msra.mxu1 %v1141_v48 }
  0xec   : > { %900 = vmatprep.subr.bf16.mxu1 %v1185_v12 }
  0xed   : > { %v612_v52 = vsel %vm279_vm2, %v607_v50, %v608_v49 }
  0xee   : > { %v613_v53 = vsel %vm610_vm9, %v602_v47, %v612_v52  ;;  %v630_v54 = vpop.permute.xlu1 %629  ;;  %v628_v55 = vpop.permute.xlu0 %627 }
  0xef   : > { %635 = vst.msk [vmem:[#allocation2 + $0xd4] sm:$0xf] %vm633_vm10, %v630_v54  ;;  %634 = vst.msk [vmem:[#allocation2 + $0xc8] sm:$0xf] %vm633_vm10, %v628_v55  ;;  %v1087_v56 = vcombine.high %v611_v4, %v613_v53  ;;  %v1086_v57 = vcombine.low %v611_v4, %v613_v53  ;;  %901 = vmatpush1.bf16.msra.mxu1 %v1142_v51 }
  0xf0   : > { %916 = vmatprep.subr.bf16.mxu1 %v1185_v12 }
  0xf1   : > { %873 = vmatprep.subr.bf16.mxu0 %v1087_v56 }
  0xf2   : > { %874 = vmatpush2.bf16.msra.mxu0 %v1086_v57 }
  0xf5   : > { %876 = vmatmul.mubr.bf16.vlgmr.msra.gmra.mxu0 %v1144_v58 }
  0xf6   : > { %v1143_v59 = vld [vmem:[#allocation2 + $0xc8] ss:$12 sps:$4 sm:$0xff]  }
  0xf7   : > { %917 = vmatpush2.bf16.msra.mxu1 %v1143_v59 }
  0xfa   : > { %919 = vmatmul.mubr.bf16.vlgmr.msra.gmra.mxu1 %v1144_v58 }
  0xfb   : > { %v679_v60 = vpop.permute.xlu0 %678  ;;  %v684_v0 = vpop.permute.xlu1 %683 }
 0x1b5   : > { %v877_v61 = vpop.f32.mrf.mxu0 }
 0x1b6   : > { %v878_v62 = vadd.f32 %v877_v61, %v679_v60 }
 0x1b7   : > { %v879_v63 = vpop.f32.mrf.mxu0 }
 0x1b8   : > { %1147 = vtanh.f32 %v878_v62  ;;  %v880_v1 = vadd.f32 %v879_v63, %v679_v60 }
 0x1b9   : > { %v881_v2 = vpop.f32.mrf.mxu0 }
 0x1ba   : > { %1149 = vtanh.f32 %v880_v1  ;;  %v882_v12 = vadd.f32 %v881_v2, %v684_v0  ;;  %v920_v3 = vpop.f32.mrf.mxu1 }
 0x1bb   : > { %v883_v6 = vpop.f32.mrf.mxu0  ;;  %v921_v7 = vadd.f32 %v920_v3, %v679_v60 }
 0x1bc   : > { %1151 = vtanh.f32 %v882_v12  ;;  %v884_v8 = vadd.f32 %v883_v6, %v684_v0  ;;  %v922_v9 = vpop.f32.mrf.mxu1 }
 0x1bd   : > { %1153 = vtanh.f32 %v921_v7 }
 0x1be   : > { %v923_v10 = vpop.f32.mrf.mxu1  ;;  %1155 = vtanh.f32 %v884_v8 }
 0x1bf   : > { %v924_v11 = vadd.f32 %v923_v10, %v684_v0 }
 0x1c0   : > { %v925_v13 = vpop.f32.mrf.mxu1 }
 0x1c1   : > { %1157 = vtanh.f32 %v924_v11 }
 0x1c5   : > { %v1148_v14 = vpop.eup %1147 }
 0x1c6   : > { %933 = vst [vmem:[%s242_s11] sm:$0xff] %v1148_v14 }
 0x1c7   : > { %v1150_v15 = vpop.eup %1149 }
 0x1c8   : > { %934 = vst [vmem:[%s242_s11 + $0x8] sm:$0xff] %v1150_v15 }
 0x1c9   : > { %v1152_v16 = vpop.eup %1151 }
 0x1ca   : > { %936 = vst [vmem:[%s242_s11 + $0x18] sm:$0xf] %v1152_v16  ;;  %v1154_v17 = vpop.eup %1153 }
 0x1cb   : > { %v1156_v18 = vpop.eup %1155  ;;  %935 = vst [vmem:[%s242_s11 + $0x10] sm:$0xff] %v1154_v17  ;;  %945 = sbr.rel (!%p1248_p5) target bundleno = 472 (0x1d8), region = 66 }
 0x1cc   : > { %937 = vst [vmem:[%s242_s11 + $0x20] sm:$0xf] %v1156_v18 }
 0x1cd   : > { %v961_v20 = vld [vmem:[%s242_s11] sm:$0xff] (%p1248_p5) }
 0x1ce   : > { %v1158_v19 = vpop.eup %1157  ;;  %962 = vst [vmem:[%s948_s13] sm:$0xff] (%p1248_p5), %v961_v20 }
 0x1cf   : > { %938 = vst [vmem:[%s242_s11 + $0x28] sm:$0xf] %v1158_v19  ;;  %v963_v21 = vld [vmem:[%s242_s11 + $0x8] sm:$0xff] (%p1248_p5) }
 0x1d0   : > { %964 = vst [vmem:[%s948_s13 + $0x8] sm:$0xff] %v963_v21 }
 0x1d1   : > { %v967_v23 = vld [vmem:[%s242_s11 + $0x18] sm:$0xff] }
 0x1d2   : > { %v965_v22 = vld [vmem:[%s242_s11 + $0x10] sm:$0xff]  ;;  %968 = vst [vmem:[%s948_s13 + $0x30] sm:$0xff] %v967_v23 }
 0x1d3   : > { %v969_v24 = vld [vmem:[%s242_s11 + $0x20] sm:$0xff]  ;;  %966 = vst [vmem:[%s948_s13 + $0x10] sm:$0xff] %v965_v22 }
 0x1d4   : > { %970 = vst [vmem:[%s948_s13 + $0x38] sm:$0xff] %v969_v24 }
 0x1d6   : > { %v971_v25 = vld [vmem:[%s242_s11 + $0x28] sm:$0xff] }
 0x1d7   : > { %972 = vst [vmem:[%s948_s13 + $0x40] sm:$0xff] %v971_v25 }
 0x1d8 PF: > { %p11_p11 = scmp.ge.s32.totalorder %s1236_s19, 4   ;;  %s1403_s15 = smov %s1177_s16 }
 0x1d9   : > { %s1404_s16 = smov %s1246_s22  ;;  %s1405_s17 = smov %s1236_s19 }
 0x1da   :  { %13 = sbr.rel (!%p11_p11) target bundleno = 2 (0x2), region = 129 }

</bundles_post_ra>
